<compile_context>
chip_gen: v7x
topology: tpu7x:2x2x1
jax: 0.10.0
libtpu: 0.0.40
codegen_flags: <defaults>
</compile_context>

<pallas_src>
import jax
import jax.numpy as jnp
from jax.experimental import pallas as pl
from jax.experimental.pallas import tpu as pltpu

MAX_R = 100      # args.max_r (must be 100: fc3 emits 100 features into fc_final)
F_IN = 2048

# MXU/lane-aligned padded MLP dims (weights are zero-padded; math is identical).
H1_PAD = 256     # fc2 out: 200 -> 256
H2_PAD = 128     # fc3 out: 100 -> 128
OUT_PAD = 128    # fc_final out: 1 -> 128 (only column 0 is meaningful)


# ----------------------------------------------------------------------------
# Kernel 1: per-tile score == Linear(2048, 1) over (B*T, 2048).  HBM-bound.
# ----------------------------------------------------------------------------
def score_kernel(x_ref, w_ref, b_ref, o_ref):
    # x_ref: (tm, F) in the input dtype (bf16 preferred), w_ref: (F, 1) same dtype,
    # b_ref: (1,) f32 scalar in SMEM, o_ref: (tm, 1) f32.
    s = jnp.dot(x_ref[...], w_ref[...], preferred_element_type=jnp.float32)
    o_ref[...] = s + b_ref[0]


def score_linear(x2d, w_score, b_score, tm=512):
    BT, F = x2d.shape
    grid = (pl.cdiv(BT, tm),)          # remainder rows handled by the partial last block
    return pl.pallas_call(
        score_kernel,
        out_shape=jax.ShapeDtypeStruct((BT, 1), jnp.float32),
        grid_spec=pltpu.PrefetchScalarGridSpec(
            num_scalar_prefetch=0,
            grid=grid,
            in_specs=[
                pl.BlockSpec((tm, F), lambda i: (i, 0)),
                pl.BlockSpec((F, 1), lambda i: (0, 0)),
                pl.BlockSpec(memory_space=pltpu.MemorySpace.SMEM),   # scalar bias
            ],
            out_specs=pl.BlockSpec((tm, 1), lambda i: (i, 0)),
        ),
        compiler_params=pltpu.CompilerParams(
            dimension_semantics=("parallel",),   # megacore-friendly on v7x
        ),
    )(x2d, w_score, b_score)


# ----------------------------------------------------------------------------
# Kernel 2: fused MLP head  (fc2 -> sigmoid -> fc3 -> sigmoid -> fc4 -> sigmoid)
#           All hidden dims are zero-padded to 256/128 so matmuls are MXU/lane
#           aligned.  Total work is ~0.5 MFLOP; a single un-gridded call.
# ----------------------------------------------------------------------------
def mlp_kernel(x_ref, w2_ref, b2_ref, w3_ref, b3_ref, w4_ref, b4_ref, o_ref):
    x = x_ref[...]                                                   # (B, 2*max_r)
    h1 = jax.nn.sigmoid(
        jnp.dot(x, w2_ref[...], preferred_element_type=jnp.float32) + b2_ref[...]
    )
    # TODO(synk): dropout1 treated as identity (eval mode).
    h2 = jax.nn.sigmoid(
        jnp.dot(h1, w3_ref[...], preferred_element_type=jnp.float32) + b3_ref[...]
    )
    # TODO(synk): dropout2 treated as identity (eval mode).
    y = jnp.dot(h2, w4_ref[...], preferred_element_type=jnp.float32) + b4_ref[...]
    o_ref[...] = jax.nn.sigmoid(y)                                   # last_activation


def mlp_head(x_cat, params):
    B = x_cat.shape[0]
    y = pl.pallas_call(
        mlp_kernel,
        out_shape=jax.ShapeDtypeStruct((B, OUT_PAD), jnp.float32),
        in_specs=[pl.BlockSpec(memory_space=pltpu.MemorySpace.VMEM)] * 7,
        out_specs=pl.BlockSpec(memory_space=pltpu.MemorySpace.VMEM),
    )(x_cat, params["w2"], params["b2"], params["w3"], params["b3"],
      params["w4"], params["b4"])
    return y[:, :1]                      # only column 0 is the real fc_final output


# ----------------------------------------------------------------------------
# Full forward (glue in plain JAX: reshape, top/bottom-k, concat)
# ----------------------------------------------------------------------------
def model_forward(x, params, max_r=MAX_R):
    B, T, F = x.shape
    # Cast to bf16 at the kernel boundary: halves HBM bytes read by the
    # bandwidth-bound score kernel (free if the caller already supplies bf16).
    x2d = x.reshape(B * T, F).astype(jnp.bfloat16)
    w_score = params["w_score"].astype(jnp.bfloat16)

    scores = score_linear(x2d, w_score, params["b_score"])          # (B*T, 1) f32
    tile_score = scores.reshape(B, T)

    # Equivalent to: xs = sort(tile_score, descending); cat(xs[:, :max_r], xs[:, T-max_r:])
    top = jax.lax.top_k(tile_score, max_r)[0]                       # k largest, descending
    bot = -jax.lax.top_k(-tile_score, max_r)[0][:, ::-1]            # k smallest, descending
    x_cat = jnp.concatenate([top, bot], axis=1)                     # (B, 2*max_r)

    out = mlp_head(x_cat, params)                                   # (B, 1)
    return out, tile_score


# ----------------------------------------------------------------------------
# Deterministic parameter init (synthetic; matches the module's layer shapes,
# then zero-pads the MLP weights to MXU/lane-aligned sizes).
# ----------------------------------------------------------------------------
def init_params(key, max_r=MAX_R):
    ks = jax.random.split(key, 8)

    def lin(kw, kb, fan_in, fan_out):
        lim = 1.0 / jnp.sqrt(jnp.float32(fan_in))
        w = jax.random.uniform(kw, (fan_in, fan_out), jnp.float32, -lim, lim)
        b = jax.random.uniform(kb, (1, fan_out), jnp.float32, -lim, lim)
        return w, b

    w_score, b_score = lin(ks[0], ks[1], F_IN, 1)    # nn.Linear(2048, 1), stored (F, 1)
    w2, b2 = lin(ks[2], ks[3], 2 * max_r, 200)       # fc2
    w3, b3 = lin(ks[4], ks[5], 200, 100)             # fc3
    w4, b4 = lin(ks[6], ks[7], max_r, 1)             # fc_final / fc4  (max_r == 100)

    def pad2(a, shape):
        out = jnp.zeros(shape, jnp.float32)
        return out.at[: a.shape[0], : a.shape[1]].set(a)

    return {
        "w_score": w_score,                          # (2048, 1)
        "b_score": b_score.reshape(1),               # (1,) scalar -> SMEM in-kernel
        "w2": pad2(w2, (2 * max_r, H1_PAD)), "b2": pad2(b2, (1, H1_PAD)),
        "w3": pad2(w3, (H1_PAD, H2_PAD)),    "b3": pad2(b3, (1, H2_PAD)),
        "w4": pad2(w4, (H2_PAD, OUT_PAD)),   "b4": pad2(b4, (1, OUT_PAD)),
    }


if __name__ == "__main__":
    # T >= max_r so the top/bottom concat is well-formed; B*T = 1024 gives the
    # score kernel two tm=512 grid steps (both TensorCores get work on v7x).
    B, T = 2, 512
    key = jax.random.PRNGKey(0)
    x = jax.random.normal(key, (B, T, F_IN), dtype=jnp.float32).astype(jnp.bfloat16)

    params = init_params(jax.random.PRNGKey(42))

    fwd = jax.jit(model_forward)
    out, tile_score = fwd(x, params)
    out = jax.block_until_ready(out)
    tile_score = jax.block_until_ready(tile_score)

    assert out.shape == (B, 1)
    assert tile_score.shape == (B, T)
    assert bool(jnp.all(jnp.isfinite(out)))
    assert bool(jnp.all(jnp.isfinite(tile_score)))

    print("KERNEL_OK")
</pallas_src>

<mosaic_0001>
module attributes {stable_mosaic.version = 11 : i64} {
  func.func @score_kernel(%arg0: i32, %arg1: memref<512x2048xbf16, #tpu.memory_space<vmem>>, %arg2: memref<2048x1xbf16, #tpu.memory_space<vmem>>, %arg3: memref<1xf32, #tpu.memory_space<smem>>, %arg4: memref<512x1xf32, #tpu.memory_space<vmem>>) attributes {dimension_semantics = [#tpu.dimension_semantics<parallel>], iteration_bounds = array<i64: 2>, scalar_prefetch = 0 : i64, scratch_operands = 0 : i64, tpu.core_type = #tpu.core_type<tc>, window_params = [{transform_indices = @transform_0, window_bounds = array<i64: 512, 2048>}, {pipeline_mode = #tpu.pipeline_mode<synchronous>, transform_indices = @transform_1, window_bounds = array<i64: 2048, 1>}, {transform_indices = @transform_2, window_bounds = array<i64: 1>}, {transform_indices = @transform_3, window_bounds = array<i64: 512, 1>}]} {
    %c0 = arith.constant 0 : index
    %c0_0 = arith.constant 0 : index
    %0 = vector.load %arg1[%c0, %c0_0] : memref<512x2048xbf16, #tpu.memory_space<vmem>>, vector<512x2048xbf16>
    %c0_1 = arith.constant 0 : index
    %c0_2 = arith.constant 0 : index
    %1 = vector.load %arg2[%c0_1, %c0_2] : memref<2048x1xbf16, #tpu.memory_space<vmem>>, vector<2048x1xbf16>
    %cst = arith.constant dense<0.000000e+00> : vector<512x1xf32>
    %2 = tpu.matmul %0, %1, %cst {dimension_numbers = #tpu.dot_dimension_numbers<[1], [0], [0], [1], [0, 0, 1, 1], [], []>} : vector<512x2048xbf16>, vector<2048x1xbf16>, vector<512x1xf32> -> vector<512x1xf32>
    %c0_3 = arith.constant 0 : index
    %3 = memref.load %arg3[%c0_3] : memref<1xf32, #tpu.memory_space<smem>>
    %4 = vector.broadcast %3 : f32 to vector<512x1xf32>
    %5 = arith.addf %2, %4 : vector<512x1xf32>
    %c0_4 = arith.constant 0 : index
    %c0_5 = arith.constant 0 : index
    %6 = vector.load %arg4[%c0_4, %c0_5] : memref<512x1xf32, #tpu.memory_space<vmem>>, vector<512x1xf32>
    tpu.vector_store %arg4[%c0_4, %c0_5], %5 {strides = array<i32>} : memref<512x1xf32, #tpu.memory_space<vmem>>, vector<512x1xf32>,
    return
  }
  func.func @transform_0(%arg0: i32) -> (i32, i32) {
    %c0_i32 = arith.constant 0 : i32
    %c0_i32_0 = arith.constant 0 : i32
    return %arg0, %c0_i32 : i32, i32
  }
  func.func @transform_1(%arg0: i32) -> (i32, i32) {
    %c0_i32 = arith.constant 0 : i32
    %c0_i32_0 = arith.constant 0 : i32
    %c0_i32_1 = arith.constant 0 : i32
    return %c0_i32, %c0_i32_0 : i32, i32
  }
  func.func @transform_2(%arg0: i32) -> i32 {
    %c0_i32 = arith.constant 0 : i32
    %c0_i32_0 = arith.constant 0 : i32
    return %c0_i32 : i32
  }
  func.func @transform_3(%arg0: i32) -> (i32, i32) {
    %c0_i32 = arith.constant 0 : i32
    %c0_i32_0 = arith.constant 0 : i32
    return %arg0, %c0_i32 : i32, i32
  }
}

module attributes {stable_mosaic.version = 11 : i64} {
  func.func @mlp_kernel(%arg0: memref<2x200xf32, #tpu.memory_space<vmem>>, %arg1: memref<200x256xf32, #tpu.memory_space<vmem>>, %arg2: memref<1x256xf32, #tpu.memory_space<vmem>>, %arg3: memref<256x128xf32, #tpu.memory_space<vmem>>, %arg4: memref<1x128xf32, #tpu.memory_space<vmem>>, %arg5: memref<128x128xf32, #tpu.memory_space<vmem>>, %arg6: memref<1x128xf32, #tpu.memory_space<vmem>>, %arg7: memref<2x128xf32, #tpu.memory_space<vmem>>) attributes {dimension_semantics = [], scalar_prefetch = 0 : i64, scratch_operands = 0 : i64, tpu.core_type = #tpu.core_type<tc>} {
    %c0 = arith.constant 0 : index
    %c0_0 = arith.constant 0 : index
    %0 = vector.load %arg0[%c0, %c0_0] : memref<2x200xf32, #tpu.memory_space<vmem>>, vector<2x200xf32>
    %c0_1 = arith.constant 0 : index
    %c0_2 = arith.constant 0 : index
    %1 = vector.load %arg1[%c0_1, %c0_2] : memref<200x256xf32, #tpu.memory_space<vmem>>, vector<200x256xf32>
    %cst = arith.constant dense<0.000000e+00> : vector<2x256xf32>
    %2 = tpu.matmul %0, %1, %cst {dimension_numbers = #tpu.dot_dimension_numbers<[1], [0], [0], [1], [0, 0, 1, 1], [], []>} : vector<2x200xf32>, vector<200x256xf32>, vector<2x256xf32> -> vector<2x256xf32>
    %c0_3 = arith.constant 0 : index
    %c0_4 = arith.constant 0 : index
    %3 = vector.load %arg2[%c0_3, %c0_4] : memref<1x256xf32, #tpu.memory_space<vmem>>, vector<1x256xf32>
    %4 = vector.broadcast %3 : vector<1x256xf32> to vector<2x256xf32>
    %5 = arith.addf %2, %4 : vector<2x256xf32>
    %6 = arith.negf %5 : vector<2x256xf32>
    %7 = math.exp %6 : vector<2x256xf32>
    %cst_5 = arith.constant 1.000000e+00 : f32
    %8 = vector.broadcast %cst_5 : f32 to vector<2x256xf32>
    %9 = arith.addf %8, %7 : vector<2x256xf32>
    %10 = arith.divf %8, %9 : vector<2x256xf32>
    %c0_6 = arith.constant 0 : index
    %c0_7 = arith.constant 0 : index
    %11 = vector.load %arg3[%c0_6, %c0_7] : memref<256x128xf32, #tpu.memory_space<vmem>>, vector<256x128xf32>
    %cst_8 = arith.constant dense<0.000000e+00> : vector<2x128xf32>
    %12 = tpu.matmul %10, %11, %cst_8 {dimension_numbers = #tpu.dot_dimension_numbers<[1], [0], [0], [1], [0, 0, 1, 1], [], []>} : vector<2x256xf32>, vector<256x128xf32>, vector<2x128xf32> -> vector<2x128xf32>
    %c0_9 = arith.constant 0 : index
    %c0_10 = arith.constant 0 : index
    %13 = vector.load %arg4[%c0_9, %c0_10] : memref<1x128xf32, #tpu.memory_space<vmem>>, vector<1x128xf32>
    %14 = vector.broadcast %13 : vector<1x128xf32> to vector<2x128xf32>
    %15 = arith.addf %12, %14 : vector<2x128xf32>
    %16 = arith.negf %15 : vector<2x128xf32>
    %17 = math.exp %16 : vector<2x128xf32>
    %cst_11 = arith.constant 1.000000e+00 : f32
    %18 = vector.broadcast %cst_11 : f32 to vector<2x128xf32>
    %19 = arith.addf %18, %17 : vector<2x128xf32>
    %20 = arith.divf %18, %19 : vector<2x128xf32>
    %c0_12 = arith.constant 0 : index
    %c0_13 = arith.constant 0 : index
    %21 = vector.load %arg5[%c0_12, %c0_13] : memref<128x128xf32, #tpu.memory_space<vmem>>, vector<128x128xf32>
    %cst_14 = arith.constant dense<0.000000e+00> : vector<2x128xf32>
    %22 = tpu.matmul %20, %21, %cst_14 {dimension_numbers = #tpu.dot_dimension_numbers<[1], [0], [0], [1], [0, 0, 1, 1], [], []>} : vector<2x128xf32>, vector<128x128xf32>, vector<2x128xf32> -> vector<2x128xf32>
    %c0_15 = arith.constant 0 : index
    %c0_16 = arith.constant 0 : index
    %23 = vector.load %arg6[%c0_15, %c0_16] : memref<1x128xf32, #tpu.memory_space<vmem>>, vector<1x128xf32>
    %24 = vector.broadcast %23 : vector<1x128xf32> to vector<2x128xf32>
    %25 = arith.addf %22, %24 : vector<2x128xf32>
    %26 = arith.negf %25 : vector<2x128xf32>
    %27 = math.exp %26 : vector<2x128xf32>
    %cst_17 = arith.constant 1.000000e+00 : f32
    %28 = vector.broadcast %cst_17 : f32 to vector<2x128xf32>
    %29 = arith.addf %28, %27 : vector<2x128xf32>
    %30 = arith.divf %28, %29 : vector<2x128xf32>
    %c0_18 = arith.constant 0 : index
    %c0_19 = arith.constant 0 : index
    %31 = vector.load %arg7[%c0_18, %c0_19] : memref<2x128xf32, #tpu.memory_space<vmem>>, vector<2x128xf32>
    tpu.vector_store %arg7[%c0_18, %c0_19], %30 {strides = array<i32>} : memref<2x128xf32, #tpu.memory_space<vmem>>, vector<2x128xf32>,
    return
  }
}

</mosaic_0001>

<bundles_post_ra>
// kernel: neg.2
= control target key start
LH: loop header
LB: loop body
LE: loop exit
PB: predicated region body
PF: predicated region fallthrough
CT: control target
= control target key end

     0   :  { %s72_s0 = inlined_call_operand.vmem [shape: f32[2,512], index: 0, kind: input, shape index: {}]   ;;  %s73_s1 = inlined_call_operand.vmem [shape: f32[2,512], index: 1, kind: output, shape index: {}]  }
   0x1   :  { %v2_v0 = vld [vmem:[%s72_s0] sm:$0x3]  ;;  %v32_v1 = vld [vmem:[%s72_s0 + $0x2] sm:$0x3]  ;;  %v34_v2 = vld [vmem:[%s72_s0 + $0x4] sm:$0x3] }
   0x2   :  { %v5_v3 = vxor.u32 2147483648, %v2_v0  ;;  %v12_v4 = vxor.u32 2147483648, %v32_v1  ;;  %v20_v5 = vxor.u32 2147483648, %v34_v2  ;;  %v36_v6 = vld [vmem:[%s72_s0 + $0x6] sm:$0x3] }
   0x3   :  { %v28_v7 = vxor.u32 2147483648, %v36_v6 }
   0x4   :  { %7 = vst [vmem:[%s73_s1] sm:$0x3] %v5_v3  ;;  %33 = vst [vmem:[%s73_s1 + $0x2] sm:$0x3] %v12_v4 }
   0x5   :  { %35 = vst [vmem:[%s73_s1 + $0x4] sm:$0x3] %v20_v5  ;;  %37 = vst [vmem:[%s73_s1 + $0x6] sm:$0x3] %v28_v7 }

// kernel: neg.3
= control target key start
LH: loop header
LB: loop body
LE: loop exit
PB: predicated region body
PF: predicated region fallthrough
CT: control target
= control target key end

     0   :  { %s24_s0 = inlined_call_operand.vmem [shape: f32[2,100], index: 0, kind: input, shape index: {}]   ;;  %s25_s1 = inlined_call_operand.vmem [shape: f32[2,100], index: 1, kind: output, shape index: {}]  }
   0x1   :  { %v2_v0 = vld [vmem:[%s24_s0] sm:$0x3] }
   0x2   :  { %v5_v1 = vxor.u32 2147483648, %v2_v0 }
   0x4   :  { %7 = vst [vmem:[%s25_s1] sm:$0x3] %v5_v1 }

// kernel: model_forward.3
= control target key start
LH: loop header
LB: loop body
LE: loop exit
PB: predicated region body
PF: predicated region fallthrough
CT: control target
= control target key end

     0   :  { %vm99_vm0 = vcmask 588800   ;;  %vm623_vm1 = vmmov 0   ;;  %s979_s1 = inlined_call_operand.vmem [shape: f32[200,256], index: 1, kind: input, shape index: {}]   ;;  %s980_s0 = inlined_call_operand.vmem [shape: f32[2,200], index: 0, kind: input, shape index: {}]   ;;  %s981_s3 = inlined_call_operand.vmem [shape: f32[256,128], index: 3, kind: input, shape index: {}]   ;;  %s982_s2 = inlined_call_operand.vmem [shape: f32[1,256], index: 2, kind: input, shape index: {}]   ;;  %s983_s5 = inlined_call_operand.vmem [shape: f32[128,128], index: 5, kind: input, shape index: {}]   ;;  %s984_s4 = inlined_call_operand.vmem [shape: f32[1,128], index: 4, kind: input, shape index: {}]   ;;  %s985_s6 = inlined_call_operand.vmem [shape: f32[1,128], index: 6, kind: input, shape index: {}]   ;;  %s986_s7 = inlined_call_operand.vmem [shape: f32[2,128], index: 7, kind: output, shape index: {}]  }
   0x1   :  { %v28_v0 = vld [vmem:[%s979_s1 + $0x8] sm:$0xff]  ;;  %v30_v1 = vld [vmem:[%s979_s1 + $0x18] sm:$0xff]  ;;  %v27_v2 = vld [vmem:[%s979_s1] sm:$0xff] }
   0x2   :  { %v499_v3 = vpack.c.bf16 %v30_v1, %v28_v0  ;;  %v29_v4 = vld [vmem:[%s979_s1 + $0x10] sm:$0xff]  ;;  %v32_v5 = vld [vmem:[%s979_s1 + $0x28] sm:$0xff]  ;;  %v34_v6 = vld [vmem:[%s979_s1 + $0x38] sm:$0xff] }
   0x3   :  { %v501_v7 = vpack.c.bf16 %v29_v4, %v27_v2  ;;  %v503_v8 = vpack.c.bf16 %v34_v6, %v32_v5  ;;  %v31_v9 = vld [vmem:[%s979_s1 + $0x20] sm:$0xff]  ;;  %v33_v10 = vld [vmem:[%s979_s1 + $0x30] sm:$0xff]  ;;  %v36_v11 = vld [vmem:[%s979_s1 + $0x48] sm:$0xff] }
   0x4   :  { %500 = vmatprep.subr.bf16.mxu0 %v499_v3  ;;  %v38_v12 = vld [vmem:[%s979_s1 + $0x58] sm:$0xff]  ;;  %v505_v13 = vpack.c.bf16 %v33_v10, %v31_v9  ;;  %v35_v15 = vld [vmem:[%s979_s1 + $0x40] sm:$0xff]  ;;  %v37_v16 = vld [vmem:[%s979_s1 + $0x50] sm:$0xff] }
   0x5   :  { %502 = vmatpush1.bf16.msra.mxu0 %v501_v7  ;;  %v507_v14 = vpack.c.bf16 %v38_v12, %v36_v11  ;;  %v40_v17 = vld [vmem:[%s979_s1 + $0x68] sm:$0xff]  ;;  %v42_v18 = vld [vmem:[%s979_s1 + $0x78] sm:$0xff]  ;;  %v509_v19 = vpack.c.bf16 %v37_v16, %v35_v15  ;;  %v39_v21 = vld [vmem:[%s979_s1 + $0x60] sm:$0xff] }
   0x6   :  { %504 = vmatprep.subr.bf16.mxu0 %v503_v8  ;;  %v511_v20 = vpack.c.bf16 %v42_v18, %v40_v17  ;;  %v41_v22 = vld [vmem:[%s979_s1 + $0x70] sm:$0xff]  ;;  %v44_v23 = vld [vmem:[%s979_s1 + $0x88] sm:$0xff]  ;;  %v46_v24 = vld [vmem:[%s979_s1 + $0x98] sm:$0xff] }
   0x7   :  { %v513_v25 = vpack.c.bf16 %v41_v22, %v39_v21  ;;  %v515_v26 = vpack.c.bf16 %v46_v24, %v44_v23  ;;  %v43_v27 = vld [vmem:[%s979_s1 + $0x80] sm:$0xff]  ;;  %v45_v28 = vld [vmem:[%s979_s1 + $0x90] sm:$0xff]  ;;  %v48_v29 = vld [vmem:[%s979_s1 + $0xa8] sm:$0xff] }
   0x8   :  { %v50_v30 = vld [vmem:[%s979_s1 + $0xb8] sm:$0xff]  ;;  %v517_v31 = vpack.c.bf16 %v45_v28, %v43_v27  ;;  %v47_v32 = vld [vmem:[%s979_s1 + $0xa0] sm:$0xff]  ;;  %v49_v35 = vld [vmem:[%s979_s1 + $0xb0] sm:$0xff] }
   0x9   :  { %506 = vmatpush1.bf16.msra.mxu0 %v505_v13  ;;  %v737_v33 = vld.sshfl [vmem:[%s980_s0] sm:$0x33 pattern:$0x76325410]  ;;  %v519_v34 = vpack.c.bf16 %v50_v30, %v48_v29  ;;  %v202_v38 = vld [vmem:[%s981_s3 + $0x88] sm:$0xff]  ;;  %v54_v40 = vld [vmem:[%s979_s1 + $0xd8] sm:$0xff]  ;;  %v521_v42 = vpack.c.bf16 %v49_v35, %v47_v32 }
   0xa   :  { %508 = vmatprep.subr.bf16.mxu0 %v507_v14  ;;  %v97_v36 = vcombine.high %v737_v33, %v737_v33  ;;  %v201_v37 = vld [vmem:[%s981_s3 + $0x80] sm:$0xff]  ;;  %v52_v39 = vld [vmem:[%s979_s1 + $0xc8] sm:$0xff]  ;;  %v53_v45 = vld [vmem:[%s979_s1 + $0xd0] sm:$0xff] }
   0xb   :  { %v547_v41 = vpack.c.bf16 %v202_v38, %v201_v37  ;;  %v523_v43 = vpack.c.bf16 %v54_v40, %v52_v39  ;;  %v51_v44 = vld [vmem:[%s979_s1 + $0xc0] sm:$0xff]  ;;  %v56_v46 = vld [vmem:[%s979_s1 + $0xe8] sm:$0xff]  ;;  %v58_v47 = vld [vmem:[%s979_s1 + $0xf8] sm:$0xff] }
   0xc   :  { %405 = vmatprep.mubr.msk.f32.mxu0 %vm99_vm0, %v97_v36  ;;  %v525_v48 = vpack.c.bf16 %v53_v45, %v51_v44  ;;  %v527_v49 = vpack.c.bf16 %v58_v47, %v56_v46  ;;  %v55_v50 = vld [vmem:[%s979_s1 + $0xe0] sm:$0xff]  ;;  %v57_v51 = vld [vmem:[%s979_s1 + $0xf0] sm:$0xff]  ;;  %v60_v52 = vld [vmem:[%s979_s1 + $0x108] sm:$0xff] }
   0xd   :  { %510 = vmatpush1.bf16.msra.mxu0 %v509_v19  ;;  %548 = vmatprep.subr.bf16.mxu1 %v547_v41  ;;  %v62_v53 = vld [vmem:[%s979_s1 + $0x118] sm:$0xff]  ;;  %v529_v54 = vpack.c.bf16 %v57_v51, %v55_v50  ;;  %v59_v56 = vld [vmem:[%s979_s1 + $0x100] sm:$0xff]  ;;  %v61_v57 = vld [vmem:[%s979_s1 + $0x110] sm:$0xff] }
   0xe   :  { %512 = vmatprep.subr.bf16.mxu0 %v511_v20  ;;  %v531_v55 = vpack.c.bf16 %v62_v53, %v60_v52  ;;  %v64_v58 = vld [vmem:[%s979_s1 + $0x128] sm:$0xff]  ;;  %v66_v59 = vld [vmem:[%s979_s1 + $0x138] sm:$0xff]  ;;  %v533_v60 = vpack.c.bf16 %v61_v57, %v59_v56  ;;  %v63_v62 = vld [vmem:[%s979_s1 + $0x120] sm:$0xff] }
   0xf   :  { %v535_v61 = vpack.c.bf16 %v66_v59, %v64_v58  ;;  %v65_v63 = vld [vmem:[%s979_s1 + $0x130] sm:$0xff]  ;;  %v68_v0 = vld [vmem:[%s979_s1 + $0x148] sm:$0xff]  ;;  %v70_v1 = vld [vmem:[%s979_s1 + $0x158] sm:$0xff] }
  0x10   :  { %v537_v2 = vpack.c.bf16 %v65_v63, %v63_v62  ;;  %v539_v3 = vpack.c.bf16 %v70_v1, %v68_v0  ;;  %v67_v4 = vld [vmem:[%s979_s1 + $0x140] sm:$0xff]  ;;  %v69_v5 = vld [vmem:[%s979_s1 + $0x150] sm:$0xff]  ;;  %v72_v6 = vld [vmem:[%s979_s1 + $0x168] sm:$0xff] }
  0x11   :  { %514 = vmatpush1.bf16.msra.mxu0 %v513_v25  ;;  %v74_v7 = vld [vmem:[%s979_s1 + $0x178] sm:$0xff]  ;;  %v541_v8 = vpack.c.bf16 %v69_v5, %v67_v4  ;;  %v71_v10 = vld [vmem:[%s979_s1 + $0x160] sm:$0xff]  ;;  %v73_v11 = vld [vmem:[%s979_s1 + $0x170] sm:$0xff] }
  0x12   :  { %516 = vmatprep.subr.bf16.mxu0 %v515_v26  ;;  %v543_v9 = vpack.c.bf16 %v74_v7, %v72_v6  ;;  %v545_v12 = vpack.c.bf16 %v73_v11, %v71_v10  ;;  %v76_v13 = vld [vmem:[%s979_s1 + $0x188] sm:$0xff]  ;;  %v75_v14 = vld [vmem:[%s979_s1 + $0x180] sm:$0xff]  ;;  %v203_v18 = vld [vmem:[%s981_s3 + $0x90] sm:$0xff] }
  0x13   :  { %v185_v15 = vld [vmem:[%s981_s3] sm:$0xff]  ;;  %v186_v16 = vld [vmem:[%s981_s3 + $0x8] sm:$0xff]  ;;  %v204_v19 = vld [vmem:[%s981_s3 + $0x98] sm:$0xff] }
  0x14   :  { %v549_v17 = vpack.c.bf16 %v186_v16, %v185_v15  ;;  %v551_v20 = vpack.c.bf16 %v204_v19, %v203_v18  ;;  %v187_v21 = vld [vmem:[%s981_s3 + $0x10] sm:$0xff]  ;;  %v188_v22 = vld [vmem:[%s981_s3 + $0x18] sm:$0xff]  ;;  %v205_v24 = vld [vmem:[%s981_s3 + $0xa0] sm:$0xff]  ;;  %v622_v18 = vmov 0.0|0.0  }
  0x15   :  { %518 = vmatpush1.bf16.msra.mxu0 %v517_v31  ;;  %v553_v23 = vpack.c.bf16 %v188_v22, %v187_v21  ;;  %v206_v25 = vld [vmem:[%s981_s3 + $0xa8] sm:$0xff]  ;;  %v189_v27 = vld [vmem:[%s981_s3 + $0x20] sm:$0xff]  ;;  %v207_v30 = vld [vmem:[%s981_s3 + $0xb0] sm:$0xff] }
  0x16   :  { %520 = vmatprep.subr.bf16.mxu0 %v519_v34  ;;  %550 = vmatpush3.bf16.msra.mxu1 %v549_v17  ;;  %v555_v26 = vpack.c.bf16 %v206_v25, %v205_v24  ;;  %v190_v28 = vld [vmem:[%s981_s3 + $0x28] sm:$0xff]  ;;  %v208_v31 = vld [vmem:[%s981_s3 + $0xb8] sm:$0xff]  ;;  %v209_v36 = vld [vmem:[%s981_s3 + $0xc0] sm:$0xff] }
  0x17   :  { %552 = vmatprep.subr.bf16.mxu1 %v551_v20  ;;  %v557_v29 = vpack.c.bf16 %v190_v28, %v189_v27  ;;  %v559_v32 = vpack.c.bf16 %v208_v31, %v207_v30  ;;  %v192_v34 = vld [vmem:[%s981_s3 + $0x38] sm:$0xff]  ;;  %v210_v37 = vld [vmem:[%s981_s3 + $0xc8] sm:$0xff]  ;;  %v193_v39 = vld [vmem:[%s981_s3 + $0x40] sm:$0xff] }
  0x18   :  { %v563_v38 = vpack.c.bf16 %v210_v37, %v209_v36  ;;  %v194_v40 = vld [vmem:[%s981_s3 + $0x48] sm:$0xff]  ;;  %v195_v45 = vld [vmem:[%s981_s3 + $0x50] sm:$0xff]  ;;  %v196_v46 = vld [vmem:[%s981_s3 + $0x58] sm:$0xff] }
  0x19   :  { %522 = vmatpush1.bf16.msra.mxu0 %v521_v42  ;;  %v565_v41 = vpack.c.bf16 %v194_v40, %v193_v39  ;;  %v211_v42 = vld [vmem:[%s981_s3 + $0xd0] sm:$0xff]  ;;  %v569_v47 = vpack.c.bf16 %v196_v46, %v195_v45  ;;  %v197_v50 = vld [vmem:[%s981_s3 + $0x60] sm:$0xff]  ;;  %v198_v52 = vld [vmem:[%s981_s3 + $0x68] sm:$0xff]  ;;  %v624_v39 = vmov 0.0  }
  0x1a   :  { %524 = vmatprep.subr.bf16.mxu0 %v523_v43  ;;  %554 = vmatpush3.bf16.msra.mxu1 %v553_v23  ;;  %v212_v43 = vld [vmem:[%s981_s3 + $0xd8] sm:$0xff]  ;;  %v215_v53 = vld [vmem:[%s981_s3 + $0xf0] sm:$0xff]  ;;  %v77_v63 = vld [vmem:[%s982_s2] sm:$0x3] }
  0x1b   :  { %556 = vmatprep.subr.bf16.mxu1 %v555_v26  ;;  %v567_v44 = vpack.c.bf16 %v212_v43, %v211_v42  ;;  %v199_v57 = vld [vmem:[%s981_s3 + $0x70] sm:$0xff]  ;;  %v200_v58 = vld [vmem:[%s981_s3 + $0x78] sm:$0xff]  ;;  %v300_v15 = vld [vmem:[%s983_s5] sm:$0xff] }
  0x1c   :  { %v577_v59 = vpack.c.bf16 %v200_v58, %v199_v57  ;;  %v301_v16 = vld [vmem:[%s983_s5 + $0x8] sm:$0xff]  ;;  %v302_v19 = vld [vmem:[%s983_s5 + $0x10] sm:$0xff]  ;;  %v303_v20 = vld [vmem:[%s983_s5 + $0x18] sm:$0xff] }
  0x1d   :  { %526 = vmatpush1.bf16.msra.mxu0 %v525_v48  ;;  %v213_v48 = vld [vmem:[%s981_s3 + $0xe0] sm:$0xff]  ;;  %v580_v17 = vpack.c.bf16 %v301_v16, %v300_v15  ;;  %v583_v21 = vpack.c.bf16 %v303_v20, %v302_v19  ;;  %v305_v23 = vld [vmem:[%s983_s5 + $0x28] sm:$0xff]  ;;  %v306_v25 = vld [vmem:[%s983_s5 + $0x30] sm:$0xff] }
  0x1e   :  { %528 = vmatprep.subr.bf16.mxu0 %v527_v49  ;;  %558 = vmatpush3.bf16.msra.mxu1 %v557_v29  ;;  %v214_v49 = vld [vmem:[%s981_s3 + $0xe8] sm:$0xff]  ;;  %v304_v22 = vld [vmem:[%s983_s5 + $0x20] sm:$0xff]  ;;  %v307_v26 = vld [vmem:[%s983_s5 + $0x38] sm:$0xff] }
  0x1f   :  { %560 = vmatprep.subr.bf16.mxu1 %v559_v32  ;;  %v571_v51 = vpack.c.bf16 %v214_v49, %v213_v48  ;;  %v586_v24 = vpack.c.bf16 %v305_v23, %v304_v22  ;;  %v589_v27 = vpack.c.bf16 %v307_v26, %v306_v25  ;;  %v308_v28 = vld [vmem:[%s983_s5 + $0x40] sm:$0xff]  ;;  %v309_v29 = vld [vmem:[%s983_s5 + $0x48] sm:$0xff]  ;;  %v310_v31 = vld [vmem:[%s983_s5 + $0x50] sm:$0xff] }
  0x20   :  { %v592_v30 = vpack.c.bf16 %v309_v29, %v308_v28  ;;  %v311_v32 = vld [vmem:[%s983_s5 + $0x58] sm:$0xff]  ;;  %v314_v37 = vld [vmem:[%s983_s5 + $0x70] sm:$0xff]  ;;  %v408_v42 = vld [vmem:[%s984_s4] ss:$0 sm:$0xff] }
  0x21   :  { %530 = vmatpush1.bf16.msra.mxu0 %v529_v54  ;;  %v216_v54 = vld [vmem:[%s981_s3 + $0xf8] sm:$0xff] }
  0x22   :  { %532 = vmatprep.subr.bf16.mxu0 %v531_v55  ;;  %v573_v55 = vpack.c.bf16 %v198_v52, %v197_v50  ;;  %v575_v56 = vpack.c.bf16 %v216_v54, %v215_v53  ;;  %v410_v50 = vld [vmem:[%s985_s6] ss:$0 sm:$0xff] }
  0x25   :  { %534 = vmatpush1.bf16.msra.mxu0 %v533_v60  ;;  %v79_v60 = vlaneseq }
  0x26   :  { %536 = vmatprep.subr.bf16.mxu0 %v535_v61 }
  0x27   :  { %v80_v61 = vshrl.u32 %v79_v60, 7 }
  0x29   :  { %538 = vmatpush1.bf16.msra.mxu0 %v537_v2  ;;  %v81_v62 = vsub.s32 0, %v80_v61  ;;  %v85_v0 = vsub.s32 1, %v80_v61 }
  0x2a   :  { %540 = vmatprep.subr.bf16.mxu0 %v539_v3 }
  0x2b   :  { %v82_v1 = vrot.slane %v77_v63, %v81_v62  ;;  %v86_v2 = vrot.slane %v77_v63, %v85_v0 }
  0x2d   :  { %542 = vmatpush1.bf16.msra.mxu0 %v541_v8 }
  0x2e   :  { %544 = vmatprep.subr.bf16.mxu0 %v543_v9 }
  0x31   :  { %546 = vmatpush1.bf16.msra.mxu0 %v545_v12 }
  0x32   :  { %150 = vmatprep.subr.mxu0 %v76_v13 }
  0x35   :  { %151 = vmatpush1.msra.mxu0 %v75_v14 }
  0x36   :  { %167 = vmatmul.mubr.f32.vlgmr.msra.gmra.mrb[0].mxu0 %v737_v33  ;;  %v191_v33 = vld [vmem:[%s981_s3 + $0x30] sm:$0xff] }
  0x37   :  { %v561_v35 = vpack.c.bf16 %v192_v34, %v191_v33  ;;  %v595_v33 = vpack.c.bf16 %v311_v32, %v310_v31  ;;  %v312_v34 = vld [vmem:[%s983_s5 + $0x60] sm:$0xff] }
  0x39   :  { %562 = vmatpush3.bf16.msra.mxu1 %v561_v35  ;;  %v313_v35 = vld [vmem:[%s983_s5 + $0x68] sm:$0xff] }
  0x3a   :  { %564 = vmatprep.subr.bf16.mxu1 %v563_v38  ;;  %v598_v36 = vpack.c.bf16 %v313_v35, %v312_v34  ;;  %v315_v38 = vld [vmem:[%s983_s5 + $0x78] sm:$0xff] }
  0x3b   :  { %v601_v40 = vpack.c.bf16 %v315_v38, %v314_v37 }
  0x3d   :  { %566 = vmatpush3.bf16.msra.mxu1 %v565_v41 }
  0x3e   :  { %568 = vmatprep.subr.bf16.mxu1 %v567_v44 }
  0x41   :  { %570 = vmatpush3.bf16.msra.mxu1 %v569_v47 }
  0x42   :  { %572 = vmatprep.subr.bf16.mxu1 %v571_v51 }
  0x45   :  { %574 = vmatpush3.bf16.msra.mxu1 %v573_v55 }
  0x46   :  { %576 = vmatprep.subr.bf16.mxu1 %v575_v56 }
  0x49   :  { %578 = vmatpush3.bf16.msra.mxu1 %v577_v59 }
  0x4a   :  { %579 = vmatprep.subr.bf16.mxu1 %v622_v18 }
 0x109   :  { %v168_v3 = vpop.f32.mrb[0].mxu0 }
 0x10a   :  { %v169_v4 = vadd.f32 %v168_v3, %v82_v1  ;;  %v170_v5 = vpop.f32.mrb[1].mxu0 }
 0x10b   :  { %v171_v6 = vadd.f32 %v170_v5, %v86_v2 }
 0x10c   :  { %v406_v7 = vmul.f32 -1.442695, %v169_v4 }
 0x10d   :  { %v407_v8 = vmul.f32 -1.442695, %v171_v6 }
 0x10e   :  { %606 = vpow2.f32 %v406_v7 }
 0x10f   :  { %608 = vpow2.f32 %v407_v8 }
 0x118   :  { %v607_v9 = vpop.eup %606 }
 0x119   :  { %v609_v10 = vpop.eup %608  ;;  %v179_v11 = vadd.f32 1.0, %v607_v9 }
 0x11a   :  { %v180_v12 = vadd.f32 1.0, %v609_v10 }
 0x11c   :  { %610 = vrcp.f32 %v180_v12 }
 0x11d   :  { %612 = vrcp.f32 %v179_v11 }
 0x126   :  { %v611_v13 = vpop.eup %610 }
 0x127   :  { %v613_v14 = vpop.eup %612  ;;  %288 = vmatprep.mubr.f32.mxu1 %v611_v13 }
 0x128   :  { %289 = vmatmul.mubr.f32.vlgmr.msra.gmra.mrb[0].mxu1 %v613_v14 }
 0x129   :  { %581 = vmatpush3.bf16.msra.mxu1 %v580_v17  ;;  %496 = vmatprep.mubr.msk.f32.mxu1 %vm623_vm1, %v624_v39 }
 0x12a   :  { %582 = vmatprep.subr.bf16.mxu1 %v622_v18 }
 0x12d   :  { %584 = vmatpush3.bf16.msra.mxu1 %v583_v21 }
 0x12e   :  { %585 = vmatprep.subr.bf16.mxu1 %v622_v18 }
 0x131   :  { %587 = vmatpush3.bf16.msra.mxu1 %v586_v24 }
 0x132   :  { %588 = vmatprep.subr.bf16.mxu1 %v622_v18 }
 0x135   :  { %590 = vmatpush3.bf16.msra.mxu1 %v589_v27 }
 0x136   :  { %591 = vmatprep.subr.bf16.mxu1 %v622_v18 }
 0x139   :  { %593 = vmatpush3.bf16.msra.mxu1 %v592_v30 }
 0x13a   :  { %594 = vmatprep.subr.bf16.mxu1 %v622_v18 }
 0x13d   :  { %596 = vmatpush3.bf16.msra.mxu1 %v595_v33 }
 0x13e   :  { %597 = vmatprep.subr.bf16.mxu1 %v622_v18 }
 0x141   :  { %599 = vmatpush3.bf16.msra.mxu1 %v598_v36 }
 0x142   :  { %600 = vmatprep.subr.bf16.mxu1 %v622_v18 }
 0x145   :  { %602 = vmatpush3.bf16.msra.mxu1 %v601_v40 }
 0x1fb   :  { %v444_v41 = vpop.f32.mrb[0].mxu1 }
 0x1fc   :  { %v445_v43 = vpop.f32.mrb[1].mxu1 }
 0x1fd   :  { %v446_v44 = vadd.f32 %v445_v43, %v444_v41 }
 0x1ff   :  { %v291_v45 = vadd.f32 %v446_v44, %v408_v42 }
 0x201   :  { %v409_v46 = vmul.f32 -1.442695, %v291_v45 }
 0x203   :  { %614 = vpow2.f32 %v409_v46 }
 0x20d   :  { %v615_v47 = vpop.eup %614 }
 0x20e   :  { %v297_v48 = vadd.f32 1.0, %v615_v47 }
 0x210   :  { %616 = vrcp.f32 %v297_v48 }
 0x21a   :  { %v617_v49 = vpop.eup %616 }
 0x21b   :  { %497 = vmatmul.mubr.f32.vlgmr.msra.gmra.mrb[2].mxu1 %v617_v49 }
 0x2ee   :  { %v389_v51 = vpop.f32.mrb[2].mxu1 }
 0x2ef   :  { %v390_v52 = vadd.f32 %v410_v50, %v389_v51  ;;  %v498_v53 = vpop.f32.mrb[3].mxu1 }
 0x2f1   :  { %v411_v54 = vmul.f32 -1.442695, %v390_v52 }
 0x2f3   :  { %618 = vpow2.f32 %v411_v54 }
 0x2fd   :  { %v619_v55 = vpop.eup %618 }
 0x2fe   :  { %v396_v56 = vadd.f32 1.0, %v619_v55 }
 0x300   :  { %620 = vrcp.f32 %v396_v56 }
 0x30a   :  { %v621_v57 = vpop.eup %620 }
 0x30b   :  { %399 = vst [vmem:[%s986_s7] sm:$0x3] %v621_v57 }

// kernel: model_forward.2
= control target key start
LH: loop header
LB: loop body
LE: loop exit
PB: predicated region body
PF: predicated region fallthrough
CT: control target
= control target key end

     0   :  { %s9898_s0 = inlined_call_operand.hbm [shape: bf16[1024,2048], index: 0, kind: input, shape index: {}]   ;;  %s9899_s1 = inlined_call_operand.vmem [shape: bf16[2048,1], index: 1, kind: input, shape index: {}]   ;;  %s9900_s2 = inlined_call_operand.<no memory space> [shape: f32[1], index: 2, kind: input, shape index: {}]   ;;  %s9901_s3 = inlined_call_operand.vmem [shape: f32[1024,1], index: 3, kind: output, shape index: {}]  }
   0x1   :  { %8 = sst [smem:[#allocation2]] %s9900_s2 }
   0x2   :  { %9 = vsyncpa [#allocation4], 0 }
   0x3   :  { %11 = vsyncpa [#allocation4 + $0x1], 0  ;;  %s8553_s14 = smov 0   ;;  %s8555_s15 = smov 0  }
   0x4   :  { %s8557_s16 = smov 0   ;;  %s8559_s17 = smov 0  }
   0x5 LB: > { %s6738_s2 = sadd.s32 4294967295, %s8524_s17   ;;  %s8573_s18 = sadd.s32 1, %s8524_s17   ;;  %s8524_s17 = sphi %s8559_s17, %s9908_s17   ;;  %s8520_s16 = sphi %s8557_s16, %s9907_s16   ;;  %s8516_s15 = sphi %s8555_s15, %s9906_s15   ;;  %s8512_s14 = sphi %s8553_s14, %s9905_s14  }
   0x6   : > { %s21_s19 = ssub.s32 %s8524_s17, %s8573_s18  ;;  %s24_s20 = sadd.s32 1, %s8520_s16 }
   0x7   : > { %p22_p0 = scmp.eq.s32.totalorder %s21_s19, 0  ;;  %p31_p1 = scmp.ne.s32.totalorder %s8520_s16, %s8516_s15 }
   0x8   : > { %p32_p2 = scmp.eq.s32.totalorder %s8524_s17, 0  ;;  %p37_p3 = scmp.ne.s32.totalorder %s8516_s15, %s8512_s14 }
   0x9   : > { %s8583_s21 = scalar_select %p22_p0, %s8520_s16, %s24_s20  }
   0xa   : > { %p33_p4 = por %p32_p2, %p31_p1  ;;  %p38_p5 = scmp.eq.s32.totalorder %s6738_s2, 0 }
   0xb   : > { %p8296_p6 = scmp.lt.s32.totalorder %s8524_s17, 2  ;;  %s135_s23 = sand.u32 1, %s8520_s16  }
   0xc   : > { %p8588_p7 = por %p38_p5, %p37_p3  ;;  %s6742_s24 = sshll.u32 %s135_s23, 12 }
   0xd   : > { %s7393_s25 = sshll.u32 %s8524_s17, 16  ;;  %s139_s29 = scalar_lea.vmem [#allocation3], %s6742_s24 }
   0xe   : > { %s8597_s28 = scalar_lea.hbm %s9898_s0, %s7393_s25  ;;  %s147_s30 = sshll.u32 %s139_s29, 4  ;;  %s8599_s30 = int_to_ptr.vmem [resolvable:$true] %s147_s30 }
   0xf   : > { %p8601_p8 = pnand %p8296_p6, %p33_p4  ;;  %s8606_s5 = scalar_lea.sflag [#allocation4], %s135_s23 }
  0x10   : > { %s8460_s6 = scalar_lea.hbm %s8597_s28, 65536  ;;  %s8465_s9 = scalar_lea.hbm %s9898_s0, 131072 }
  0x11   : > { %p8461_p10 = scmp.ne.s32.totalorder %s8597_s28, %s8460_s6  ;;  %p8462_p11 = pneg %p8601_p8 }
  0x12   : > { %p8466_p0 = scmp.lt.u32.totalorder %s8597_s28, %s9898_s0  ;;  %p8467_p1 = scmp.lt.u32.totalorder %s8465_s9, %s8460_s6 }
  0x13   : > { %p8463_p12 = pnand %p8462_p11, %p8461_p10  ;;  %p8469_p3 = scmp.lt.u32.totalorder %s8460_s6, %s8597_s28 }
  0x14   : > { %p8468_p2 = por %p8467_p1, %p8466_p0 }
  0x15   : > { %p8464_p13 = pneg %p8463_p12 }
  0x16   : > { %p8470_p4 = por %p8469_p3, %p8468_p2 }
  0x18   : > { %p8471_p5 = pnand %p8470_p4, %p8464_p13 }
  0x1a   : > { %8474 = shalt.err (!%p8471_p5)
}
  0x1b   : > { %s8475_s12 = scalar_lea.vmem %s8599_s30, 65536  ;;  %s8526_s13 = smov [#allocation3]  }
  0x1c   : > { %p8476_p6 = scmp.ne.s32.totalorder %s8599_s30, %s8475_s12  ;;  %s8480_s14 = sshll.u32 %s8526_s13, 4  ;;  %s8481_s14 = int_to_ptr.vmem [resolvable:$false] %s8480_s14 }
  0x1d   : > { %s8482_s19 = scalar_lea.vmem %s8481_s14, 131072  ;;  %p8483_p9 = scmp.lt.s32.totalorder %s8599_s30, %s8481_s14 }
  0x1e   : > { %p8478_p10 = pnand %p8476_p6, %p8462_p11  ;;  %p8484_p0 = scmp.lt.s32.totalorder %s8482_s19, %s8475_s12 }
  0x20   : > { %p8479_p12 = pneg %p8478_p10  ;;  %p8485_p1 = por %p8484_p0, %p8483_p9 }
  0x22   : > { %p8486_p2 = pnand %p8485_p1, %p8479_p12 }
  0x24   : > { %8489 = shalt.err (!%p8486_p2)
}
  0x25   : > { %s8527_s20 = smov 1024   ;;  %s8528_s23 = smov 64  }
  0x26   : > { %8295 = dma.hbm_to_vmem [thread:$0]  (!%p8601_p8), %s8597_s28, 65536, %s8599_s30, %s8606_s5, %s8527_s20, %s8527_s20, %s8528_s23  }
  0x27   : > { %p155_p11 = scmp.lt.s32.totalorder %s8524_s17, 3  ;;  %p9904_p13 = scmp.ge.s32.totalorder %s8524_s17, 1 }
  0x29   : > { %p156_p3 = pnand %p9904_p13, %p155_p11 }
  0x2a   : > { %s161_s24 = sand.u32 (!%p156_p3), 1, %s8516_s15  }
  0x2b   : > { %159 = sbr.rel (%p156_p3) target bundleno = 1351 (0x547), region = 32  ;;  %s6747_s25 = sshll.u32 (!%p156_p3), %s161_s24, 12 }
  0x2c   : > { %s162_s26 = scalar_lea.sflag (!%p156_p3), [#allocation4], %s161_s24  ;;  %s8638_s27 = scalar_lea.vmem (!%p156_p3), [#allocation3], %s6747_s25 }
  0x32   : > { %8507 = dma.done.wait (%p8588_p7), %s162_s26, 65536  }
  0x33   : > { %8509 = vsyncadd (%p8588_p7), %s162_s26, 4294901760  ;;  %v8529_v0 = vmov 0   ;;  %v8332_v1 = vld [vmem:[%s9899_s1] sm:$0xff]   ;;  %v8334_v3 = vld [vmem:[%s9899_s1 + $0x8] sm:$0xff]   ;;  %s6748_s5 = sshll.u32 %s6738_s2, 6  ;;  %s964_s6 = sld [smem:[#allocation2]] }
  0x34   : > { %4294 = vmatprep.subr.bf16.mxu1 %v8529_v0  ;;  %5450 = vmatprep.subr.bf16.mxu0 %v8529_v0  ;;  %v8333_v2 = vld [vmem:[%s9899_s1 + $0x200] sm:$0xff]   ;;  %v8335_v4 = vld [vmem:[%s9899_s1 + $0x208] sm:$0xff]   ;;  %v8336_v5 = vld [vmem:[%s9899_s1 + $0x10] sm:$0xff]   ;;  %p190_p7 = scmp.lt.s32.totalorder %s6748_s5, 127  ;;  %vm6606_vm0 = vcmask 7168  }
  0x35   : > { %4295 = vmatpush1.bf16.msra.mxu1 %v8332_v1  ;;  %5451 = vmatpush1.bf16.msra.mxu0 %v8333_v2  ;;  %v8337_v6 = vld [vmem:[%s9899_s1 + $0x210] sm:$0xff]   ;;  %v8338_v7 = vld [vmem:[%s9899_s1 + $0x18] sm:$0xff]   ;;  %v8340_v9 = vld [vmem:[%s9899_s1 + $0x20] sm:$0xff]  }
  0x36   : > { %4296 = vmatprep.subr.bf16.mxu1 %v8529_v0  ;;  %5452 = vmatprep.subr.bf16.mxu0 %v8529_v0  ;;  %v8339_v8 = vld [vmem:[%s9899_s1 + $0x218] sm:$0xff]   ;;  %v8341_v10 = vld [vmem:[%s9899_s1 + $0x220] sm:$0xff]   ;;  %v8342_v11 = vld [vmem:[%s9899_s1 + $0x28] sm:$0xff]   ;;  %s9910_s5 = smov (!%p190_p7, %s6748_s5), 127 }
  0x37   : > { %v8343_v12 = vld [vmem:[%s9899_s1 + $0x228] sm:$0xff]   ;;  %v8344_v13 = vld [vmem:[%s9899_s1 + $0x30] sm:$0xff]   ;;  %v8346_v15 = vld [vmem:[%s9899_s1 + $0x38] sm:$0xff]   ;;  %s6749_s17 = sshll.u32 %s9910_s5, 3 }
  0x38   : > { %v8345_v14 = vld [vmem:[%s9899_s1 + $0x230] sm:$0xff]   ;;  %v8347_v16 = vld [vmem:[%s9899_s1 + $0x238] sm:$0xff]   ;;  %v8348_v17 = vld [vmem:[%s9899_s1 + $0x40] sm:$0xff]   ;;  %s9680_s7 = scalar_lea.vmem %s9901_s3, %s6749_s17 }
  0x39   : > { %4297 = vmatpush1.bf16.msra.mxu1 %v8334_v3  ;;  %5453 = vmatpush1.bf16.msra.mxu0 %v8335_v4  ;;  %v8349_v18 = vld [vmem:[%s9899_s1 + $0x240] sm:$0xff]   ;;  %v8350_v24 = vld [vmem:[%s9899_s1 + $0x48] sm:$0xff]   ;;  %v8352_v27 = vld [vmem:[%s9899_s1 + $0x50] sm:$0xff]  }
  0x3a   : > { %4298 = vmatprep.subr.bf16.mxu1 %v8529_v0  ;;  %5454 = vmatprep.subr.bf16.mxu0 %v8529_v0  ;;  %v8717_v19 = vld [vmem:[%s8638_s27] sm:$0xff]  ;;  %v8351_v26 = vld [vmem:[%s9899_s1 + $0x248] sm:$0xff]   ;;  %v8353_v28 = vld [vmem:[%s9899_s1 + $0x250] sm:$0xff]  }
  0x3b   : > { %v8720_v20 = vld [vmem:[%s8638_s27 + $0x40] sm:$0xff]  ;;  %v8354_v29 = vld [vmem:[%s9899_s1 + $0x58] sm:$0xff]   ;;  %v8358_v33 = vld [vmem:[%s9899_s1 + $0x68] sm:$0xff]  }
  0x3c   : > { %v8723_v21 = vld [vmem:[%s8638_s27 + $0x20] sm:$0xff]  ;;  %v6751_v22 = vcombine.high %v8717_v19, %v8720_v20  ;;  %v8355_v30 = vld [vmem:[%s9899_s1 + $0x258] sm:$0xff]   ;;  %v8359_v34 = vld [vmem:[%s9899_s1 + $0x268] sm:$0xff]   ;;  %v6750_v42 = vcombine.low %v8717_v19, %v8720_v20 }
  0x3d   : > { %4299 = vmatpush1.bf16.msra.mxu1 %v8336_v5  ;;  %5455 = vmatpush1.bf16.msra.mxu0 %v8337_v6  ;;  %v8728_v23 = vld [vmem:[%s8638_s27 + $0x60] sm:$0xff]  ;;  %v8360_v35 = vld [vmem:[%s9899_s1 + $0x70] sm:$0xff]   ;;  %v8362_v37 = vld [vmem:[%s9899_s1 + $0x78] sm:$0xff]  }
  0x3e   : > { %4300 = vmatprep.subr.bf16.mxu1 %v8529_v0  ;;  %5456 = vmatprep.subr.bf16.mxu0 %v8529_v0  ;;  %v6759_v25 = vcombine.high %v8723_v21, %v8728_v23  ;;  %v8356_v31 = vld [vmem:[%s9899_s1 + $0x60] sm:$0xff]   ;;  %v8361_v36 = vld [vmem:[%s9899_s1 + $0x270] sm:$0xff]   ;;  %v8363_v38 = vld [vmem:[%s9899_s1 + $0x278] sm:$0xff]   ;;  %v6758_v44 = vcombine.low %v8723_v21, %v8728_v23 }
  0x3f   : > { %4326 = vmatprep.mubr.bf16.mxu1 %v6751_v22  ;;  %v8357_v32 = vld [vmem:[%s9899_s1 + $0x260] sm:$0xff]   ;;  %v8366_v51 = vld [vmem:[%s9899_s1 + $0x88] sm:$0xff]   ;;  %v8368_v59 = vld [vmem:[%s9899_s1 + $0x90] sm:$0xff]  }
  0x40   : > { %5482 = vmatprep.mubr.bf16.mxu0 %v6759_v25  ;;  %v212_v39 = vld [vmem:[%s8638_s27 + $0x80] sm:$0xff]  ;;  %v8367_v52 = vld [vmem:[%s9899_s1 + $0x288] sm:$0xff]   ;;  %v8369_v60 = vld [vmem:[%s9899_s1 + $0x290] sm:$0xff]  }
  0x41   : > { %4301 = vmatpush1.bf16.msra.mxu1 %v8338_v7  ;;  %5457 = vmatpush1.bf16.msra.mxu0 %v8339_v8  ;;  %v220_v40 = vld [vmem:[%s8638_s27 + $0xc0] sm:$0xff]  ;;  %v8370_v2 = vld [vmem:[%s9899_s1 + $0x98] sm:$0xff]   ;;  %v8377_v20 = vld [vmem:[%s9899_s1 + $0x2b0] sm:$0xff]  }
  0x42   : > { %4302 = vmatprep.subr.bf16.mxu1 %v8529_v0  ;;  %5458 = vmatprep.subr.bf16.mxu0 %v8529_v0  ;;  %v216_v41 = vld [vmem:[%s8638_s27 + $0xa0] sm:$0xff]  ;;  %v6767_v47 = vcombine.high %v212_v39, %v220_v40  ;;  %v6766_v55 = vcombine.low %v212_v39, %v220_v40  ;;  %v8371_v3 = vld [vmem:[%s9899_s1 + $0x298] sm:$0xff]   ;;  %v8383_v39 = vld [vmem:[%s9899_s1 + $0x2c8] sm:$0xff]  }
  0x43   : > { %v224_v43 = vld [vmem:[%s8638_s27 + $0xe0] sm:$0xff] }
  0x44   : > { %v8364_v45 = vld [vmem:[%s9899_s1 + $0x80] sm:$0xff]   ;;  %v6775_v48 = vcombine.high %v216_v41, %v224_v43  ;;  %v6774_v56 = vcombine.low %v216_v41, %v224_v43  ;;  %v8384_v41 = vld [vmem:[%s9899_s1 + $0xd0] sm:$0xff]  }
  0x45   : > { %4303 = vmatpush1.bf16.msra.mxu1 %v8340_v9  ;;  %5459 = vmatpush1.bf16.msra.mxu0 %v8341_v10  ;;  %v8365_v46 = vld [vmem:[%s9899_s1 + $0x280] sm:$0xff]  }
  0x46   : > { %4304 = vmatprep.subr.bf16.mxu1 %v8529_v0  ;;  %5460 = vmatprep.subr.bf16.mxu0 %v8529_v0  ;;  %v228_v49 = vld [vmem:[%s8638_s27 + $0x100] sm:$0xff] }
  0x47   : > { %v236_v50 = vld [vmem:[%s8638_s27 + $0x140] sm:$0xff] }
  0x48   : > { %v232_v53 = vld [vmem:[%s8638_s27 + $0x120] sm:$0xff]  ;;  %v6783_v57 = vcombine.high %v228_v49, %v236_v50  ;;  %v6782_v4 = vcombine.low %v228_v49, %v236_v50 }
  0x49   : > { %4305 = vmatpush1.bf16.msra.mxu1 %v8342_v11  ;;  %5461 = vmatpush1.bf16.msra.mxu0 %v8343_v12  ;;  %v240_v54 = vld [vmem:[%s8638_s27 + $0x160] sm:$0xff] }
  0x4a   : > { %4306 = vmatprep.subr.bf16.mxu1 %v8529_v0  ;;  %5462 = vmatprep.subr.bf16.mxu0 %v8529_v0  ;;  %v6791_v58 = vcombine.high %v232_v53, %v240_v54  ;;  %v244_v61 = vld [vmem:[%s8638_s27 + $0x180] sm:$0xff]  ;;  %v6790_v6 = vcombine.low %v232_v53, %v240_v54 }
  0x4b   : > { %v252_v62 = vld [vmem:[%s8638_s27 + $0x1c0] sm:$0xff] }
  0x4c   : > { %v248_v63 = vld [vmem:[%s8638_s27 + $0x1a0] sm:$0xff]  ;;  %v6799_v7 = vcombine.high %v244_v61, %v252_v62 }
  0x4d   : > { %4307 = vmatpush1.bf16.msra.mxu1 %v8344_v13  ;;  %5463 = vmatpush1.bf16.msra.mxu0 %v8345_v14  ;;  %v256_v1 = vld [vmem:[%s8638_s27 + $0x1e0] sm:$0xff]  ;;  %v8374_v14 = vld [vmem:[%s9899_s1 + $0xa8] sm:$0xff]  }
  0x4e   : > { %4308 = vmatprep.subr.bf16.mxu1 %v8529_v0  ;;  %5464 = vmatprep.subr.bf16.mxu0 %v8529_v0  ;;  %v8372_v5 = vld [vmem:[%s9899_s1 + $0xa0] sm:$0xff]   ;;  %v6807_v9 = vcombine.high %v248_v63, %v256_v1 }
  0x4f   : > { %v8373_v8 = vld [vmem:[%s9899_s1 + $0x2a0] sm:$0xff]  }
  0x50   : > { %v260_v10 = vld [vmem:[%s8638_s27 + $0x200] sm:$0xff] }
  0x51   : > { %4309 = vmatpush1.bf16.msra.mxu1 %v8346_v15  ;;  %5465 = vmatpush1.bf16.msra.mxu0 %v8347_v16  ;;  %v268_v11 = vld [vmem:[%s8638_s27 + $0x240] sm:$0xff]  ;;  %v8375_v15 = vld [vmem:[%s9899_s1 + $0x2a8] sm:$0xff]   ;;  %v6798_v16 = vcombine.low %v244_v61, %v252_v62 }
  0x52   : > { %4310 = vmatprep.subr.bf16.mxu1 %v8529_v0  ;;  %5466 = vmatprep.subr.bf16.mxu0 %v8529_v0  ;;  %v264_v12 = vld [vmem:[%s8638_s27 + $0x220] sm:$0xff]  ;;  %v6815_v19 = vcombine.high %v260_v10, %v268_v11 }
  0x53   : > { %v272_v13 = vld [vmem:[%s8638_s27 + $0x260] sm:$0xff] }
  0x54   : > { %v6823_v21 = vcombine.high %v264_v12, %v272_v13  ;;  %v276_v22 = vld [vmem:[%s8638_s27 + $0x280] sm:$0xff] }
  0x55   : > { %4311 = vmatpush1.bf16.msra.mxu1 %v8348_v17  ;;  %5467 = vmatpush1.bf16.msra.mxu0 %v8349_v18  ;;  %v8376_v17 = vld [vmem:[%s9899_s1 + $0xb0] sm:$0xff]   ;;  %v6806_v18 = vcombine.low %v248_v63, %v256_v1  ;;  %v284_v23 = vld [vmem:[%s8638_s27 + $0x2c0] sm:$0xff] }
  0x56   : > { %4312 = vmatprep.subr.bf16.mxu1 %v8529_v0  ;;  %5468 = vmatprep.subr.bf16.mxu0 %v8529_v0  ;;  %v288_v25 = vld [vmem:[%s8638_s27 + $0x2e0] sm:$0xff]  ;;  %v6830_v40 = vcombine.low %v276_v22, %v284_v23 }
  0x57   : > { %v320_v49 = vld [vmem:[%s8638_s27 + $0x3e0] sm:$0xff] }
  0x58   : > { %v324_v54 = vld [vmem:[%s8638_s27 + $0x400] sm:$0xff] }
  0x59   : > { %4313 = vmatpush1.bf16.msra.mxu1 %v8350_v24  ;;  %5469 = vmatpush1.bf16.msra.mxu0 %v8351_v26  ;;  %v280_v24 = vld [vmem:[%s8638_s27 + $0x2a0] sm:$0xff]  ;;  %v8378_v26 = vld [vmem:[%s9899_s1 + $0xb8] sm:$0xff]  }
  0x5a   : > { %4314 = vmatprep.subr.bf16.mxu1 %v8529_v0  ;;  %5470 = vmatprep.subr.bf16.mxu0 %v8529_v0  ;;  %v340_v1 = vld [vmem:[%s8638_s27 + $0x480] sm:$0xff] }
  0x5d   : > { %4315 = vmatpush1.bf16.msra.mxu1 %v8352_v27  ;;  %5471 = vmatpush1.bf16.msra.mxu0 %v8353_v28  ;;  %v8379_v27 = vld [vmem:[%s9899_s1 + $0x2b8] sm:$0xff]   ;;  %v6814_v28 = vcombine.low %v260_v10, %v268_v11  ;;  %v8388_v10 = vld [vmem:[%s9899_s1 + $0xe0] sm:$0xff]  }
  0x5e   : > { %4316 = vmatprep.subr.bf16.mxu1 %v8529_v0  ;;  %5472 = vmatprep.subr.bf16.mxu0 %v8529_v0  ;;  %v8389_v11 = vld [vmem:[%s9899_s1 + $0x2e0] sm:$0xff]  }
  0x61   : > { %4317 = vmatpush1.bf16.msra.mxu1 %v8354_v29  ;;  %5473 = vmatpush1.bf16.msra.mxu0 %v8355_v30  ;;  %v8380_v29 = vld [vmem:[%s9899_s1 + $0xc0] sm:$0xff]   ;;  %v6822_v30 = vcombine.low %v264_v12, %v272_v13 }
  0x62   : > { %4318 = vmatprep.subr.bf16.mxu1 %v8529_v0  ;;  %5474 = vmatprep.subr.bf16.mxu0 %v8529_v0  ;;  %v364_v12 = vld [vmem:[%s8638_s27 + $0x540] sm:$0xff] }
  0x63   : > { %v360_v13 = vld [vmem:[%s8638_s27 + $0x520] sm:$0xff] }
  0x65   : > { %4319 = vmatpush1.bf16.msra.mxu1 %v8356_v31  ;;  %5475 = vmatpush1.bf16.msra.mxu0 %v8357_v32  ;;  %v6831_v31 = vcombine.high %v276_v22, %v284_v23  ;;  %v8381_v32 = vld [vmem:[%s9899_s1 + $0x2c0] sm:$0xff]  }
  0x66   : > { %4320 = vmatprep.subr.bf16.mxu1 %v8529_v0  ;;  %5476 = vmatprep.subr.bf16.mxu0 %v8529_v0  ;;  %v384_v22 = vld [vmem:[%s8638_s27 + $0x5e0] sm:$0xff] }
  0x69   : > { %4321 = vmatpush1.bf16.msra.mxu1 %v8358_v33  ;;  %5477 = vmatpush1.bf16.msra.mxu0 %v8359_v34  ;;  %v6839_v33 = vcombine.high %v280_v24, %v288_v25  ;;  %v292_v34 = vld [vmem:[%s8638_s27 + $0x300] sm:$0xff] }
  0x6a   : > { %4322 = vmatprep.subr.bf16.mxu1 %v8529_v0  ;;  %5478 = vmatprep.subr.bf16.mxu0 %v8529_v0 }
  0x6d   : > { %4323 = vmatpush1.bf16.msra.mxu1 %v8360_v35  ;;  %5479 = vmatpush1.bf16.msra.mxu0 %v8361_v36  ;;  %v300_v35 = vld [vmem:[%s8638_s27 + $0x340] sm:$0xff] }
  0x6e   : > { %4324 = vmatprep.subr.bf16.mxu1 %v8529_v0  ;;  %5480 = vmatprep.subr.bf16.mxu0 %v8529_v0  ;;  %v296_v36 = vld [vmem:[%s8638_s27 + $0x320] sm:$0xff]  ;;  %v6847_v43 = vcombine.high %v292_v34, %v300_v35  ;;  %v6846_v50 = vcombine.low %v292_v34, %v300_v35 }
  0x71   : > { %4325 = vmatpush1.bf16.msra.mxu1 %v8362_v37  ;;  %5481 = vmatpush1.bf16.msra.mxu0 %v8363_v38  ;;  %v304_v37 = vld [vmem:[%s8638_s27 + $0x360] sm:$0xff]  ;;  %v8382_v38 = vld [vmem:[%s9899_s1 + $0xc8] sm:$0xff]  }
  0x72   : > { %4583 = vmatprep.subr.bf16.mxu1 %v8529_v0  ;;  %5739 = vmatprep.subr.bf16.mxu0 %v8529_v0 }
  0x74   : > { %4327 = vmatmul.mubr.bf16.vlgmr.msra.gmra.mrb[0].mxu1 %v6750_v42  ;;  %5483 = vmatmul.mubr.bf16.vlgmr.msra.gmra.mrb[0].mxu0 %v6758_v44  ;;  %v6838_v42 = vcombine.low %v280_v24, %v288_v25  ;;  %v8385_v44 = vld [vmem:[%s9899_s1 + $0x2d0] sm:$0xff]  }
  0x75   : > { %4584 = vmatpush1.bf16.msra.mxu1 %v8364_v45  ;;  %5740 = vmatpush1.bf16.msra.mxu0 %v8365_v46  ;;  %v6855_v45 = vcombine.high %v296_v36, %v304_v37  ;;  %v308_v46 = vld [vmem:[%s8638_s27 + $0x380] sm:$0xff] }
  0x76   : > { %4334 = vmatprep.mubr.bf16.mxu1 %v6767_v47  ;;  %5490 = vmatprep.mubr.bf16.mxu0 %v6775_v48  ;;  %v316_v47 = vld [vmem:[%s8638_s27 + $0x3c0] sm:$0xff] }
  0x77   : > { %4585 = vmatprep.subr.bf16.mxu1 %v8529_v0  ;;  %5741 = vmatprep.subr.bf16.mxu0 %v8529_v0  ;;  %v312_v48 = vld [vmem:[%s8638_s27 + $0x3a0] sm:$0xff] }
  0x78   : > { %v6871_v53 = vcombine.high %v312_v48, %v320_v49  ;;  %v6870_v61 = vcombine.low %v312_v48, %v320_v49  ;;  %v428_v48 = vld [vmem:[%s8638_s27 + $0x740] sm:$0xff] }
  0x79   : > { %4586 = vmatpush1.bf16.msra.mxu1 %v8366_v51  ;;  %5742 = vmatpush1.bf16.msra.mxu0 %v8367_v52  ;;  %v6854_v51 = vcombine.low %v296_v36, %v304_v37  ;;  %v6863_v52 = vcombine.high %v308_v46, %v316_v47  ;;  %v404_v37 = vld [vmem:[%s8638_s27 + $0x680] sm:$0xff] }
  0x7a   : > { %4587 = vmatprep.subr.bf16.mxu1 %v8529_v0  ;;  %5743 = vmatprep.subr.bf16.mxu0 %v8529_v0  ;;  %v424_v49 = vld [vmem:[%s8638_s27 + $0x720] sm:$0xff] }
  0x7c   : > { %4335 = vmatmul.mubr.bf16.gmra.mrb[4].mxu1 %v6766_v55  ;;  %5491 = vmatmul.mubr.bf16.gmra.mrb[4].mxu0 %v6774_v56  ;;  %v8386_v55 = vld [vmem:[%s9899_s1 + $0xd8] sm:$0xff]  }
  0x7d   : > { %4342 = vmatprep.mubr.bf16.mxu1 %v6783_v57  ;;  %5498 = vmatprep.mubr.bf16.mxu0 %v6791_v58  ;;  %v8387_v56 = vld [vmem:[%s9899_s1 + $0x2d8] sm:$0xff]   ;;  %v332_v57 = vld [vmem:[%s8638_s27 + $0x440] sm:$0xff] }
  0x7e   : > { %4588 = vmatpush1.bf16.msra.mxu1 %v8368_v59  ;;  %5744 = vmatpush1.bf16.msra.mxu0 %v8369_v60  ;;  %v328_v58 = vld [vmem:[%s8638_s27 + $0x420] sm:$0xff]  ;;  %v6862_v60 = vcombine.low %v308_v46, %v316_v47  ;;  %v6879_v62 = vcombine.high %v324_v54, %v332_v57  ;;  %v8393_v46 = vld [vmem:[%s9899_s1 + $0x2f0] sm:$0xff]  }
  0x7f   : > { %4589 = vmatprep.subr.bf16.mxu1 %v8529_v0  ;;  %5745 = vmatprep.subr.bf16.mxu0 %v8529_v0  ;;  %v336_v59 = vld [vmem:[%s8638_s27 + $0x460] sm:$0xff] }
  0x80   : > { %v6887_v63 = vcombine.high %v328_v58, %v336_v59  ;;  %v420_v47 = vld [vmem:[%s8638_s27 + $0x700] sm:$0xff] }
  0x82   : > { %4590 = vmatpush1.bf16.msra.mxu1 %v8370_v2  ;;  %5746 = vmatpush1.bf16.msra.mxu0 %v8371_v3  ;;  %v348_v2 = vld [vmem:[%s8638_s27 + $0x4c0] sm:$0xff] }
  0x83   : > { %4591 = vmatprep.subr.bf16.mxu1 %v8529_v0  ;;  %5747 = vmatprep.subr.bf16.mxu0 %v8529_v0  ;;  %v344_v3 = vld [vmem:[%s8638_s27 + $0x4a0] sm:$0xff] }
  0x84   : > { %4343 = vmatmul.mubr.bf16.gmra.mrb[8].mxu1 %v6782_v4  ;;  %5499 = vmatmul.mubr.bf16.gmra.mrb[8].mxu0 %v6790_v6  ;;  %v352_v4 = vld [vmem:[%s8638_s27 + $0x4e0] sm:$0xff]  ;;  %v6886_v6 = vcombine.low %v328_v58, %v336_v59  ;;  %v6974_v59 = vcombine.low %v420_v47, %v428_v48 }
  0x85   : > { %4350 = vmatprep.mubr.bf16.mxu1 %v6799_v7  ;;  %5506 = vmatprep.mubr.bf16.mxu0 %v6807_v9  ;;  %v6895_v7 = vcombine.high %v340_v1, %v348_v2  ;;  %v356_v9 = vld [vmem:[%s8638_s27 + $0x500] sm:$0xff] }
  0x86   : > { %4592 = vmatpush1.bf16.msra.mxu1 %v8372_v5  ;;  %5748 = vmatpush1.bf16.msra.mxu0 %v8373_v8  ;;  %v6878_v5 = vcombine.low %v324_v54, %v332_v57  ;;  %v6903_v8 = vcombine.high %v344_v3, %v352_v4  ;;  %v6910_v23 = vcombine.low %v356_v9, %v364_v12  ;;  %v440_v57 = vld [vmem:[%s8638_s27 + $0x7a0] sm:$0xff] }
  0x87   : > { %4593 = vmatprep.subr.bf16.mxu1 %v8529_v0  ;;  %5749 = vmatprep.subr.bf16.mxu0 %v8529_v0  ;;  %v448_v58 = vld [vmem:[%s8638_s27 + $0x7e0] sm:$0xff] }
  0x8a   : > { %4594 = vmatpush1.bf16.msra.mxu1 %v8374_v14  ;;  %5750 = vmatpush1.bf16.msra.mxu0 %v8375_v15  ;;  %v368_v14 = vld [vmem:[%s8638_s27 + $0x560] sm:$0xff]  ;;  %v6894_v15 = vcombine.low %v340_v1, %v348_v2  ;;  %v8395_v1 = vld [vmem:[%s9899_s1 + $0x2f8] sm:$0xff]  }
  0x8b   : > { %4595 = vmatprep.subr.bf16.mxu1 %v8529_v0  ;;  %5751 = vmatprep.subr.bf16.mxu0 %v8529_v0  ;;  %v6918_v24 = vcombine.low %v360_v13, %v368_v14  ;;  %v452_v2 = vld [vmem:[%s8638_s27 + $0x800] sm:$0xff] }
  0x8c   : > { %4351 = vmatmul.mubr.bf16.gmra.mrb[12].mxu1 %v6798_v16  ;;  %5507 = vmatmul.mubr.bf16.gmra.mrb[12].mxu0 %v6806_v18  ;;  %v6902_v16 = vcombine.low %v344_v3, %v352_v4  ;;  %v6919_v18 = vcombine.high %v360_v13, %v368_v14  ;;  %v460_v3 = vld [vmem:[%s8638_s27 + $0x840] sm:$0xff] }
  0x8d   : > { %4358 = vmatprep.mubr.bf16.mxu1 %v6815_v19  ;;  %5514 = vmatprep.mubr.bf16.mxu0 %v6823_v21  ;;  %v372_v19 = vld [vmem:[%s8638_s27 + $0x580] sm:$0xff]  ;;  %v7006_v14 = vcombine.low %v452_v2, %v460_v3 }
  0x8e   : > { %4596 = vmatpush1.bf16.msra.mxu1 %v8376_v17  ;;  %5752 = vmatpush1.bf16.msra.mxu0 %v8377_v20  ;;  %v6911_v17 = vcombine.high %v356_v9, %v364_v12  ;;  %v380_v20 = vld [vmem:[%s8638_s27 + $0x5c0] sm:$0xff] }
  0x8f   : > { %4597 = vmatprep.subr.bf16.mxu1 %v8529_v0  ;;  %5753 = vmatprep.subr.bf16.mxu0 %v8529_v0  ;;  %v376_v21 = vld [vmem:[%s8638_s27 + $0x5a0] sm:$0xff]  ;;  %v6927_v25 = vcombine.high %v372_v19, %v380_v20 }
  0x90   : > { %v6934_v34 = vcombine.low %v376_v21, %v384_v22  ;;  %v456_v4 = vld [vmem:[%s8638_s27 + $0x820] sm:$0xff] }
  0x91   : > { %v472_v12 = vld [vmem:[%s8638_s27 + $0x8a0] sm:$0xff] }
  0x92   : > { %4598 = vmatpush1.bf16.msra.mxu1 %v8378_v26  ;;  %5754 = vmatpush1.bf16.msra.mxu0 %v8379_v27  ;;  %v6935_v26 = vcombine.high %v376_v21, %v384_v22  ;;  %v8390_v27 = vld [vmem:[%s9899_s1 + $0xe8] sm:$0xff]   ;;  %v480_v13 = vld [vmem:[%s8638_s27 + $0x8e0] sm:$0xff] }
  0x93   : > { %4599 = vmatprep.subr.bf16.mxu1 %v8529_v0  ;;  %5755 = vmatprep.subr.bf16.mxu0 %v8529_v0  ;;  %v496_v21 = vld [vmem:[%s8638_s27 + $0x960] sm:$0xff] }
  0x94   : > { %4359 = vmatmul.mubr.bf16.gmra.mrb[16].mxu1 %v6814_v28  ;;  %5515 = vmatmul.mubr.bf16.gmra.mrb[16].mxu0 %v6822_v30  ;;  %v8391_v28 = vld [vmem:[%s9899_s1 + $0x2e8] sm:$0xff]   ;;  %v396_v30 = vld [vmem:[%s8638_s27 + $0x640] sm:$0xff] }
  0x95   : > { %4366 = vmatprep.mubr.bf16.mxu1 %v6831_v31  ;;  %5522 = vmatprep.mubr.bf16.mxu0 %v6839_v33  ;;  %v392_v31 = vld [vmem:[%s8638_s27 + $0x620] sm:$0xff]  ;;  %v6926_v33 = vcombine.low %v372_v19, %v380_v20 }
  0x96   : > { %4600 = vmatpush1.bf16.msra.mxu1 %v8380_v29  ;;  %5756 = vmatpush1.bf16.msra.mxu0 %v8381_v32  ;;  %v388_v29 = vld [vmem:[%s8638_s27 + $0x600] sm:$0xff] }
  0x97   : > { %4601 = vmatprep.subr.bf16.mxu1 %v8529_v0  ;;  %5757 = vmatprep.subr.bf16.mxu0 %v8529_v0  ;;  %v400_v32 = vld [vmem:[%s8638_s27 + $0x660] sm:$0xff]  ;;  %v6943_v35 = vcombine.high %v388_v29, %v396_v30 }
  0x98   : > { %v6951_v36 = vcombine.high %v392_v31, %v400_v32  ;;  %v492_v19 = vld [vmem:[%s8638_s27 + $0x940] sm:$0xff] }
  0x99   : > { %v488_v20 = vld [vmem:[%s8638_s27 + $0x920] sm:$0xff] }
  0x9a   : > { %4602 = vmatpush1.bf16.msra.mxu1 %v8382_v38  ;;  %5758 = vmatpush1.bf16.msra.mxu0 %v8383_v39  ;;  %v412_v38 = vld [vmem:[%s8638_s27 + $0x6c0] sm:$0xff] }
  0x9b   : > { %4603 = vmatprep.subr.bf16.mxu1 %v8529_v0  ;;  %5759 = vmatprep.subr.bf16.mxu0 %v8529_v0  ;;  %v408_v39 = vld [vmem:[%s8638_s27 + $0x6a0] sm:$0xff] }
  0x9c   : > { %4367 = vmatmul.mubr.bf16.gmra.mrb[20].mxu1 %v6830_v40  ;;  %5523 = vmatmul.mubr.bf16.gmra.mrb[20].mxu0 %v6838_v42  ;;  %v416_v40 = vld [vmem:[%s8638_s27 + $0x6e0] sm:$0xff]  ;;  %v6950_v42 = vcombine.low %v392_v31, %v400_v32  ;;  %v7046_v31 = vcombine.low %v488_v20, %v496_v21 }
  0x9d   : > { %4374 = vmatprep.mubr.bf16.mxu1 %v6847_v43  ;;  %5530 = vmatprep.mubr.bf16.mxu0 %v6855_v45  ;;  %v6959_v43 = vcombine.high %v404_v37, %v412_v38  ;;  %v8392_v45 = vld [vmem:[%s9899_s1 + $0xf0] sm:$0xff]  }
  0x9e   : > { %4604 = vmatpush1.bf16.msra.mxu1 %v8384_v41  ;;  %5760 = vmatpush1.bf16.msra.mxu0 %v8385_v44  ;;  %v6942_v41 = vcombine.low %v388_v29, %v396_v30  ;;  %v6967_v44 = vcombine.high %v408_v39, %v416_v40  ;;  %v512_v29 = vld [vmem:[%s8638_s27 + $0x9e0] sm:$0xff] }
  0x9f   : > { %4605 = vmatprep.subr.bf16.mxu1 %v8529_v0  ;;  %5761 = vmatprep.subr.bf16.mxu0 %v8529_v0 }
  0xa2   : > { %4606 = vmatpush1.bf16.msra.mxu1 %v8386_v55  ;;  %5762 = vmatpush1.bf16.msra.mxu0 %v8387_v56  ;;  %v436_v55 = vld [vmem:[%s8638_s27 + $0x780] sm:$0xff] }
  0xa3   : > { %4607 = vmatprep.subr.bf16.mxu1 %v8529_v0  ;;  %5763 = vmatprep.subr.bf16.mxu0 %v8529_v0  ;;  %v444_v56 = vld [vmem:[%s8638_s27 + $0x7c0] sm:$0xff] }
  0xa4   : > { %4375 = vmatmul.mubr.bf16.gmra.mrb[24].mxu1 %v6846_v50  ;;  %5531 = vmatmul.mubr.bf16.gmra.mrb[24].mxu0 %v6854_v51  ;;  %v432_v50 = vld [vmem:[%s8638_s27 + $0x760] sm:$0xff]  ;;  %v6958_v51 = vcombine.low %v404_v37, %v412_v38 }
  0xa5   : > { %4382 = vmatprep.mubr.bf16.mxu1 %v6863_v52  ;;  %5538 = vmatprep.mubr.bf16.mxu0 %v6871_v53  ;;  %v6966_v52 = vcombine.low %v408_v39, %v416_v40  ;;  %v6975_v53 = vcombine.high %v420_v47, %v428_v48  ;;  %v6983_v54 = vcombine.high %v424_v49, %v432_v50  ;;  %v528_v37 = vld [vmem:[%s8638_s27 + $0xa60] sm:$0xff] }
  0xa6   : > { %4608 = vmatpush1.bf16.msra.mxu1 %v8388_v10  ;;  %5764 = vmatpush1.bf16.msra.mxu0 %v8389_v11  ;;  %v468_v10 = vld [vmem:[%s8638_s27 + $0x880] sm:$0xff] }
  0xa7   : > { %4609 = vmatprep.subr.bf16.mxu1 %v8529_v0  ;;  %5765 = vmatprep.subr.bf16.mxu0 %v8529_v0  ;;  %v476_v11 = vld [vmem:[%s8638_s27 + $0x8c0] sm:$0xff] }
  0xa8   : > { %v7022_v22 = vcombine.low %v468_v10, %v476_v11 }
  0xaa   : > { %4610 = vmatpush1.bf16.msra.mxu1 %v8390_v27  ;;  %5766 = vmatpush1.bf16.msra.mxu0 %v8391_v28  ;;  %v508_v27 = vld [vmem:[%s8638_s27 + $0x9c0] sm:$0xff] }
  0xab   : > { %4611 = vmatprep.subr.bf16.mxu1 %v8529_v0  ;;  %5767 = vmatprep.subr.bf16.mxu0 %v8529_v0  ;;  %v504_v28 = vld [vmem:[%s8638_s27 + $0x9a0] sm:$0xff] }
  0xac   : > { %4383 = vmatmul.mubr.bf16.gmra.mrb[28].mxu1 %v6862_v60  ;;  %5539 = vmatmul.mubr.bf16.gmra.mrb[28].mxu0 %v6870_v61  ;;  %v6982_v60 = vcombine.low %v424_v49, %v432_v50  ;;  %v6991_v61 = vcombine.high %v436_v55, %v444_v56  ;;  %v7062_v39 = vcombine.low %v504_v28, %v512_v29  ;;  %v548_v50 = vld [vmem:[%s8638_s27 + $0xb00] sm:$0xff] }
  0xad   : > { %4390 = vmatprep.mubr.bf16.mxu1 %v6879_v62  ;;  %5546 = vmatprep.mubr.bf16.mxu0 %v6887_v63  ;;  %v6999_v62 = vcombine.high %v440_v57, %v448_v58  ;;  %v8394_v63 = vld [vmem:[%s9899_s1 + $0xf8] sm:$0xff]  }
  0xae   : > { %4612 = vmatpush1.bf16.msra.mxu1 %v8392_v45  ;;  %5768 = vmatpush1.bf16.msra.mxu0 %v8393_v46  ;;  %v544_v45 = vld [vmem:[%s8638_s27 + $0xae0] sm:$0xff] }
  0xaf   : > { %4613 = vmatprep.subr.bf16.mxu1 %v8529_v0  ;;  %5769 = vmatprep.subr.bf16.mxu0 %v8529_v0 }
  0xb2   : > { %4614 = vmatpush1.bf16.msra.mxu1 %v8394_v63  ;;  %5770 = vmatpush1.bf16.msra.mxu0 %v8395_v1 }
  0xb3   : > { %4872 = vmatprep.subr.bf16.mxu1 %v8529_v0  ;;  %6028 = vmatprep.subr.bf16.mxu0 %v8529_v0 }
  0xb4   : > { %4391 = vmatmul.mubr.bf16.gmra.mrb[32].mxu1 %v6878_v5  ;;  %5547 = vmatmul.mubr.bf16.gmra.mrb[32].mxu0 %v6886_v6  ;;  %v464_v5 = vld [vmem:[%s8638_s27 + $0x860] sm:$0xff]  ;;  %v6990_v6 = vcombine.low %v436_v55, %v444_v56 }
  0xb5   : > { %4398 = vmatprep.mubr.bf16.mxu1 %v6895_v7  ;;  %5554 = vmatprep.mubr.bf16.mxu0 %v6903_v8  ;;  %v6998_v7 = vcombine.low %v440_v57, %v448_v58  ;;  %v7007_v8 = vcombine.high %v452_v2, %v460_v3  ;;  %v7015_v9 = vcombine.high %v456_v4, %v464_v5  ;;  %v564_v58 = vld [vmem:[%s8638_s27 + $0xb80] sm:$0xff] }
  0xb6   : > { %v580_v3 = vld [vmem:[%s8638_s27 + $0xc00] sm:$0xff] }
  0xbc   : > { %4399 = vmatmul.mubr.bf16.gmra.mrb[36].mxu1 %v6894_v15  ;;  %5555 = vmatmul.mubr.bf16.gmra.mrb[36].mxu0 %v6902_v16  ;;  %v7014_v15 = vcombine.low %v456_v4, %v464_v5  ;;  %v7023_v16 = vcombine.high %v468_v10, %v476_v11  ;;  %v588_v4 = vld [vmem:[%s8638_s27 + $0xc40] sm:$0xff] }
  0xbd   : > { %4406 = vmatprep.mubr.bf16.mxu1 %v6911_v17  ;;  %5562 = vmatprep.mubr.bf16.mxu0 %v6919_v18  ;;  %v7031_v17 = vcombine.high %v472_v12, %v480_v13  ;;  %v484_v18 = vld [vmem:[%s8638_s27 + $0x900] sm:$0xff] }
  0xbe   : > { %v7038_v30 = vcombine.low %v484_v18, %v492_v19  ;;  %v584_v5 = vld [vmem:[%s8638_s27 + $0xc20] sm:$0xff] }
  0xbf   : > { %v596_v11 = vld [vmem:[%s8638_s27 + $0xc80] sm:$0xff] }
  0xc4   : > { %4407 = vmatmul.mubr.bf16.gmra.mrb[40].mxu1 %v6910_v23  ;;  %5563 = vmatmul.mubr.bf16.gmra.mrb[40].mxu0 %v6918_v24  ;;  %v7030_v23 = vcombine.low %v472_v12, %v480_v13  ;;  %v7039_v24 = vcombine.high %v484_v18, %v492_v19  ;;  %v604_v12 = vld [vmem:[%s8638_s27 + $0xcc0] sm:$0xff] }
  0xc5   : > { %4414 = vmatprep.mubr.bf16.mxu1 %v6927_v25  ;;  %5570 = vmatprep.mubr.bf16.mxu0 %v6935_v26  ;;  %v7047_v25 = vcombine.high %v488_v20, %v496_v21  ;;  %v500_v26 = vld [vmem:[%s8638_s27 + $0x980] sm:$0xff] }
  0xc6   : > { %v7055_v32 = vcombine.high %v500_v26, %v508_v27  ;;  %v7054_v38 = vcombine.low %v500_v26, %v508_v27  ;;  %v600_v13 = vld [vmem:[%s8638_s27 + $0xca0] sm:$0xff] }
  0xc7   : > { %v612_v19 = vld [vmem:[%s8638_s27 + $0xd00] sm:$0xff] }
  0xc8   : > { %v620_v20 = vld [vmem:[%s8638_s27 + $0xd40] sm:$0xff] }
  0xc9   : > { %v616_v21 = vld [vmem:[%s8638_s27 + $0xd20] sm:$0xff] }
  0xca   : > { %v628_v27 = vld [vmem:[%s8638_s27 + $0xd80] sm:$0xff] }
  0xcc   : > { %4415 = vmatmul.mubr.bf16.gmra.mrb[44].mxu1 %v6926_v33  ;;  %5571 = vmatmul.mubr.bf16.gmra.mrb[44].mxu0 %v6934_v34  ;;  %v7063_v33 = vcombine.high %v504_v28, %v512_v29  ;;  %v516_v34 = vld [vmem:[%s8638_s27 + $0xa00] sm:$0xff] }
  0xcd   : > { %4422 = vmatprep.mubr.bf16.mxu1 %v6943_v35  ;;  %5578 = vmatprep.mubr.bf16.mxu0 %v6951_v36  ;;  %v524_v35 = vld [vmem:[%s8638_s27 + $0xa40] sm:$0xff] }
  0xce   : > { %v520_v36 = vld [vmem:[%s8638_s27 + $0xa20] sm:$0xff]  ;;  %v7071_v40 = vcombine.high %v516_v34, %v524_v35  ;;  %v7070_v46 = vcombine.low %v516_v34, %v524_v35 }
  0xcf   : > { %v7078_v47 = vcombine.low %v520_v36, %v528_v37  ;;  %v636_v28 = vld [vmem:[%s8638_s27 + $0xdc0] sm:$0xff] }
  0xd0   : > { %v632_v29 = vld [vmem:[%s8638_s27 + $0xda0] sm:$0xff] }
  0xd1   : > { %v644_v35 = vld [vmem:[%s8638_s27 + $0xe00] sm:$0xff] }
  0xd4   : > { %4423 = vmatmul.mubr.bf16.gmra.mrb[48].mxu1 %v6942_v41  ;;  %5579 = vmatmul.mubr.bf16.gmra.mrb[48].mxu0 %v6950_v42  ;;  %v7079_v41 = vcombine.high %v520_v36, %v528_v37  ;;  %v532_v42 = vld [vmem:[%s8638_s27 + $0xa80] sm:$0xff] }
  0xd5   : > { %4430 = vmatprep.mubr.bf16.mxu1 %v6959_v43  ;;  %5586 = vmatprep.mubr.bf16.mxu0 %v6967_v44  ;;  %v540_v43 = vld [vmem:[%s8638_s27 + $0xac0] sm:$0xff] }
  0xd6   : > { %v536_v44 = vld [vmem:[%s8638_s27 + $0xaa0] sm:$0xff]  ;;  %v7087_v48 = vcombine.high %v532_v42, %v540_v43 }
  0xd7   : > { %v7095_v49 = vcombine.high %v536_v44, %v544_v45  ;;  %v7094_v55 = vcombine.low %v536_v44, %v544_v45  ;;  %v652_v36 = vld [vmem:[%s8638_s27 + $0xe40] sm:$0xff] }
  0xd8   : > { %v648_v37 = vld [vmem:[%s8638_s27 + $0xe20] sm:$0xff] }
  0xd9   : > { %v668_v44 = vld [vmem:[%s8638_s27 + $0xec0] sm:$0xff] }
  0xda   : > { %v664_v45 = vld [vmem:[%s8638_s27 + $0xea0] sm:$0xff] }
  0xdc   : > { %4431 = vmatmul.mubr.bf16.gmra.mrb[52].mxu1 %v6958_v51  ;;  %5587 = vmatmul.mubr.bf16.gmra.mrb[52].mxu0 %v6966_v52  ;;  %v556_v51 = vld [vmem:[%s8638_s27 + $0xb40] sm:$0xff] }
  0xdd   : > { %4438 = vmatprep.mubr.bf16.mxu1 %v6975_v53  ;;  %5594 = vmatprep.mubr.bf16.mxu0 %v6983_v54  ;;  %v552_v52 = vld [vmem:[%s8638_s27 + $0xb20] sm:$0xff]  ;;  %v7086_v54 = vcombine.low %v532_v42, %v540_v43  ;;  %v7103_v56 = vcombine.high %v548_v50, %v556_v51 }
  0xde   : > { %v560_v53 = vld [vmem:[%s8638_s27 + $0xb60] sm:$0xff] }
  0xdf   : > { %v7111_v57 = vcombine.high %v552_v52, %v560_v53  ;;  %v7110_v63 = vcombine.low %v552_v52, %v560_v53  ;;  %v660_v43 = vld [vmem:[%s8638_s27 + $0xe80] sm:$0xff] }
  0xe0   : > { %v684_v52 = vld [vmem:[%s8638_s27 + $0xf40] sm:$0xff] }
  0xe1   : > { %v680_v53 = vld [vmem:[%s8638_s27 + $0xf20] sm:$0xff] }
  0xe4   : > { %4439 = vmatmul.mubr.bf16.gmra.mrb[56].mxu1 %v6974_v59  ;;  %5595 = vmatmul.mubr.bf16.gmra.mrb[56].mxu0 %v6982_v60  ;;  %v572_v59 = vld [vmem:[%s8638_s27 + $0xbc0] sm:$0xff] }
  0xe5   : > { %4446 = vmatprep.mubr.bf16.mxu1 %v6991_v61  ;;  %5602 = vmatprep.mubr.bf16.mxu0 %v6999_v62  ;;  %v568_v60 = vld [vmem:[%s8638_s27 + $0xba0] sm:$0xff]  ;;  %v7102_v62 = vcombine.low %v548_v50, %v556_v51  ;;  %v7119_v1 = vcombine.high %v564_v58, %v572_v59 }
  0xe6   : > { %v576_v61 = vld [vmem:[%s8638_s27 + $0xbe0] sm:$0xff] }
  0xe7   : > { %v7127_v2 = vcombine.high %v568_v60, %v576_v61  ;;  %v676_v51 = vld [vmem:[%s8638_s27 + $0xf00] sm:$0xff] }
  0xec   : > { %4447 = vmatmul.mubr.bf16.gmra.mrb[60].mxu1 %v6990_v6  ;;  %5603 = vmatmul.mubr.bf16.gmra.mrb[60].mxu0 %v6998_v7  ;;  %v592_v6 = vld [vmem:[%s8638_s27 + $0xc60] sm:$0xff]  ;;  %v7118_v7 = vcombine.low %v564_v58, %v572_v59 }
  0xed   : > { %4454 = vmatprep.mubr.bf16.mxu1 %v7007_v8  ;;  %5610 = vmatprep.mubr.bf16.mxu0 %v7015_v9  ;;  %v7126_v8 = vcombine.low %v568_v60, %v576_v61  ;;  %v7135_v9 = vcombine.high %v580_v3, %v588_v4  ;;  %v7143_v10 = vcombine.high %v584_v5, %v592_v6  ;;  %v692_v59 = vld [vmem:[%s8638_s27 + $0xf80] sm:$0xff] }
  0xee   : > { %v700_v60 = vld [vmem:[%s8638_s27 + $0xfc0] sm:$0xff] }
  0xef   : > { %v696_v61 = vld [vmem:[%s8638_s27 + $0xfa0] sm:$0xff] }
  0xf4   : > { %4455 = vmatmul.mubr.bf16.gmra.mrb[64].mxu1 %v7006_v14  ;;  %5611 = vmatmul.mubr.bf16.gmra.mrb[64].mxu0 %v7014_v15  ;;  %v608_v14 = vld [vmem:[%s8638_s27 + $0xce0] sm:$0xff]  ;;  %v7134_v15 = vcombine.low %v580_v3, %v588_v4  ;;  %v197_v4 = vld [vmem:[%s8638_s27 + $0x8] sm:$0xff] }
  0xf5   : > { %4462 = vmatprep.mubr.bf16.mxu1 %v7023_v16  ;;  %5618 = vmatprep.mubr.bf16.mxu0 %v7031_v17  ;;  %v7142_v16 = vcombine.low %v584_v5, %v592_v6  ;;  %v7151_v17 = vcombine.high %v596_v11, %v604_v12  ;;  %v7159_v18 = vcombine.high %v600_v13, %v608_v14  ;;  %v205_v5 = vld [vmem:[%s8638_s27 + $0x48] sm:$0xff] }
  0xf6   : > { %v201_v6 = vld [vmem:[%s8638_s27 + $0x28] sm:$0xff] }
  0xfc   : > { %4463 = vmatmul.mubr.bf16.gmra.mrb[68].mxu1 %v7022_v22  ;;  %5619 = vmatmul.mubr.bf16.gmra.mrb[68].mxu0 %v7030_v23  ;;  %v624_v22 = vld [vmem:[%s8638_s27 + $0xd60] sm:$0xff]  ;;  %v7150_v23 = vcombine.low %v596_v11, %v604_v12  ;;  %v213_v12 = vld [vmem:[%s8638_s27 + $0x88] sm:$0xff] }
  0xfd   : > { %4470 = vmatprep.mubr.bf16.mxu1 %v7039_v24  ;;  %5626 = vmatprep.mubr.bf16.mxu0 %v7047_v25  ;;  %v7158_v24 = vcombine.low %v600_v13, %v608_v14  ;;  %v7167_v25 = vcombine.high %v612_v19, %v620_v20  ;;  %v7175_v26 = vcombine.high %v616_v21, %v624_v22  ;;  %v221_v13 = vld [vmem:[%s8638_s27 + $0xc8] sm:$0xff] }
  0xfe   : > { %v6752_v14 = vcombine.low %v197_v4, %v205_v5 }
 0x104   : > { %4471 = vmatmul.mubr.bf16.gmra.mrb[72].mxu1 %v7038_v30  ;;  %5627 = vmatmul.mubr.bf16.gmra.mrb[72].mxu0 %v7046_v31  ;;  %v640_v30 = vld [vmem:[%s8638_s27 + $0xde0] sm:$0xff]  ;;  %v7166_v31 = vcombine.low %v612_v19, %v620_v20  ;;  %v6769_v20 = vcombine.high %v213_v12, %v221_v13 }
 0x105   : > { %4478 = vmatprep.mubr.bf16.mxu1 %v7055_v32  ;;  %5634 = vmatprep.mubr.bf16.mxu0 %v7063_v33  ;;  %v7174_v32 = vcombine.low %v616_v21, %v624_v22  ;;  %v7183_v33 = vcombine.high %v628_v27, %v636_v28  ;;  %v7191_v34 = vcombine.high %v632_v29, %v640_v30  ;;  %v8397_v19 = vld [vmem:[%s9899_s1 + $0x300] sm:$0xff]   ;;  %v8398_v22 = vld [vmem:[%s9899_s1 + $0x108] sm:$0xff]  }
 0x10c   : > { %4479 = vmatmul.mubr.bf16.gmra.mrb[76].mxu1 %v7054_v38  ;;  %5635 = vmatmul.mubr.bf16.gmra.mrb[76].mxu0 %v7062_v39  ;;  %v656_v38 = vld [vmem:[%s8638_s27 + $0xe60] sm:$0xff]  ;;  %v7182_v39 = vcombine.low %v628_v27, %v636_v28  ;;  %v241_v27 = vld [vmem:[%s8638_s27 + $0x168] sm:$0xff]  ;;  %v6768_v28 = vcombine.low %v213_v12, %v221_v13 }
 0x10d   : > { %4486 = vmatprep.mubr.bf16.mxu1 %v7071_v40  ;;  %5642 = vmatprep.mubr.bf16.mxu0 %v7079_v41  ;;  %v7190_v40 = vcombine.low %v632_v29, %v640_v30  ;;  %v7199_v41 = vcombine.high %v644_v35, %v652_v36  ;;  %v7207_v42 = vcombine.high %v648_v37, %v656_v38  ;;  %v8415_v12 = vld [vmem:[%s9899_s1 + $0x348] sm:$0xff]  }
 0x114   : > { %4487 = vmatmul.mubr.bf16.gmra.mrb[80].mxu1 %v7070_v46  ;;  %5643 = vmatmul.mubr.bf16.gmra.mrb[80].mxu0 %v7078_v47  ;;  %v672_v46 = vld [vmem:[%s8638_s27 + $0xee0] sm:$0xff]  ;;  %v7198_v47 = vcombine.low %v644_v35, %v652_v36  ;;  %v253_v35 = vld [vmem:[%s8638_s27 + $0x1c8] sm:$0xff]  ;;  %v8402_v36 = vld [vmem:[%s9899_s1 + $0x118] sm:$0xff]  }
 0x115   : > { %4494 = vmatprep.mubr.bf16.mxu1 %v7087_v48  ;;  %5650 = vmatprep.mubr.bf16.mxu0 %v7095_v49  ;;  %v7206_v48 = vcombine.low %v648_v37, %v656_v38  ;;  %v7215_v49 = vcombine.high %v660_v43, %v668_v44  ;;  %v7223_v50 = vcombine.high %v664_v45, %v672_v46  ;;  %v249_v37 = vld [vmem:[%s8638_s27 + $0x1a8] sm:$0xff] }
 0x116   : > { %v257_v38 = vld [vmem:[%s8638_s27 + $0x1e8] sm:$0xff] }
 0x11c   : > { %4495 = vmatmul.mubr.bf16.gmra.mrb[84].mxu1 %v7086_v54  ;;  %5651 = vmatmul.mubr.bf16.gmra.mrb[84].mxu0 %v7094_v55  ;;  %v688_v54 = vld [vmem:[%s8638_s27 + $0xf60] sm:$0xff]  ;;  %v7214_v55 = vcombine.low %v660_v43, %v668_v44  ;;  %v6809_v43 = vcombine.high %v249_v37, %v257_v38 }
 0x11d   : > { %4502 = vmatprep.mubr.bf16.mxu1 %v7103_v56  ;;  %5658 = vmatprep.mubr.bf16.mxu0 %v7111_v57  ;;  %v7222_v56 = vcombine.low %v664_v45, %v672_v46  ;;  %v7231_v57 = vcombine.high %v676_v51, %v684_v52  ;;  %v7239_v58 = vcombine.high %v680_v53, %v688_v54  ;;  %v8404_v44 = vld [vmem:[%s9899_s1 + $0x120] sm:$0xff]   ;;  %v261_v46 = vld [vmem:[%s8638_s27 + $0x208] sm:$0xff] }
 0x11e   : > { %v8405_v45 = vld [vmem:[%s9899_s1 + $0x320] sm:$0xff]  }
 0x124   : > { %4503 = vmatmul.mubr.bf16.gmra.mrb[88].mxu1 %v7102_v62  ;;  %5659 = vmatmul.mubr.bf16.gmra.mrb[88].mxu0 %v7110_v63  ;;  %v704_v62 = vld [vmem:[%s8638_s27 + $0xfe0] sm:$0xff]  ;;  %v7230_v63 = vcombine.low %v676_v51, %v684_v52  ;;  %v8407_v51 = vld [vmem:[%s9899_s1 + $0x328] sm:$0xff]  }
 0x125   : > { %4510 = vmatprep.mubr.bf16.mxu1 %v7119_v1  ;;  %5666 = vmatprep.mubr.bf16.mxu0 %v7127_v2  ;;  %v7238_v1 = vcombine.low %v680_v53, %v688_v54  ;;  %v7247_v2 = vcombine.high %v692_v59, %v700_v60  ;;  %v7255_v3 = vcombine.high %v696_v61, %v704_v62 }
 0x126   : > { %v6808_v53 = vcombine.low %v249_v37, %v257_v38  ;;  %v341_v37 = vld [vmem:[%s8638_s27 + $0x488] sm:$0xff] }
 0x127   : > { %v349_v38 = vld [vmem:[%s8638_s27 + $0x4c8] sm:$0xff] }
 0x12c   : > { %4511 = vmatmul.mubr.bf16.gmra.mrb[92].mxu1 %v7118_v7  ;;  %5667 = vmatmul.mubr.bf16.gmra.mrb[92].mxu0 %v7126_v8  ;;  %v209_v7 = vld [vmem:[%s8638_s27 + $0x68] sm:$0xff]  ;;  %v7246_v8 = vcombine.low %v692_v59, %v700_v60  ;;  %v8410_v60 = vld [vmem:[%s9899_s1 + $0x138] sm:$0xff]  }
 0x12d   : > { %4518 = vmatprep.mubr.bf16.mxu1 %v7135_v9  ;;  %5674 = vmatprep.mubr.bf16.mxu0 %v7143_v10  ;;  %v7254_v9 = vcombine.low %v696_v61, %v704_v62  ;;  %v6753_v10 = vcombine.high %v197_v4, %v205_v5  ;;  %v6761_v11 = vcombine.high %v201_v6, %v209_v7  ;;  %v285_v59 = vld [vmem:[%s8638_s27 + $0x2c8] sm:$0xff]  ;;  %v8412_v5 = vld [vmem:[%s9899_s1 + $0x140] sm:$0xff]  }
 0x12e   : > { %v281_v61 = vld [vmem:[%s8638_s27 + $0x2a8] sm:$0xff] }
 0x12f   : > { %v289_v62 = vld [vmem:[%s8638_s27 + $0x2e8] sm:$0xff] }
 0x130   : > { %v6841_v4 = vcombine.high %v281_v61, %v289_v62 }
 0x134   : > { %4519 = vmatmul.mubr.bf16.gmra.mrb[96].mxu1 %v7134_v15  ;;  %5675 = vmatmul.mubr.bf16.gmra.mrb[96].mxu0 %v7142_v16  ;;  %v217_v15 = vld [vmem:[%s8638_s27 + $0xa8] sm:$0xff] }
 0x135   : > { %4526 = vmatprep.mubr.bf16.mxu1 %v7151_v17  ;;  %5682 = vmatprep.mubr.bf16.mxu0 %v7159_v18  ;;  %v225_v16 = vld [vmem:[%s8638_s27 + $0xe8] sm:$0xff]  ;;  %v6760_v17 = vcombine.low %v201_v6, %v209_v7  ;;  %v8396_v18 = vld [vmem:[%s9899_s1 + $0x100] sm:$0xff]  }
 0x136   : > { %v6777_v21 = vcombine.high %v217_v15, %v225_v16  ;;  %v6776_v29 = vcombine.low %v217_v15, %v225_v16  ;;  %v8413_v6 = vld [vmem:[%s9899_s1 + $0x340] sm:$0xff]   ;;  %v293_v7 = vld [vmem:[%s8638_s27 + $0x308] sm:$0xff] }
 0x13c   : > { %4527 = vmatmul.mubr.bf16.gmra.mrb[100].mxu1 %v7150_v23  ;;  %5683 = vmatmul.mubr.bf16.gmra.mrb[100].mxu0 %v7158_v24  ;;  %v229_v23 = vld [vmem:[%s8638_s27 + $0x108] sm:$0xff] }
 0x13d   : > { %4534 = vmatprep.mubr.bf16.mxu1 %v7167_v25  ;;  %5690 = vmatprep.mubr.bf16.mxu0 %v7175_v26  ;;  %v237_v24 = vld [vmem:[%s8638_s27 + $0x148] sm:$0xff] }
 0x13e   : > { %v8399_v25 = vld [vmem:[%s9899_s1 + $0x308] sm:$0xff]   ;;  %v6785_v30 = vcombine.high %v229_v23, %v237_v24 }
 0x13f   : > { %v233_v26 = vld [vmem:[%s8638_s27 + $0x128] sm:$0xff] }
 0x144   : > { %4535 = vmatmul.mubr.bf16.gmra.mrb[104].mxu1 %v7166_v31  ;;  %5691 = vmatmul.mubr.bf16.gmra.mrb[104].mxu0 %v7174_v32  ;;  %v6793_v31 = vcombine.high %v233_v26, %v241_v27  ;;  %v8400_v32 = vld [vmem:[%s9899_s1 + $0x110] sm:$0xff]  }
 0x145   : > { %4542 = vmatprep.mubr.bf16.mxu1 %v7183_v33  ;;  %5698 = vmatprep.mubr.bf16.mxu0 %v7191_v34  ;;  %v8401_v33 = vld [vmem:[%s9899_s1 + $0x310] sm:$0xff]   ;;  %v245_v34 = vld [vmem:[%s8638_s27 + $0x188] sm:$0xff] }
 0x146   : > { %v6800_v52 = vcombine.low %v245_v34, %v253_v35 }
 0x14c   : > { %4543 = vmatmul.mubr.bf16.gmra.mrb[108].mxu1 %v7182_v39  ;;  %5699 = vmatmul.mubr.bf16.gmra.mrb[108].mxu0 %v7190_v40  ;;  %v8403_v39 = vld [vmem:[%s9899_s1 + $0x318] sm:$0xff]   ;;  %v6784_v40 = vcombine.low %v229_v23, %v237_v24 }
 0x14d   : > { %4550 = vmatprep.mubr.bf16.mxu1 %v7199_v41  ;;  %5706 = vmatprep.mubr.bf16.mxu0 %v7207_v42  ;;  %v6792_v41 = vcombine.low %v233_v26, %v241_v27  ;;  %v6801_v42 = vcombine.high %v245_v34, %v253_v35  ;;  %v8418_v27 = vld [vmem:[%s9899_s1 + $0x158] sm:$0xff]  }
 0x154   : > { %4551 = vmatmul.mubr.bf16.gmra.mrb[112].mxu1 %v7198_v47  ;;  %5707 = vmatmul.mubr.bf16.gmra.mrb[112].mxu0 %v7206_v48  ;;  %v269_v47 = vld [vmem:[%s8638_s27 + $0x248] sm:$0xff] }
 0x155   : > { %4558 = vmatprep.mubr.bf16.mxu1 %v7215_v49  ;;  %5714 = vmatprep.mubr.bf16.mxu0 %v7223_v50  ;;  %v8406_v48 = vld [vmem:[%s9899_s1 + $0x128] sm:$0xff]   ;;  %v6817_v54 = vcombine.high %v261_v46, %v269_v47 }
 0x156   : > { %v265_v49 = vld [vmem:[%s8638_s27 + $0x228] sm:$0xff] }
 0x157   : > { %v273_v50 = vld [vmem:[%s8638_s27 + $0x268] sm:$0xff] }
 0x15c   : > { %4559 = vmatmul.mubr.bf16.gmra.mrb[116].mxu1 %v7214_v55  ;;  %5715 = vmatmul.mubr.bf16.gmra.mrb[116].mxu0 %v7222_v56  ;;  %v6825_v55 = vcombine.high %v265_v49, %v273_v50  ;;  %v8408_v56 = vld [vmem:[%s9899_s1 + $0x130] sm:$0xff]  }
 0x15d   : > { %4566 = vmatprep.mubr.bf16.mxu1 %v7231_v57  ;;  %5722 = vmatprep.mubr.bf16.mxu0 %v7239_v58  ;;  %v8409_v57 = vld [vmem:[%s9899_s1 + $0x330] sm:$0xff]   ;;  %v277_v58 = vld [vmem:[%s8638_s27 + $0x288] sm:$0xff] }
 0x15e   : > { %v6832_v13 = vcombine.low %v277_v58, %v285_v59 }
 0x164   : > { %4567 = vmatmul.mubr.bf16.gmra.mrb[120].mxu1 %v7230_v63  ;;  %5723 = vmatmul.mubr.bf16.gmra.mrb[120].mxu0 %v7238_v1  ;;  %v8411_v63 = vld [vmem:[%s9899_s1 + $0x338] sm:$0xff]   ;;  %v6816_v1 = vcombine.low %v261_v46, %v269_v47  ;;  %v8421_v46 = vld [vmem:[%s9899_s1 + $0x360] sm:$0xff]   ;;  %v357_v47 = vld [vmem:[%s8638_s27 + $0x508] sm:$0xff] }
 0x165   : > { %4574 = vmatprep.mubr.bf16.mxu1 %v7247_v2  ;;  %5730 = vmatprep.mubr.bf16.mxu0 %v7255_v3  ;;  %v6824_v2 = vcombine.low %v265_v49, %v273_v50  ;;  %v6833_v3 = vcombine.high %v277_v58, %v285_v59  ;;  %v361_v49 = vld [vmem:[%s8638_s27 + $0x528] sm:$0xff] }
 0x166   : > { %v369_v50 = vld [vmem:[%s8638_s27 + $0x568] sm:$0xff] }
 0x167   : > { %v385_v58 = vld [vmem:[%s8638_s27 + $0x5e8] sm:$0xff] }
 0x16c   : > { %4575 = vmatmul.mubr.bf16.gmra.mrb[124].mxu1 %v7246_v8  ;;  %5731 = vmatmul.mubr.bf16.gmra.mrb[124].mxu0 %v7254_v9  ;;  %v301_v8 = vld [vmem:[%s8638_s27 + $0x348] sm:$0xff] }
 0x16d   : > { %4615 = vmatprep.mubr.bf16.mxu1 %v6753_v10  ;;  %5771 = vmatprep.mubr.bf16.mxu0 %v6761_v11  ;;  %v8414_v9 = vld [vmem:[%s9899_s1 + $0x148] sm:$0xff]   ;;  %v6849_v15 = vcombine.high %v293_v7, %v301_v8  ;;  %v6848_v23 = vcombine.low %v293_v7, %v301_v8 }
 0x16e   : > { %v297_v10 = vld [vmem:[%s8638_s27 + $0x328] sm:$0xff] }
 0x16f   : > { %v305_v11 = vld [vmem:[%s8638_s27 + $0x368] sm:$0xff] }
 0x170   : > { %v6857_v16 = vcombine.high %v297_v10, %v305_v11  ;;  %v6856_v24 = vcombine.low %v297_v10, %v305_v11  ;;  %v405_v10 = vld [vmem:[%s8638_s27 + $0x688] sm:$0xff] }
 0x171   : > { %v413_v11 = vld [vmem:[%s8638_s27 + $0x6c8] sm:$0xff] }
 0x174   : > { %4616 = vmatmul.mubr.bf16.vlgmr.msra.gmra.mrb[0].mxu1 %v6752_v14  ;;  %5772 = vmatmul.mubr.bf16.vlgmr.msra.gmra.mrb[0].mxu0 %v6760_v17  ;;  %v6840_v14 = vcombine.low %v281_v61, %v289_v62  ;;  %v8416_v17 = vld [vmem:[%s9899_s1 + $0x150] sm:$0xff]  }
 0x175   : > { %4873 = vmatpush1.bf16.msra.mxu1 %v8396_v18  ;;  %6029 = vmatpush1.bf16.msra.mxu0 %v8397_v19  ;;  %v8417_v18 = vld [vmem:[%s9899_s1 + $0x350] sm:$0xff]   ;;  %v309_v19 = vld [vmem:[%s8638_s27 + $0x388] sm:$0xff] }
 0x176   : > { %4623 = vmatprep.mubr.bf16.mxu1 %v6769_v20  ;;  %5779 = vmatprep.mubr.bf16.mxu0 %v6777_v21  ;;  %v317_v20 = vld [vmem:[%s8638_s27 + $0x3c8] sm:$0xff] }
 0x177   : > { %4874 = vmatprep.subr.bf16.mxu1 %v8529_v0  ;;  %6030 = vmatprep.subr.bf16.mxu0 %v8529_v0  ;;  %v313_v21 = vld [vmem:[%s8638_s27 + $0x3a8] sm:$0xff] }
 0x179   : > { %4875 = vmatpush1.bf16.msra.mxu1 %v8398_v22  ;;  %6031 = vmatpush1.bf16.msra.mxu0 %v8399_v25  ;;  %v321_v22 = vld [vmem:[%s8638_s27 + $0x3e8] sm:$0xff]  ;;  %v6865_v25 = vcombine.high %v309_v19, %v317_v20 }
 0x17a   : > { %4876 = vmatprep.subr.bf16.mxu1 %v8529_v0  ;;  %6032 = vmatprep.subr.bf16.mxu0 %v8529_v0  ;;  %v6873_v26 = vcombine.high %v313_v21, %v321_v22  ;;  %v6872_v34 = vcombine.low %v313_v21, %v321_v22  ;;  %v429_v21 = vld [vmem:[%s8638_s27 + $0x748] sm:$0xff] }
 0x17b   : > { %v425_v22 = vld [vmem:[%s8638_s27 + $0x728] sm:$0xff] }
 0x17c   : > { %4624 = vmatmul.mubr.bf16.gmra.mrb[4].mxu1 %v6768_v28  ;;  %5780 = vmatmul.mubr.bf16.gmra.mrb[4].mxu0 %v6776_v29  ;;  %v8419_v28 = vld [vmem:[%s9899_s1 + $0x358] sm:$0xff]   ;;  %v325_v29 = vld [vmem:[%s8638_s27 + $0x408] sm:$0xff] }
 0x17d   : > { %4631 = vmatprep.mubr.bf16.mxu1 %v6785_v30  ;;  %5787 = vmatprep.mubr.bf16.mxu0 %v6793_v31  ;;  %v333_v30 = vld [vmem:[%s8638_s27 + $0x448] sm:$0xff] }
 0x17e   : > { %4877 = vmatpush1.bf16.msra.mxu1 %v8400_v32  ;;  %6033 = vmatpush1.bf16.msra.mxu0 %v8401_v33  ;;  %v329_v31 = vld [vmem:[%s8638_s27 + $0x428] sm:$0xff]  ;;  %v6864_v33 = vcombine.low %v309_v19, %v317_v20  ;;  %v6881_v35 = vcombine.high %v325_v29, %v333_v30  ;;  %v8425_v19 = vld [vmem:[%s9899_s1 + $0x370] sm:$0xff]  }
 0x17f   : > { %4878 = vmatprep.subr.bf16.mxu1 %v8529_v0  ;;  %6034 = vmatprep.subr.bf16.mxu0 %v8529_v0  ;;  %v337_v32 = vld [vmem:[%s8638_s27 + $0x468] sm:$0xff] }
 0x180   : > { %v421_v20 = vld [vmem:[%s8638_s27 + $0x708] sm:$0xff] }
 0x182   : > { %4879 = vmatpush1.bf16.msra.mxu1 %v8402_v36  ;;  %6035 = vmatpush1.bf16.msra.mxu0 %v8403_v39  ;;  %v6889_v36 = vcombine.high %v329_v31, %v337_v32  ;;  %v345_v39 = vld [vmem:[%s8638_s27 + $0x4a8] sm:$0xff] }
 0x183   : > { %4880 = vmatprep.subr.bf16.mxu1 %v8529_v0  ;;  %6036 = vmatprep.subr.bf16.mxu0 %v8529_v0 }
 0x184   : > { %4632 = vmatmul.mubr.bf16.gmra.mrb[8].mxu1 %v6784_v40  ;;  %5788 = vmatmul.mubr.bf16.gmra.mrb[8].mxu0 %v6792_v41  ;;  %v353_v40 = vld [vmem:[%s8638_s27 + $0x4e8] sm:$0xff]  ;;  %v6880_v41 = vcombine.low %v325_v29, %v333_v30 }
 0x185   : > { %4639 = vmatprep.mubr.bf16.mxu1 %v6801_v42  ;;  %5795 = vmatprep.mubr.bf16.mxu0 %v6809_v43  ;;  %v6888_v42 = vcombine.low %v329_v31, %v337_v32  ;;  %v6897_v43 = vcombine.high %v341_v37, %v349_v38  ;;  %v445_v29 = vld [vmem:[%s8638_s27 + $0x7c8] sm:$0xff]  ;;  %v6976_v32 = vcombine.low %v421_v20, %v429_v21 }
 0x186   : > { %4881 = vmatpush1.bf16.msra.mxu1 %v8404_v44  ;;  %6037 = vmatpush1.bf16.msra.mxu0 %v8405_v45  ;;  %v6905_v44 = vcombine.high %v345_v39, %v353_v40  ;;  %v8420_v45 = vld [vmem:[%s9899_s1 + $0x160] sm:$0xff]   ;;  %v441_v30 = vld [vmem:[%s8638_s27 + $0x7a8] sm:$0xff] }
 0x187   : > { %4882 = vmatprep.subr.bf16.mxu1 %v8529_v0  ;;  %6038 = vmatprep.subr.bf16.mxu0 %v8529_v0  ;;  %v449_v31 = vld [vmem:[%s8638_s27 + $0x7e8] sm:$0xff] }
 0x18a   : > { %4883 = vmatpush1.bf16.msra.mxu1 %v8406_v48  ;;  %6039 = vmatpush1.bf16.msra.mxu0 %v8407_v51  ;;  %v365_v48 = vld [vmem:[%s8638_s27 + $0x548] sm:$0xff]  ;;  %v6896_v51 = vcombine.low %v341_v37, %v349_v38  ;;  %v8427_v37 = vld [vmem:[%s9899_s1 + $0x378] sm:$0xff]  }
 0x18b   : > { %4884 = vmatprep.subr.bf16.mxu1 %v8529_v0  ;;  %6040 = vmatprep.subr.bf16.mxu0 %v8529_v0  ;;  %v6912_v59 = vcombine.low %v357_v47, %v365_v48  ;;  %v453_v38 = vld [vmem:[%s8638_s27 + $0x808] sm:$0xff] }
 0x18c   : > { %4640 = vmatmul.mubr.bf16.gmra.mrb[12].mxu1 %v6800_v52  ;;  %5796 = vmatmul.mubr.bf16.gmra.mrb[12].mxu0 %v6808_v53  ;;  %v6904_v52 = vcombine.low %v345_v39, %v353_v40  ;;  %v6913_v53 = vcombine.high %v357_v47, %v365_v48  ;;  %v461_v39 = vld [vmem:[%s8638_s27 + $0x848] sm:$0xff] }
 0x18d   : > { %4647 = vmatprep.mubr.bf16.mxu1 %v6817_v54  ;;  %5803 = vmatprep.mubr.bf16.mxu0 %v6825_v55  ;;  %v6921_v54 = vcombine.high %v361_v49, %v369_v50  ;;  %v373_v55 = vld [vmem:[%s8638_s27 + $0x588] sm:$0xff] }
 0x18e   : > { %4885 = vmatpush1.bf16.msra.mxu1 %v8408_v56  ;;  %6041 = vmatpush1.bf16.msra.mxu0 %v8409_v57  ;;  %v381_v56 = vld [vmem:[%s8638_s27 + $0x5c8] sm:$0xff] }
 0x18f   : > { %4886 = vmatprep.subr.bf16.mxu1 %v8529_v0  ;;  %6042 = vmatprep.subr.bf16.mxu0 %v8529_v0  ;;  %v377_v57 = vld [vmem:[%s8638_s27 + $0x5a8] sm:$0xff]  ;;  %v6929_v61 = vcombine.high %v373_v55, %v381_v56 }
 0x190   : > { %v6937_v62 = vcombine.high %v377_v57, %v385_v58  ;;  %v6936_v7 = vcombine.low %v377_v57, %v385_v58  ;;  %v457_v40 = vld [vmem:[%s8638_s27 + $0x828] sm:$0xff] }
 0x191   : > { %v477_v47 = vld [vmem:[%s8638_s27 + $0x8c8] sm:$0xff] }
 0x192   : > { %4887 = vmatpush1.bf16.msra.mxu1 %v8410_v60  ;;  %6043 = vmatpush1.bf16.msra.mxu0 %v8411_v63  ;;  %v6920_v60 = vcombine.low %v361_v49, %v369_v50  ;;  %v8422_v63 = vld [vmem:[%s9899_s1 + $0x168] sm:$0xff]   ;;  %v7008_v50 = vcombine.low %v453_v38, %v461_v39 }
 0x193   : > { %4888 = vmatprep.subr.bf16.mxu1 %v8529_v0  ;;  %6044 = vmatprep.subr.bf16.mxu0 %v8529_v0  ;;  %v473_v48 = vld [vmem:[%s8638_s27 + $0x8a8] sm:$0xff] }
 0x194   : > { %4648 = vmatmul.mubr.bf16.gmra.mrb[16].mxu1 %v6816_v1  ;;  %5804 = vmatmul.mubr.bf16.gmra.mrb[16].mxu0 %v6824_v2  ;;  %v8423_v1 = vld [vmem:[%s9899_s1 + $0x368] sm:$0xff]  }
 0x195   : > { %4655 = vmatprep.mubr.bf16.mxu1 %v6833_v3  ;;  %5811 = vmatprep.mubr.bf16.mxu0 %v6841_v4  ;;  %v389_v2 = vld [vmem:[%s8638_s27 + $0x608] sm:$0xff] }
 0x196   : > { %4889 = vmatpush1.bf16.msra.mxu1 %v8412_v5  ;;  %6045 = vmatpush1.bf16.msra.mxu0 %v8413_v6  ;;  %v397_v3 = vld [vmem:[%s8638_s27 + $0x648] sm:$0xff]  ;;  %v6928_v6 = vcombine.low %v373_v55, %v381_v56 }
 0x197   : > { %4890 = vmatprep.subr.bf16.mxu1 %v8529_v0  ;;  %6046 = vmatprep.subr.bf16.mxu0 %v8529_v0  ;;  %v393_v4 = vld [vmem:[%s8638_s27 + $0x628] sm:$0xff]  ;;  %v6945_v8 = vcombine.high %v389_v2, %v397_v3 }
 0x198   : > { %v401_v5 = vld [vmem:[%s8638_s27 + $0x668] sm:$0xff] }
 0x199   : > { %v481_v49 = vld [vmem:[%s8638_s27 + $0x8e8] sm:$0xff] }
 0x19a   : > { %4891 = vmatpush1.bf16.msra.mxu1 %v8414_v9  ;;  %6047 = vmatpush1.bf16.msra.mxu0 %v8415_v12  ;;  %v6953_v9 = vcombine.high %v393_v4, %v401_v5  ;;  %v409_v12 = vld [vmem:[%s8638_s27 + $0x6a8] sm:$0xff] }
 0x19b   : > { %4892 = vmatprep.subr.bf16.mxu1 %v8529_v0  ;;  %6048 = vmatprep.subr.bf16.mxu0 %v8529_v0  ;;  %v493_v55 = vld [vmem:[%s8638_s27 + $0x948] sm:$0xff] }
 0x19c   : > { %4656 = vmatmul.mubr.bf16.gmra.mrb[20].mxu1 %v6832_v13  ;;  %5812 = vmatmul.mubr.bf16.gmra.mrb[20].mxu0 %v6840_v14  ;;  %v417_v13 = vld [vmem:[%s8638_s27 + $0x6e8] sm:$0xff]  ;;  %v6944_v14 = vcombine.low %v389_v2, %v397_v3 }
 0x19d   : > { %4663 = vmatprep.mubr.bf16.mxu1 %v6849_v15  ;;  %5819 = vmatprep.mubr.bf16.mxu0 %v6857_v16  ;;  %v6952_v15 = vcombine.low %v393_v4, %v401_v5  ;;  %v6961_v16 = vcombine.high %v405_v10, %v413_v11  ;;  %v489_v56 = vld [vmem:[%s8638_s27 + $0x928] sm:$0xff] }
 0x19e   : > { %4893 = vmatpush1.bf16.msra.mxu1 %v8416_v17  ;;  %6049 = vmatpush1.bf16.msra.mxu0 %v8417_v18  ;;  %v6969_v17 = vcombine.high %v409_v12, %v417_v13  ;;  %v8424_v18 = vld [vmem:[%s9899_s1 + $0x170] sm:$0xff]   ;;  %v497_v57 = vld [vmem:[%s8638_s27 + $0x968] sm:$0xff] }
 0x19f   : > { %4894 = vmatprep.subr.bf16.mxu1 %v8529_v0  ;;  %6050 = vmatprep.subr.bf16.mxu0 %v8529_v0  ;;  %v513_v2 = vld [vmem:[%s8638_s27 + $0x9e8] sm:$0xff]  ;;  %v7048_v4 = vcombine.low %v489_v56, %v497_v57 }
 0x1a2   : > { %4895 = vmatpush1.bf16.msra.mxu1 %v8418_v27  ;;  %6051 = vmatpush1.bf16.msra.mxu0 %v8419_v28  ;;  %v437_v28 = vld [vmem:[%s8638_s27 + $0x788] sm:$0xff] }
 0x1a3   : > { %4896 = vmatprep.subr.bf16.mxu1 %v8529_v0  ;;  %6052 = vmatprep.subr.bf16.mxu0 %v8529_v0 }
 0x1a4   : > { %4664 = vmatmul.mubr.bf16.gmra.mrb[24].mxu1 %v6848_v23  ;;  %5820 = vmatmul.mubr.bf16.gmra.mrb[24].mxu0 %v6856_v24  ;;  %v433_v23 = vld [vmem:[%s8638_s27 + $0x768] sm:$0xff]  ;;  %v6960_v24 = vcombine.low %v405_v10, %v413_v11 }
 0x1a5   : > { %4671 = vmatprep.mubr.bf16.mxu1 %v6865_v25  ;;  %5827 = vmatprep.mubr.bf16.mxu0 %v6873_v26  ;;  %v6968_v25 = vcombine.low %v409_v12, %v417_v13  ;;  %v6977_v26 = vcombine.high %v421_v20, %v429_v21  ;;  %v6985_v27 = vcombine.high %v425_v22, %v433_v23  ;;  %v529_v10 = vld [vmem:[%s8638_s27 + $0xa68] sm:$0xff] }
 0x1a6   : > { %4897 = vmatpush1.bf16.msra.mxu1 %v8420_v45  ;;  %6053 = vmatpush1.bf16.msra.mxu0 %v8421_v46  ;;  %v469_v46 = vld [vmem:[%s8638_s27 + $0x888] sm:$0xff] }
 0x1a7   : > { %4898 = vmatprep.subr.bf16.mxu1 %v8529_v0  ;;  %6054 = vmatprep.subr.bf16.mxu0 %v8529_v0  ;;  %v7024_v58 = vcombine.low %v469_v46, %v477_v47 }
 0x1aa   : > { %4899 = vmatpush1.bf16.msra.mxu1 %v8422_v63  ;;  %6055 = vmatpush1.bf16.msra.mxu0 %v8423_v1  ;;  %v509_v63 = vld [vmem:[%s8638_s27 + $0x9c8] sm:$0xff] }
 0x1ab   : > { %4900 = vmatprep.subr.bf16.mxu1 %v8529_v0  ;;  %6056 = vmatprep.subr.bf16.mxu0 %v8529_v0  ;;  %v505_v1 = vld [vmem:[%s8638_s27 + $0x9a8] sm:$0xff] }
 0x1ac   : > { %4672 = vmatmul.mubr.bf16.gmra.mrb[28].mxu1 %v6864_v33  ;;  %5828 = vmatmul.mubr.bf16.gmra.mrb[28].mxu0 %v6872_v34  ;;  %v6984_v33 = vcombine.low %v425_v22, %v433_v23  ;;  %v6993_v34 = vcombine.high %v437_v28, %v445_v29  ;;  %v7064_v12 = vcombine.low %v505_v1, %v513_v2  ;;  %v549_v23 = vld [vmem:[%s8638_s27 + $0xb08] sm:$0xff] }
 0x1ad   : > { %4679 = vmatprep.mubr.bf16.mxu1 %v6881_v35  ;;  %5835 = vmatprep.mubr.bf16.mxu0 %v6889_v36  ;;  %v7001_v35 = vcombine.high %v441_v30, %v449_v31  ;;  %v8426_v36 = vld [vmem:[%s9899_s1 + $0x178] sm:$0xff]  }
 0x1ae   : > { %4901 = vmatpush1.bf16.msra.mxu1 %v8424_v18  ;;  %6057 = vmatpush1.bf16.msra.mxu0 %v8425_v19  ;;  %v545_v18 = vld [vmem:[%s8638_s27 + $0xae8] sm:$0xff] }
 0x1af   : > { %4902 = vmatprep.subr.bf16.mxu1 %v8529_v0  ;;  %6058 = vmatprep.subr.bf16.mxu0 %v8529_v0 }
 0x1b2   : > { %4903 = vmatpush1.bf16.msra.mxu1 %v8426_v36  ;;  %6059 = vmatpush1.bf16.msra.mxu0 %v8427_v37 }
 0x1b3   : > { %5161 = vmatprep.subr.bf16.mxu1 %v8529_v0  ;;  %6317 = vmatprep.subr.bf16.mxu0 %v8529_v0 }
 0x1b4   : > { %4680 = vmatmul.mubr.bf16.gmra.mrb[32].mxu1 %v6880_v41  ;;  %5836 = vmatmul.mubr.bf16.gmra.mrb[32].mxu0 %v6888_v42  ;;  %v465_v41 = vld [vmem:[%s8638_s27 + $0x868] sm:$0xff]  ;;  %v6992_v42 = vcombine.low %v437_v28, %v445_v29 }
 0x1b5   : > { %4687 = vmatprep.mubr.bf16.mxu1 %v6897_v43  ;;  %5843 = vmatprep.mubr.bf16.mxu0 %v6905_v44  ;;  %v7000_v43 = vcombine.low %v441_v30, %v449_v31  ;;  %v7009_v44 = vcombine.high %v453_v38, %v461_v39  ;;  %v7017_v45 = vcombine.high %v457_v40, %v465_v41  ;;  %v565_v31 = vld [vmem:[%s8638_s27 + $0xb88] sm:$0xff] }
 0x1b6   : > { %v581_v39 = vld [vmem:[%s8638_s27 + $0xc08] sm:$0xff] }
 0x1bc   : > { %4688 = vmatmul.mubr.bf16.gmra.mrb[36].mxu1 %v6896_v51  ;;  %5844 = vmatmul.mubr.bf16.gmra.mrb[36].mxu0 %v6904_v52  ;;  %v7016_v51 = vcombine.low %v457_v40, %v465_v41  ;;  %v7025_v52 = vcombine.high %v469_v46, %v477_v47  ;;  %v589_v40 = vld [vmem:[%s8638_s27 + $0xc48] sm:$0xff] }
 0x1bd   : > { %4695 = vmatprep.mubr.bf16.mxu1 %v6913_v53  ;;  %5851 = vmatprep.mubr.bf16.mxu0 %v6921_v54  ;;  %v7033_v53 = vcombine.high %v473_v48, %v481_v49  ;;  %v485_v54 = vld [vmem:[%s8638_s27 + $0x908] sm:$0xff] }
 0x1be   : > { %v7040_v3 = vcombine.low %v485_v54, %v493_v55  ;;  %v585_v41 = vld [vmem:[%s8638_s27 + $0xc28] sm:$0xff] }
 0x1bf   : > { %v597_v47 = vld [vmem:[%s8638_s27 + $0xc88] sm:$0xff] }
 0x1c4   : > { %4696 = vmatmul.mubr.bf16.gmra.mrb[40].mxu1 %v6912_v59  ;;  %5852 = vmatmul.mubr.bf16.gmra.mrb[40].mxu0 %v6920_v60  ;;  %v7032_v59 = vcombine.low %v473_v48, %v481_v49  ;;  %v7041_v60 = vcombine.high %v485_v54, %v493_v55  ;;  %v605_v48 = vld [vmem:[%s8638_s27 + $0xcc8] sm:$0xff] }
 0x1c5   : > { %4703 = vmatprep.mubr.bf16.mxu1 %v6929_v61  ;;  %5859 = vmatprep.mubr.bf16.mxu0 %v6937_v62  ;;  %v7049_v61 = vcombine.high %v489_v56, %v497_v57  ;;  %v501_v62 = vld [vmem:[%s8638_s27 + $0x988] sm:$0xff] }
 0x1c6   : > { %v7057_v5 = vcombine.high %v501_v62, %v509_v63  ;;  %v7056_v11 = vcombine.low %v501_v62, %v509_v63  ;;  %v601_v49 = vld [vmem:[%s8638_s27 + $0xca8] sm:$0xff] }
 0x1c7   : > { %v613_v55 = vld [vmem:[%s8638_s27 + $0xd08] sm:$0xff] }
 0x1c8   : > { %v621_v56 = vld [vmem:[%s8638_s27 + $0xd48] sm:$0xff] }
 0x1c9   : > { %v617_v57 = vld [vmem:[%s8638_s27 + $0xd28] sm:$0xff] }
 0x1ca   : > { %v629_v63 = vld [vmem:[%s8638_s27 + $0xd88] sm:$0xff] }
 0x1cc   : > { %4704 = vmatmul.mubr.bf16.gmra.mrb[44].mxu1 %v6928_v6  ;;  %5860 = vmatmul.mubr.bf16.gmra.mrb[44].mxu0 %v6936_v7  ;;  %v7065_v6 = vcombine.high %v505_v1, %v513_v2  ;;  %v517_v7 = vld [vmem:[%s8638_s27 + $0xa08] sm:$0xff] }
 0x1cd   : > { %4711 = vmatprep.mubr.bf16.mxu1 %v6945_v8  ;;  %5867 = vmatprep.mubr.bf16.mxu0 %v6953_v9  ;;  %v525_v8 = vld [vmem:[%s8638_s27 + $0xa48] sm:$0xff] }
 0x1ce   : > { %v521_v9 = vld [vmem:[%s8638_s27 + $0xa28] sm:$0xff]  ;;  %v7073_v13 = vcombine.high %v517_v7, %v525_v8  ;;  %v7072_v19 = vcombine.low %v517_v7, %v525_v8 }
 0x1cf   : > { %v7080_v20 = vcombine.low %v521_v9, %v529_v10  ;;  %v637_v1 = vld [vmem:[%s8638_s27 + $0xdc8] sm:$0xff] }
 0x1d0   : > { %v633_v2 = vld [vmem:[%s8638_s27 + $0xda8] sm:$0xff] }
 0x1d1   : > { %v645_v8 = vld [vmem:[%s8638_s27 + $0xe08] sm:$0xff] }
 0x1d4   : > { %4712 = vmatmul.mubr.bf16.gmra.mrb[48].mxu1 %v6944_v14  ;;  %5868 = vmatmul.mubr.bf16.gmra.mrb[48].mxu0 %v6952_v15  ;;  %v7081_v14 = vcombine.high %v521_v9, %v529_v10  ;;  %v533_v15 = vld [vmem:[%s8638_s27 + $0xa88] sm:$0xff] }
 0x1d5   : > { %4719 = vmatprep.mubr.bf16.mxu1 %v6961_v16  ;;  %5875 = vmatprep.mubr.bf16.mxu0 %v6969_v17  ;;  %v541_v16 = vld [vmem:[%s8638_s27 + $0xac8] sm:$0xff] }
 0x1d6   : > { %v537_v17 = vld [vmem:[%s8638_s27 + $0xaa8] sm:$0xff]  ;;  %v7089_v21 = vcombine.high %v533_v15, %v541_v16 }
 0x1d7   : > { %v7097_v22 = vcombine.high %v537_v17, %v545_v18  ;;  %v7096_v28 = vcombine.low %v537_v17, %v545_v18  ;;  %v653_v9 = vld [vmem:[%s8638_s27 + $0xe48] sm:$0xff] }
 0x1d8   : > { %v649_v10 = vld [vmem:[%s8638_s27 + $0xe28] sm:$0xff] }
 0x1d9   : > { %v669_v17 = vld [vmem:[%s8638_s27 + $0xec8] sm:$0xff] }
 0x1da   : > { %v665_v18 = vld [vmem:[%s8638_s27 + $0xea8] sm:$0xff] }
 0x1dc   : > { %4720 = vmatmul.mubr.bf16.gmra.mrb[52].mxu1 %v6960_v24  ;;  %5876 = vmatmul.mubr.bf16.gmra.mrb[52].mxu0 %v6968_v25  ;;  %v557_v24 = vld [vmem:[%s8638_s27 + $0xb48] sm:$0xff] }
 0x1dd   : > { %4727 = vmatprep.mubr.bf16.mxu1 %v6977_v26  ;;  %5883 = vmatprep.mubr.bf16.mxu0 %v6985_v27  ;;  %v553_v25 = vld [vmem:[%s8638_s27 + $0xb28] sm:$0xff]  ;;  %v7088_v27 = vcombine.low %v533_v15, %v541_v16  ;;  %v7105_v29 = vcombine.high %v549_v23, %v557_v24 }
 0x1de   : > { %v561_v26 = vld [vmem:[%s8638_s27 + $0xb68] sm:$0xff] }
 0x1df   : > { %v7113_v30 = vcombine.high %v553_v25, %v561_v26  ;;  %v7112_v36 = vcombine.low %v553_v25, %v561_v26  ;;  %v661_v16 = vld [vmem:[%s8638_s27 + $0xe88] sm:$0xff] }
 0x1e0   : > { %v685_v25 = vld [vmem:[%s8638_s27 + $0xf48] sm:$0xff] }
 0x1e1   : > { %v681_v26 = vld [vmem:[%s8638_s27 + $0xf28] sm:$0xff] }
 0x1e4   : > { %4728 = vmatmul.mubr.bf16.gmra.mrb[56].mxu1 %v6976_v32  ;;  %5884 = vmatmul.mubr.bf16.gmra.mrb[56].mxu0 %v6984_v33  ;;  %v573_v32 = vld [vmem:[%s8638_s27 + $0xbc8] sm:$0xff] }
 0x1e5   : > { %4735 = vmatprep.mubr.bf16.mxu1 %v6993_v34  ;;  %5891 = vmatprep.mubr.bf16.mxu0 %v7001_v35  ;;  %v569_v33 = vld [vmem:[%s8638_s27 + $0xba8] sm:$0xff]  ;;  %v7104_v35 = vcombine.low %v549_v23, %v557_v24  ;;  %v7121_v37 = vcombine.high %v565_v31, %v573_v32 }
 0x1e6   : > { %v577_v34 = vld [vmem:[%s8638_s27 + $0xbe8] sm:$0xff] }
 0x1e7   : > { %v7129_v38 = vcombine.high %v569_v33, %v577_v34  ;;  %v677_v24 = vld [vmem:[%s8638_s27 + $0xf08] sm:$0xff] }
 0x1ec   : > { %4736 = vmatmul.mubr.bf16.gmra.mrb[60].mxu1 %v6992_v42  ;;  %5892 = vmatmul.mubr.bf16.gmra.mrb[60].mxu0 %v7000_v43  ;;  %v593_v42 = vld [vmem:[%s8638_s27 + $0xc68] sm:$0xff]  ;;  %v7120_v43 = vcombine.low %v565_v31, %v573_v32 }
 0x1ed   : > { %4743 = vmatprep.mubr.bf16.mxu1 %v7009_v44  ;;  %5899 = vmatprep.mubr.bf16.mxu0 %v7017_v45  ;;  %v7128_v44 = vcombine.low %v569_v33, %v577_v34  ;;  %v7137_v45 = vcombine.high %v581_v39, %v589_v40  ;;  %v7145_v46 = vcombine.high %v585_v41, %v593_v42  ;;  %v693_v32 = vld [vmem:[%s8638_s27 + $0xf88] sm:$0xff] }
 0x1ee   : > { %v701_v33 = vld [vmem:[%s8638_s27 + $0xfc8] sm:$0xff] }
 0x1ef   : > { %v697_v34 = vld [vmem:[%s8638_s27 + $0xfa8] sm:$0xff] }
 0x1f4   : > { %4744 = vmatmul.mubr.bf16.gmra.mrb[64].mxu1 %v7008_v50  ;;  %5900 = vmatmul.mubr.bf16.gmra.mrb[64].mxu0 %v7016_v51  ;;  %v609_v50 = vld [vmem:[%s8638_s27 + $0xce8] sm:$0xff]  ;;  %v7136_v51 = vcombine.low %v581_v39, %v589_v40  ;;  %v198_v40 = vld [vmem:[%s8638_s27 + $0x10] sm:$0xff] }
 0x1f5   : > { %4751 = vmatprep.mubr.bf16.mxu1 %v7025_v52  ;;  %5907 = vmatprep.mubr.bf16.mxu0 %v7033_v53  ;;  %v7144_v52 = vcombine.low %v585_v41, %v593_v42  ;;  %v7153_v53 = vcombine.high %v597_v47, %v605_v48  ;;  %v7161_v54 = vcombine.high %v601_v49, %v609_v50  ;;  %v206_v41 = vld [vmem:[%s8638_s27 + $0x50] sm:$0xff] }
 0x1f6   : > { %v202_v42 = vld [vmem:[%s8638_s27 + $0x30] sm:$0xff] }
 0x1fc   : > { %4752 = vmatmul.mubr.bf16.gmra.mrb[68].mxu1 %v7024_v58  ;;  %5908 = vmatmul.mubr.bf16.gmra.mrb[68].mxu0 %v7032_v59  ;;  %v625_v58 = vld [vmem:[%s8638_s27 + $0xd68] sm:$0xff]  ;;  %v7152_v59 = vcombine.low %v597_v47, %v605_v48  ;;  %v214_v48 = vld [vmem:[%s8638_s27 + $0x90] sm:$0xff] }
 0x1fd   : > { %4759 = vmatprep.mubr.bf16.mxu1 %v7041_v60  ;;  %5915 = vmatprep.mubr.bf16.mxu0 %v7049_v61  ;;  %v7160_v60 = vcombine.low %v601_v49, %v609_v50  ;;  %v7169_v61 = vcombine.high %v613_v55, %v621_v56  ;;  %v7177_v62 = vcombine.high %v617_v57, %v625_v58  ;;  %v222_v49 = vld [vmem:[%s8638_s27 + $0xd0] sm:$0xff] }
 0x1fe   : > { %v6754_v50 = vcombine.low %v198_v40, %v206_v41 }
 0x204   : > { %4760 = vmatmul.mubr.bf16.gmra.mrb[72].mxu1 %v7040_v3  ;;  %5916 = vmatmul.mubr.bf16.gmra.mrb[72].mxu0 %v7048_v4  ;;  %v641_v3 = vld [vmem:[%s8638_s27 + $0xde8] sm:$0xff]  ;;  %v7168_v4 = vcombine.low %v613_v55, %v621_v56  ;;  %v8429_v55 = vld [vmem:[%s9899_s1 + $0x380] sm:$0xff]   ;;  %v6771_v56 = vcombine.high %v214_v48, %v222_v49 }
 0x205   : > { %4767 = vmatprep.mubr.bf16.mxu1 %v7057_v5  ;;  %5923 = vmatprep.mubr.bf16.mxu0 %v7065_v6  ;;  %v7176_v5 = vcombine.low %v617_v57, %v625_v58  ;;  %v7185_v6 = vcombine.high %v629_v63, %v637_v1  ;;  %v7193_v7 = vcombine.high %v633_v2, %v641_v3  ;;  %v8430_v58 = vld [vmem:[%s9899_s1 + $0x188] sm:$0xff]  }
 0x20c   : > { %4768 = vmatmul.mubr.bf16.gmra.mrb[76].mxu1 %v7056_v11  ;;  %5924 = vmatmul.mubr.bf16.gmra.mrb[76].mxu0 %v7064_v12  ;;  %v657_v11 = vld [vmem:[%s8638_s27 + $0xe68] sm:$0xff]  ;;  %v7184_v12 = vcombine.low %v629_v63, %v637_v1  ;;  %v242_v63 = vld [vmem:[%s8638_s27 + $0x170] sm:$0xff]  ;;  %v6770_v1 = vcombine.low %v214_v48, %v222_v49 }
 0x20d   : > { %4775 = vmatprep.mubr.bf16.mxu1 %v7073_v13  ;;  %5931 = vmatprep.mubr.bf16.mxu0 %v7081_v14  ;;  %v7192_v13 = vcombine.low %v633_v2, %v641_v3  ;;  %v7201_v14 = vcombine.high %v645_v8, %v653_v9  ;;  %v7209_v15 = vcombine.high %v649_v10, %v657_v11  ;;  %v8447_v48 = vld [vmem:[%s9899_s1 + $0x3c8] sm:$0xff]  }
 0x214   : > { %4776 = vmatmul.mubr.bf16.gmra.mrb[80].mxu1 %v7072_v19  ;;  %5932 = vmatmul.mubr.bf16.gmra.mrb[80].mxu0 %v7080_v20  ;;  %v673_v19 = vld [vmem:[%s8638_s27 + $0xee8] sm:$0xff]  ;;  %v7200_v20 = vcombine.low %v645_v8, %v653_v9  ;;  %v254_v8 = vld [vmem:[%s8638_s27 + $0x1d0] sm:$0xff]  ;;  %v8434_v9 = vld [vmem:[%s9899_s1 + $0x198] sm:$0xff]  }
 0x215   : > { %4783 = vmatprep.mubr.bf16.mxu1 %v7089_v21  ;;  %5939 = vmatprep.mubr.bf16.mxu0 %v7097_v22  ;;  %v7208_v21 = vcombine.low %v649_v10, %v657_v11  ;;  %v7217_v22 = vcombine.high %v661_v16, %v669_v17  ;;  %v7225_v23 = vcombine.high %v665_v18, %v673_v19  ;;  %v250_v10 = vld [vmem:[%s8638_s27 + $0x1b0] sm:$0xff] }
 0x216   : > { %v258_v11 = vld [vmem:[%s8638_s27 + $0x1f0] sm:$0xff] }
 0x21c   : > { %4784 = vmatmul.mubr.bf16.gmra.mrb[84].mxu1 %v7088_v27  ;;  %5940 = vmatmul.mubr.bf16.gmra.mrb[84].mxu0 %v7096_v28  ;;  %v689_v27 = vld [vmem:[%s8638_s27 + $0xf68] sm:$0xff]  ;;  %v7216_v28 = vcombine.low %v661_v16, %v669_v17  ;;  %v6811_v16 = vcombine.high %v250_v10, %v258_v11  ;;  %v8436_v17 = vld [vmem:[%s9899_s1 + $0x1a0] sm:$0xff]  }
 0x21d   : > { %4791 = vmatprep.mubr.bf16.mxu1 %v7105_v29  ;;  %5947 = vmatprep.mubr.bf16.mxu0 %v7113_v30  ;;  %v7224_v29 = vcombine.low %v665_v18, %v673_v19  ;;  %v7233_v30 = vcombine.high %v677_v24, %v685_v25  ;;  %v7241_v31 = vcombine.high %v681_v26, %v689_v27  ;;  %v8437_v18 = vld [vmem:[%s9899_s1 + $0x3a0] sm:$0xff]   ;;  %v262_v19 = vld [vmem:[%s8638_s27 + $0x210] sm:$0xff] }
 0x224   : > { %4792 = vmatmul.mubr.bf16.gmra.mrb[88].mxu1 %v7104_v35  ;;  %5948 = vmatmul.mubr.bf16.gmra.mrb[88].mxu0 %v7112_v36  ;;  %v705_v35 = vld [vmem:[%s8638_s27 + $0xfe8] sm:$0xff]  ;;  %v7232_v36 = vcombine.low %v677_v24, %v685_v25 }
 0x225   : > { %4799 = vmatprep.mubr.bf16.mxu1 %v7121_v37  ;;  %5955 = vmatprep.mubr.bf16.mxu0 %v7129_v38  ;;  %v7240_v37 = vcombine.low %v681_v26, %v689_v27  ;;  %v7249_v38 = vcombine.high %v693_v32, %v701_v33  ;;  %v7257_v39 = vcombine.high %v697_v34, %v705_v35  ;;  %v8439_v24 = vld [vmem:[%s9899_s1 + $0x3a8] sm:$0xff]  }
 0x226   : > { %v6810_v26 = vcombine.low %v250_v10, %v258_v11  ;;  %v342_v10 = vld [vmem:[%s8638_s27 + $0x490] sm:$0xff] }
 0x227   : > { %v350_v11 = vld [vmem:[%s8638_s27 + $0x4d0] sm:$0xff] }
 0x22c   : > { %4800 = vmatmul.mubr.bf16.gmra.mrb[92].mxu1 %v7120_v43  ;;  %5956 = vmatmul.mubr.bf16.gmra.mrb[92].mxu0 %v7128_v44  ;;  %v210_v43 = vld [vmem:[%s8638_s27 + $0x70] sm:$0xff]  ;;  %v7248_v44 = vcombine.low %v693_v32, %v701_v33  ;;  %v8442_v33 = vld [vmem:[%s9899_s1 + $0x1b8] sm:$0xff]  }
 0x22d   : > { %4807 = vmatprep.mubr.bf16.mxu1 %v7137_v45  ;;  %5963 = vmatprep.mubr.bf16.mxu0 %v7145_v46  ;;  %v7256_v45 = vcombine.low %v697_v34, %v705_v35  ;;  %v6755_v46 = vcombine.high %v198_v40, %v206_v41  ;;  %v6763_v47 = vcombine.high %v202_v42, %v210_v43  ;;  %v286_v32 = vld [vmem:[%s8638_s27 + $0x2d0] sm:$0xff]  ;;  %v8444_v41 = vld [vmem:[%s9899_s1 + $0x1c0] sm:$0xff]  }
 0x22e   : > { %v282_v34 = vld [vmem:[%s8638_s27 + $0x2b0] sm:$0xff] }
 0x22f   : > { %v290_v35 = vld [vmem:[%s8638_s27 + $0x2f0] sm:$0xff] }
 0x230   : > { %v6843_v40 = vcombine.high %v282_v34, %v290_v35 }
 0x234   : > { %4808 = vmatmul.mubr.bf16.gmra.mrb[96].mxu1 %v7136_v51  ;;  %5964 = vmatmul.mubr.bf16.gmra.mrb[96].mxu0 %v7144_v52  ;;  %v218_v51 = vld [vmem:[%s8638_s27 + $0xb0] sm:$0xff] }
 0x235   : > { %4815 = vmatprep.mubr.bf16.mxu1 %v7153_v53  ;;  %5971 = vmatprep.mubr.bf16.mxu0 %v7161_v54  ;;  %v226_v52 = vld [vmem:[%s8638_s27 + $0xf0] sm:$0xff]  ;;  %v6762_v53 = vcombine.low %v202_v42, %v210_v43  ;;  %v8428_v54 = vld [vmem:[%s9899_s1 + $0x180] sm:$0xff]  }
 0x236   : > { %v6779_v57 = vcombine.high %v218_v51, %v226_v52  ;;  %v6778_v2 = vcombine.low %v218_v51, %v226_v52  ;;  %v8445_v42 = vld [vmem:[%s9899_s1 + $0x3c0] sm:$0xff]   ;;  %v294_v43 = vld [vmem:[%s8638_s27 + $0x310] sm:$0xff] }
 0x23c   : > { %4816 = vmatmul.mubr.bf16.gmra.mrb[100].mxu1 %v7152_v59  ;;  %5972 = vmatmul.mubr.bf16.gmra.mrb[100].mxu0 %v7160_v60  ;;  %v230_v59 = vld [vmem:[%s8638_s27 + $0x110] sm:$0xff] }
 0x23d   : > { %4823 = vmatprep.mubr.bf16.mxu1 %v7169_v61  ;;  %5979 = vmatprep.mubr.bf16.mxu0 %v7177_v62  ;;  %v238_v60 = vld [vmem:[%s8638_s27 + $0x150] sm:$0xff]  ;;  %v8431_v61 = vld [vmem:[%s9899_s1 + $0x388] sm:$0xff]  }
 0x23e   : > { %v234_v62 = vld [vmem:[%s8638_s27 + $0x130] sm:$0xff]  ;;  %v6787_v3 = vcombine.high %v230_v59, %v238_v60 }
 0x244   : > { %4824 = vmatmul.mubr.bf16.gmra.mrb[104].mxu1 %v7168_v4  ;;  %5980 = vmatmul.mubr.bf16.gmra.mrb[104].mxu0 %v7176_v5  ;;  %v6795_v4 = vcombine.high %v234_v62, %v242_v63  ;;  %v8432_v5 = vld [vmem:[%s9899_s1 + $0x190] sm:$0xff]  }
 0x245   : > { %4831 = vmatprep.mubr.bf16.mxu1 %v7185_v6  ;;  %5987 = vmatprep.mubr.bf16.mxu0 %v7193_v7  ;;  %v8433_v6 = vld [vmem:[%s9899_s1 + $0x390] sm:$0xff]  }
 0x246   : > { %v246_v7 = vld [vmem:[%s8638_s27 + $0x190] sm:$0xff] }
 0x247   : > { %v6802_v25 = vcombine.low %v246_v7, %v254_v8 }
 0x24c   : > { %4832 = vmatmul.mubr.bf16.gmra.mrb[108].mxu1 %v7184_v12  ;;  %5988 = vmatmul.mubr.bf16.gmra.mrb[108].mxu0 %v7192_v13  ;;  %v8435_v12 = vld [vmem:[%s9899_s1 + $0x398] sm:$0xff]   ;;  %v6786_v13 = vcombine.low %v230_v59, %v238_v60 }
 0x24d   : > { %4839 = vmatprep.mubr.bf16.mxu1 %v7201_v14  ;;  %5995 = vmatprep.mubr.bf16.mxu0 %v7209_v15  ;;  %v6794_v14 = vcombine.low %v234_v62, %v242_v63  ;;  %v6803_v15 = vcombine.high %v246_v7, %v254_v8  ;;  %v8450_v63 = vld [vmem:[%s9899_s1 + $0x1d8] sm:$0xff]  }
 0x254   : > { %4840 = vmatmul.mubr.bf16.gmra.mrb[112].mxu1 %v7200_v20  ;;  %5996 = vmatmul.mubr.bf16.gmra.mrb[112].mxu0 %v7208_v21  ;;  %v270_v20 = vld [vmem:[%s8638_s27 + $0x250] sm:$0xff]  ;;  %v8438_v21 = vld [vmem:[%s9899_s1 + $0x1a8] sm:$0xff]  }
 0x255   : > { %4847 = vmatprep.mubr.bf16.mxu1 %v7217_v22  ;;  %6003 = vmatprep.mubr.bf16.mxu0 %v7225_v23  ;;  %v266_v22 = vld [vmem:[%s8638_s27 + $0x230] sm:$0xff]  ;;  %v6819_v27 = vcombine.high %v262_v19, %v270_v20 }
 0x256   : > { %v274_v23 = vld [vmem:[%s8638_s27 + $0x270] sm:$0xff] }
 0x25c   : > { %4848 = vmatmul.mubr.bf16.gmra.mrb[116].mxu1 %v7216_v28  ;;  %6004 = vmatmul.mubr.bf16.gmra.mrb[116].mxu0 %v7224_v29  ;;  %v6827_v28 = vcombine.high %v266_v22, %v274_v23  ;;  %v8440_v29 = vld [vmem:[%s9899_s1 + $0x1b0] sm:$0xff]  }
 0x25d   : > { %4855 = vmatprep.mubr.bf16.mxu1 %v7233_v30  ;;  %6011 = vmatprep.mubr.bf16.mxu0 %v7241_v31  ;;  %v8441_v30 = vld [vmem:[%s9899_s1 + $0x3b0] sm:$0xff]  }
 0x25e   : > { %v278_v31 = vld [vmem:[%s8638_s27 + $0x290] sm:$0xff] }
 0x25f   : > { %v6834_v49 = vcombine.low %v278_v31, %v286_v32 }
 0x264   : > { %4856 = vmatmul.mubr.bf16.gmra.mrb[120].mxu1 %v7232_v36  ;;  %6012 = vmatmul.mubr.bf16.gmra.mrb[120].mxu0 %v7240_v37  ;;  %v8443_v36 = vld [vmem:[%s9899_s1 + $0x3b8] sm:$0xff]   ;;  %v6818_v37 = vcombine.low %v262_v19, %v270_v20  ;;  %v8453_v19 = vld [vmem:[%s9899_s1 + $0x3e0] sm:$0xff]   ;;  %v358_v20 = vld [vmem:[%s8638_s27 + $0x510] sm:$0xff] }
 0x265   : > { %4863 = vmatprep.mubr.bf16.mxu1 %v7249_v38  ;;  %6019 = vmatprep.mubr.bf16.mxu0 %v7257_v39  ;;  %v6826_v38 = vcombine.low %v266_v22, %v274_v23  ;;  %v6835_v39 = vcombine.high %v278_v31, %v286_v32  ;;  %v362_v22 = vld [vmem:[%s8638_s27 + $0x530] sm:$0xff] }
 0x266   : > { %v370_v23 = vld [vmem:[%s8638_s27 + $0x570] sm:$0xff] }
 0x267   : > { %v386_v31 = vld [vmem:[%s8638_s27 + $0x5f0] sm:$0xff] }
 0x26c   : > { %4864 = vmatmul.mubr.bf16.gmra.mrb[124].mxu1 %v7248_v44  ;;  %6020 = vmatmul.mubr.bf16.gmra.mrb[124].mxu0 %v7256_v45  ;;  %v302_v44 = vld [vmem:[%s8638_s27 + $0x350] sm:$0xff]  ;;  %v8446_v45 = vld [vmem:[%s9899_s1 + $0x1c8] sm:$0xff]  }
 0x26d   : > { %4904 = vmatprep.mubr.bf16.mxu1 %v6755_v46  ;;  %6060 = vmatprep.mubr.bf16.mxu0 %v6763_v47  ;;  %v298_v46 = vld [vmem:[%s8638_s27 + $0x330] sm:$0xff]  ;;  %v6851_v51 = vcombine.high %v294_v43, %v302_v44  ;;  %v6850_v59 = vcombine.low %v294_v43, %v302_v44 }
 0x26e   : > { %v306_v47 = vld [vmem:[%s8638_s27 + $0x370] sm:$0xff] }
 0x26f   : > { %v6859_v52 = vcombine.high %v298_v46, %v306_v47  ;;  %v6858_v60 = vcombine.low %v298_v46, %v306_v47  ;;  %v406_v46 = vld [vmem:[%s8638_s27 + $0x690] sm:$0xff] }
 0x270   : > { %v414_v47 = vld [vmem:[%s8638_s27 + $0x6d0] sm:$0xff] }
 0x274   : > { %4905 = vmatmul.mubr.bf16.vlgmr.msra.gmra.mrb[0].mxu1 %v6754_v50  ;;  %6061 = vmatmul.mubr.bf16.vlgmr.msra.gmra.mrb[0].mxu0 %v6762_v53  ;;  %v6842_v50 = vcombine.low %v282_v34, %v290_v35  ;;  %v8448_v53 = vld [vmem:[%s9899_s1 + $0x1d0] sm:$0xff]  }
 0x275   : > { %5162 = vmatpush1.bf16.msra.mxu1 %v8428_v54  ;;  %6318 = vmatpush1.bf16.msra.mxu0 %v8429_v55  ;;  %v8449_v54 = vld [vmem:[%s9899_s1 + $0x3d0] sm:$0xff]  }
 0x276   : > { %4912 = vmatprep.mubr.bf16.mxu1 %v6771_v56  ;;  %6068 = vmatprep.mubr.bf16.mxu0 %v6779_v57  ;;  %v310_v55 = vld [vmem:[%s8638_s27 + $0x390] sm:$0xff] }
 0x277   : > { %5163 = vmatprep.subr.bf16.mxu1 %v8529_v0  ;;  %6319 = vmatprep.subr.bf16.mxu0 %v8529_v0  ;;  %v318_v56 = vld [vmem:[%s8638_s27 + $0x3d0] sm:$0xff] }
 0x278   : > { %v314_v57 = vld [vmem:[%s8638_s27 + $0x3b0] sm:$0xff] }
 0x279   : > { %5164 = vmatpush1.bf16.msra.mxu1 %v8430_v58  ;;  %6320 = vmatpush1.bf16.msra.mxu0 %v8431_v61  ;;  %v322_v58 = vld [vmem:[%s8638_s27 + $0x3f0] sm:$0xff]  ;;  %v6867_v61 = vcombine.high %v310_v55, %v318_v56 }
 0x27a   : > { %5165 = vmatprep.subr.bf16.mxu1 %v8529_v0  ;;  %6321 = vmatprep.subr.bf16.mxu0 %v8529_v0  ;;  %v6875_v62 = vcombine.high %v314_v57, %v322_v58  ;;  %v6874_v7 = vcombine.low %v314_v57, %v322_v58  ;;  %v430_v57 = vld [vmem:[%s8638_s27 + $0x750] sm:$0xff] }
 0x27b   : > { %v426_v58 = vld [vmem:[%s8638_s27 + $0x730] sm:$0xff] }
 0x27c   : > { %4913 = vmatmul.mubr.bf16.gmra.mrb[4].mxu1 %v6770_v1  ;;  %6069 = vmatmul.mubr.bf16.gmra.mrb[4].mxu0 %v6778_v2  ;;  %v8451_v1 = vld [vmem:[%s9899_s1 + $0x3d8] sm:$0xff]   ;;  %v326_v2 = vld [vmem:[%s8638_s27 + $0x410] sm:$0xff] }
 0x27d   : > { %4920 = vmatprep.mubr.bf16.mxu1 %v6787_v3  ;;  %6076 = vmatprep.mubr.bf16.mxu0 %v6795_v4  ;;  %v334_v3 = vld [vmem:[%s8638_s27 + $0x450] sm:$0xff] }
 0x27e   : > { %5166 = vmatpush1.bf16.msra.mxu1 %v8432_v5  ;;  %6322 = vmatpush1.bf16.msra.mxu0 %v8433_v6  ;;  %v330_v4 = vld [vmem:[%s8638_s27 + $0x430] sm:$0xff]  ;;  %v6866_v6 = vcombine.low %v310_v55, %v318_v56  ;;  %v6883_v8 = vcombine.high %v326_v2, %v334_v3 }
 0x27f   : > { %5167 = vmatprep.subr.bf16.mxu1 %v8529_v0  ;;  %6323 = vmatprep.subr.bf16.mxu0 %v8529_v0  ;;  %v338_v5 = vld [vmem:[%s8638_s27 + $0x470] sm:$0xff] }
 0x280   : > { %v8457_v55 = vld [vmem:[%s9899_s1 + $0x3f0] sm:$0xff]  }
 0x281   : > { %v422_v56 = vld [vmem:[%s8638_s27 + $0x710] sm:$0xff] }
 0x282   : > { %5168 = vmatpush1.bf16.msra.mxu1 %v8434_v9  ;;  %6324 = vmatpush1.bf16.msra.mxu0 %v8435_v12  ;;  %v6891_v9 = vcombine.high %v330_v4, %v338_v5  ;;  %v346_v12 = vld [vmem:[%s8638_s27 + $0x4b0] sm:$0xff] }
 0x283   : > { %5169 = vmatprep.subr.bf16.mxu1 %v8529_v0  ;;  %6325 = vmatprep.subr.bf16.mxu0 %v8529_v0 }
 0x284   : > { %4921 = vmatmul.mubr.bf16.gmra.mrb[8].mxu1 %v6786_v13  ;;  %6077 = vmatmul.mubr.bf16.gmra.mrb[8].mxu0 %v6794_v14  ;;  %v354_v13 = vld [vmem:[%s8638_s27 + $0x4f0] sm:$0xff]  ;;  %v6882_v14 = vcombine.low %v326_v2, %v334_v3 }
 0x285   : > { %4928 = vmatprep.mubr.bf16.mxu1 %v6803_v15  ;;  %6084 = vmatprep.mubr.bf16.mxu0 %v6811_v16  ;;  %v6890_v15 = vcombine.low %v330_v4, %v338_v5  ;;  %v6899_v16 = vcombine.high %v342_v10, %v350_v11  ;;  %v446_v2 = vld [vmem:[%s8638_s27 + $0x7d0] sm:$0xff]  ;;  %v6978_v5 = vcombine.low %v422_v56, %v430_v57 }
 0x286   : > { %5170 = vmatpush1.bf16.msra.mxu1 %v8436_v17  ;;  %6326 = vmatpush1.bf16.msra.mxu0 %v8437_v18  ;;  %v6907_v17 = vcombine.high %v346_v12, %v354_v13  ;;  %v8452_v18 = vld [vmem:[%s9899_s1 + $0x1e0] sm:$0xff]   ;;  %v442_v3 = vld [vmem:[%s8638_s27 + $0x7b0] sm:$0xff] }
 0x287   : > { %5171 = vmatprep.subr.bf16.mxu1 %v8529_v0  ;;  %6327 = vmatprep.subr.bf16.mxu0 %v8529_v0  ;;  %v450_v4 = vld [vmem:[%s8638_s27 + $0x7f0] sm:$0xff] }
 0x28a   : > { %5172 = vmatpush1.bf16.msra.mxu1 %v8438_v21  ;;  %6328 = vmatpush1.bf16.msra.mxu0 %v8439_v24  ;;  %v366_v21 = vld [vmem:[%s8638_s27 + $0x550] sm:$0xff]  ;;  %v6898_v24 = vcombine.low %v342_v10, %v350_v11 }
 0x28b   : > { %5173 = vmatprep.subr.bf16.mxu1 %v8529_v0  ;;  %6329 = vmatprep.subr.bf16.mxu0 %v8529_v0  ;;  %v6914_v32 = vcombine.low %v358_v20, %v366_v21  ;;  %v454_v10 = vld [vmem:[%s8638_s27 + $0x810] sm:$0xff] }
 0x28c   : > { %4929 = vmatmul.mubr.bf16.gmra.mrb[12].mxu1 %v6802_v25  ;;  %6085 = vmatmul.mubr.bf16.gmra.mrb[12].mxu0 %v6810_v26  ;;  %v6906_v25 = vcombine.low %v346_v12, %v354_v13  ;;  %v6915_v26 = vcombine.high %v358_v20, %v366_v21  ;;  %v462_v11 = vld [vmem:[%s8638_s27 + $0x850] sm:$0xff] }
 0x28d   : > { %4936 = vmatprep.mubr.bf16.mxu1 %v6819_v27  ;;  %6092 = vmatprep.mubr.bf16.mxu0 %v6827_v28  ;;  %v6923_v27 = vcombine.high %v362_v22, %v370_v23  ;;  %v374_v28 = vld [vmem:[%s8638_s27 + $0x590] sm:$0xff] }
 0x28e   : > { %5174 = vmatpush1.bf16.msra.mxu1 %v8440_v29  ;;  %6330 = vmatpush1.bf16.msra.mxu0 %v8441_v30  ;;  %v382_v29 = vld [vmem:[%s8638_s27 + $0x5d0] sm:$0xff] }
 0x28f   : > { %5175 = vmatprep.subr.bf16.mxu1 %v8529_v0  ;;  %6331 = vmatprep.subr.bf16.mxu0 %v8529_v0  ;;  %v378_v30 = vld [vmem:[%s8638_s27 + $0x5b0] sm:$0xff]  ;;  %v6931_v34 = vcombine.high %v374_v28, %v382_v29 }
 0x290   : > { %v6939_v35 = vcombine.high %v378_v30, %v386_v31  ;;  %v6938_v43 = vcombine.low %v378_v30, %v386_v31  ;;  %v458_v12 = vld [vmem:[%s8638_s27 + $0x830] sm:$0xff] }
 0x291   : > { %v466_v13 = vld [vmem:[%s8638_s27 + $0x870] sm:$0xff] }
 0x292   : > { %5176 = vmatpush1.bf16.msra.mxu1 %v8442_v33  ;;  %6332 = vmatpush1.bf16.msra.mxu0 %v8443_v36  ;;  %v6922_v33 = vcombine.low %v362_v22, %v370_v23  ;;  %v8454_v36 = vld [vmem:[%s9899_s1 + $0x1e8] sm:$0xff]   ;;  %v474_v20 = vld [vmem:[%s8638_s27 + $0x8b0] sm:$0xff]  ;;  %v7010_v22 = vcombine.low %v454_v10, %v462_v11  ;;  %v7018_v23 = vcombine.low %v458_v12, %v466_v13 }
 0x293   : > { %5177 = vmatprep.subr.bf16.mxu1 %v8529_v0  ;;  %6333 = vmatprep.subr.bf16.mxu0 %v8529_v0  ;;  %v482_v21 = vld [vmem:[%s8638_s27 + $0x8f0] sm:$0xff] }
 0x294   : > { %4937 = vmatmul.mubr.bf16.gmra.mrb[16].mxu1 %v6818_v37  ;;  %6093 = vmatmul.mubr.bf16.gmra.mrb[16].mxu0 %v6826_v38  ;;  %v8455_v37 = vld [vmem:[%s9899_s1 + $0x3e8] sm:$0xff]   ;;  %v390_v38 = vld [vmem:[%s8638_s27 + $0x610] sm:$0xff]  ;;  %v7034_v31 = vcombine.low %v474_v20, %v482_v21 }
 0x295   : > { %4944 = vmatprep.mubr.bf16.mxu1 %v6835_v39  ;;  %6100 = vmatprep.mubr.bf16.mxu0 %v6843_v40  ;;  %v398_v39 = vld [vmem:[%s8638_s27 + $0x650] sm:$0xff] }
 0x296   : > { %5178 = vmatpush1.bf16.msra.mxu1 %v8444_v41  ;;  %6334 = vmatpush1.bf16.msra.mxu0 %v8445_v42  ;;  %v394_v40 = vld [vmem:[%s8638_s27 + $0x630] sm:$0xff]  ;;  %v6930_v42 = vcombine.low %v374_v28, %v382_v29  ;;  %v6947_v44 = vcombine.high %v390_v38, %v398_v39 }
 0x297   : > { %5179 = vmatprep.subr.bf16.mxu1 %v8529_v0  ;;  %6335 = vmatprep.subr.bf16.mxu0 %v8529_v0  ;;  %v402_v41 = vld [vmem:[%s8638_s27 + $0x670] sm:$0xff] }
 0x298   : > { %v490_v28 = vld [vmem:[%s8638_s27 + $0x930] sm:$0xff] }
 0x299   : > { %v498_v29 = vld [vmem:[%s8638_s27 + $0x970] sm:$0xff] }
 0x29a   : > { %5180 = vmatpush1.bf16.msra.mxu1 %v8446_v45  ;;  %6336 = vmatpush1.bf16.msra.mxu0 %v8447_v48  ;;  %v6955_v45 = vcombine.high %v394_v40, %v402_v41  ;;  %v410_v48 = vld [vmem:[%s8638_s27 + $0x6b0] sm:$0xff] }
 0x29b   : > { %5181 = vmatprep.subr.bf16.mxu1 %v8529_v0  ;;  %6337 = vmatprep.subr.bf16.mxu0 %v8529_v0 }
 0x29c   : > { %4945 = vmatmul.mubr.bf16.gmra.mrb[20].mxu1 %v6834_v49  ;;  %6101 = vmatmul.mubr.bf16.gmra.mrb[20].mxu0 %v6842_v50  ;;  %v418_v49 = vld [vmem:[%s8638_s27 + $0x6f0] sm:$0xff]  ;;  %v6946_v50 = vcombine.low %v390_v38, %v398_v39  ;;  %v7050_v39 = vcombine.low %v490_v28, %v498_v29 }
 0x29d   : > { %4952 = vmatprep.mubr.bf16.mxu1 %v6851_v51  ;;  %6108 = vmatprep.mubr.bf16.mxu0 %v6859_v52  ;;  %v6954_v51 = vcombine.low %v394_v40, %v402_v41  ;;  %v6963_v52 = vcombine.high %v406_v46, %v414_v47 }
 0x29e   : > { %5182 = vmatpush1.bf16.msra.mxu1 %v8448_v53  ;;  %6338 = vmatpush1.bf16.msra.mxu0 %v8449_v54  ;;  %v6971_v53 = vcombine.high %v410_v48, %v418_v49  ;;  %v8456_v54 = vld [vmem:[%s9899_s1 + $0x1f0] sm:$0xff]  }
 0x29f   : > { %5183 = vmatprep.subr.bf16.mxu1 %v8529_v0  ;;  %6339 = vmatprep.subr.bf16.mxu0 %v8529_v0 }
 0x2a2   : > { %5184 = vmatpush1.bf16.msra.mxu1 %v8450_v63  ;;  %6340 = vmatpush1.bf16.msra.mxu0 %v8451_v1  ;;  %v438_v1 = vld [vmem:[%s8638_s27 + $0x790] sm:$0xff] }
 0x2a3   : > { %5185 = vmatprep.subr.bf16.mxu1 %v8529_v0  ;;  %6341 = vmatprep.subr.bf16.mxu0 %v8529_v0 }
 0x2a4   : > { %4953 = vmatmul.mubr.bf16.gmra.mrb[24].mxu1 %v6850_v59  ;;  %6109 = vmatmul.mubr.bf16.gmra.mrb[24].mxu0 %v6858_v60  ;;  %v434_v59 = vld [vmem:[%s8638_s27 + $0x770] sm:$0xff]  ;;  %v6962_v60 = vcombine.low %v406_v46, %v414_v47 }
 0x2a5   : > { %4960 = vmatprep.mubr.bf16.mxu1 %v6867_v61  ;;  %6116 = vmatprep.mubr.bf16.mxu0 %v6875_v62  ;;  %v6970_v61 = vcombine.low %v410_v48, %v418_v49  ;;  %v6979_v62 = vcombine.high %v422_v56, %v430_v57  ;;  %v6987_v63 = vcombine.high %v426_v58, %v434_v59 }
 0x2a6   : > { %5186 = vmatpush1.bf16.msra.mxu1 %v8452_v18  ;;  %6342 = vmatpush1.bf16.msra.mxu0 %v8453_v19  ;;  %v470_v18 = vld [vmem:[%s8638_s27 + $0x890] sm:$0xff] }
 0x2a7   : > { %5187 = vmatprep.subr.bf16.mxu1 %v8529_v0  ;;  %6343 = vmatprep.subr.bf16.mxu0 %v8529_v0  ;;  %v478_v19 = vld [vmem:[%s8638_s27 + $0x8d0] sm:$0xff] }
 0x2a8   : > { %v7026_v30 = vcombine.low %v470_v18, %v478_v19 }
 0x2aa   : > { %5188 = vmatpush1.bf16.msra.mxu1 %v8454_v36  ;;  %6344 = vmatpush1.bf16.msra.mxu0 %v8455_v37  ;;  %v506_v36 = vld [vmem:[%s8638_s27 + $0x9b0] sm:$0xff] }
 0x2ab   : > { %5189 = vmatprep.subr.bf16.mxu1 %v8529_v0  ;;  %6345 = vmatprep.subr.bf16.mxu0 %v8529_v0  ;;  %v514_v37 = vld [vmem:[%s8638_s27 + $0x9f0] sm:$0xff] }
 0x2ac   : > { %4961 = vmatmul.mubr.bf16.gmra.mrb[28].mxu1 %v6866_v6  ;;  %6117 = vmatmul.mubr.bf16.gmra.mrb[28].mxu0 %v6874_v7  ;;  %v6986_v6 = vcombine.low %v426_v58, %v434_v59  ;;  %v6995_v7 = vcombine.high %v438_v1, %v446_v2  ;;  %v7067_v41 = vcombine.high %v506_v36, %v514_v37  ;;  %v550_v58 = vld [vmem:[%s8638_s27 + $0xb10] sm:$0xff] }
 0x2ad   : > { %4968 = vmatprep.mubr.bf16.mxu1 %v6883_v8  ;;  %6124 = vmatprep.mubr.bf16.mxu0 %v6891_v9  ;;  %v7003_v8 = vcombine.high %v442_v3, %v450_v4  ;;  %v8459_v9 = vld [vmem:[%s9899_s1 + $0x3f8] sm:$0xff]   ;;  %v7066_v47 = vcombine.low %v506_v36, %v514_v37  ;;  %v558_v59 = vld [vmem:[%s8638_s27 + $0xb50] sm:$0xff] }
 0x2ae   : > { %5190 = vmatpush1.bf16.msra.mxu1 %v8456_v54  ;;  %6346 = vmatpush1.bf16.msra.mxu0 %v8457_v55  ;;  %v634_v36 = vld [vmem:[%s8638_s27 + $0xdb0] sm:$0xff] }
 0x2af   : > { %5191 = vmatprep.subr.bf16.mxu1 %v8529_v0  ;;  %6347 = vmatprep.subr.bf16.mxu0 %v8529_v0  ;;  %v8458_v0 = vld [vmem:[%s9899_s1 + $0x1f8] sm:$0xff]   ;;  %v642_v37 = vld [vmem:[%s8638_s27 + $0xdf0] sm:$0xff] }
 0x2b2   : > { %5192 = vmatpush1.bf16.msra.mxu1 %v8458_v0  ;;  %6348 = vmatpush1.bf16.msra.mxu0 %v8459_v9 }
 0x2b4   : > { %4969 = vmatmul.mubr.bf16.gmra.mrb[32].mxu1 %v6882_v14  ;;  %6125 = vmatmul.mubr.bf16.gmra.mrb[32].mxu0 %v6890_v15  ;;  %v6994_v14 = vcombine.low %v438_v1, %v446_v2  ;;  %v7002_v15 = vcombine.low %v442_v3, %v450_v4  ;;  %v7107_v1 = vcombine.high %v550_v58, %v558_v59  ;;  %v566_v3 = vld [vmem:[%s8638_s27 + $0xb90] sm:$0xff] }
 0x2b5   : > { %4976 = vmatprep.mubr.bf16.mxu1 %v6899_v16  ;;  %6132 = vmatprep.mubr.bf16.mxu0 %v6907_v17  ;;  %v7011_v16 = vcombine.high %v454_v10, %v462_v11  ;;  %v7019_v17 = vcombine.high %v458_v12, %v466_v13  ;;  %v574_v4 = vld [vmem:[%s8638_s27 + $0xbd0] sm:$0xff] }
 0x2b6   : > { %v7123_v0 = vcombine.high %v566_v3, %v574_v4  ;;  %v582_v10 = vld [vmem:[%s8638_s27 + $0xc10] sm:$0xff] }
 0x2b7   : > { %v590_v11 = vld [vmem:[%s8638_s27 + $0xc50] sm:$0xff] }
 0x2b8   : > { %v586_v12 = vld [vmem:[%s8638_s27 + $0xc30] sm:$0xff] }
 0x2b9   : > { %v594_v13 = vld [vmem:[%s8638_s27 + $0xc70] sm:$0xff] }
 0x2bc   : > { %4977 = vmatmul.mubr.bf16.gmra.mrb[36].mxu1 %v6898_v24  ;;  %6133 = vmatmul.mubr.bf16.gmra.mrb[36].mxu0 %v6906_v25  ;;  %v7027_v24 = vcombine.high %v470_v18, %v478_v19  ;;  %v7035_v25 = vcombine.high %v474_v20, %v482_v21  ;;  %v598_v18 = vld [vmem:[%s8638_s27 + $0xc90] sm:$0xff] }
 0x2bd   : > { %4984 = vmatprep.mubr.bf16.mxu1 %v6915_v26  ;;  %6140 = vmatprep.mubr.bf16.mxu0 %v6923_v27  ;;  %v486_v26 = vld [vmem:[%s8638_s27 + $0x910] sm:$0xff] }
 0x2be   : > { %v494_v27 = vld [vmem:[%s8638_s27 + $0x950] sm:$0xff] }
 0x2bf   : > { %v7042_v38 = vcombine.low %v486_v26, %v494_v27  ;;  %v606_v19 = vld [vmem:[%s8638_s27 + $0xcd0] sm:$0xff] }
 0x2c0   : > { %v602_v20 = vld [vmem:[%s8638_s27 + $0xcb0] sm:$0xff] }
 0x2c1   : > { %v610_v21 = vld [vmem:[%s8638_s27 + $0xcf0] sm:$0xff] }
 0x2c4   : > { %4985 = vmatmul.mubr.bf16.gmra.mrb[40].mxu1 %v6914_v32  ;;  %6141 = vmatmul.mubr.bf16.gmra.mrb[40].mxu0 %v6922_v33  ;;  %v7043_v32 = vcombine.high %v486_v26, %v494_v27  ;;  %v7051_v33 = vcombine.high %v490_v28, %v498_v29  ;;  %v614_v26 = vld [vmem:[%s8638_s27 + $0xd10] sm:$0xff] }
 0x2c5   : > { %4992 = vmatprep.mubr.bf16.mxu1 %v6931_v34  ;;  %6148 = vmatprep.mubr.bf16.mxu0 %v6939_v35  ;;  %v502_v34 = vld [vmem:[%s8638_s27 + $0x990] sm:$0xff] }
 0x2c6   : > { %v510_v35 = vld [vmem:[%s8638_s27 + $0x9d0] sm:$0xff] }
 0x2c7   : > { %v7059_v40 = vcombine.high %v502_v34, %v510_v35  ;;  %v7058_v46 = vcombine.low %v502_v34, %v510_v35  ;;  %v622_v27 = vld [vmem:[%s8638_s27 + $0xd50] sm:$0xff] }
 0x2c8   : > { %v618_v28 = vld [vmem:[%s8638_s27 + $0xd30] sm:$0xff] }
 0x2c9   : > { %v626_v29 = vld [vmem:[%s8638_s27 + $0xd70] sm:$0xff] }
 0x2ca   : > { %v630_v34 = vld [vmem:[%s8638_s27 + $0xd90] sm:$0xff] }
 0x2cb   : > { %v638_v35 = vld [vmem:[%s8638_s27 + $0xdd0] sm:$0xff] }
 0x2cc   : > { %4993 = vmatmul.mubr.bf16.gmra.mrb[44].mxu1 %v6930_v42  ;;  %6149 = vmatmul.mubr.bf16.gmra.mrb[44].mxu0 %v6938_v43  ;;  %v518_v42 = vld [vmem:[%s8638_s27 + $0xa10] sm:$0xff] }
 0x2cd   : > { %5000 = vmatprep.mubr.bf16.mxu1 %v6947_v44  ;;  %6156 = vmatprep.mubr.bf16.mxu0 %v6955_v45  ;;  %v526_v43 = vld [vmem:[%s8638_s27 + $0xa50] sm:$0xff] }
 0x2ce   : > { %v522_v44 = vld [vmem:[%s8638_s27 + $0xa30] sm:$0xff]  ;;  %v7075_v48 = vcombine.high %v518_v42, %v526_v43  ;;  %v7074_v54 = vcombine.low %v518_v42, %v526_v43 }
 0x2cf   : > { %v530_v45 = vld [vmem:[%s8638_s27 + $0xa70] sm:$0xff] }
 0x2d0   : > { %v7083_v49 = vcombine.high %v522_v44, %v530_v45  ;;  %v7082_v55 = vcombine.low %v522_v44, %v530_v45  ;;  %v646_v42 = vld [vmem:[%s8638_s27 + $0xe10] sm:$0xff] }
 0x2d1   : > { %v654_v43 = vld [vmem:[%s8638_s27 + $0xe50] sm:$0xff] }
 0x2d2   : > { %v650_v44 = vld [vmem:[%s8638_s27 + $0xe30] sm:$0xff] }
 0x2d3   : > { %v658_v45 = vld [vmem:[%s8638_s27 + $0xe70] sm:$0xff] }
 0x2d4   : > { %5001 = vmatmul.mubr.bf16.gmra.mrb[48].mxu1 %v6946_v50  ;;  %6157 = vmatmul.mubr.bf16.gmra.mrb[48].mxu0 %v6954_v51  ;;  %v534_v50 = vld [vmem:[%s8638_s27 + $0xa90] sm:$0xff] }
 0x2d5   : > { %5008 = vmatprep.mubr.bf16.mxu1 %v6963_v52  ;;  %6164 = vmatprep.mubr.bf16.mxu0 %v6971_v53  ;;  %v542_v51 = vld [vmem:[%s8638_s27 + $0xad0] sm:$0xff] }
 0x2d6   : > { %v538_v52 = vld [vmem:[%s8638_s27 + $0xab0] sm:$0xff]  ;;  %v7091_v56 = vcombine.high %v534_v50, %v542_v51 }
 0x2d7   : > { %v546_v53 = vld [vmem:[%s8638_s27 + $0xaf0] sm:$0xff] }
 0x2d8   : > { %v7099_v57 = vcombine.high %v538_v52, %v546_v53 }
 0x2dc   : > { %5009 = vmatmul.mubr.bf16.gmra.mrb[52].mxu1 %v6962_v60  ;;  %6165 = vmatmul.mubr.bf16.gmra.mrb[52].mxu0 %v6970_v61  ;;  %v554_v60 = vld [vmem:[%s8638_s27 + $0xb30] sm:$0xff] }
 0x2dd   : > { %5016 = vmatprep.mubr.bf16.mxu1 %v6979_v62  ;;  %6172 = vmatprep.mubr.bf16.mxu0 %v6987_v63  ;;  %v562_v61 = vld [vmem:[%s8638_s27 + $0xb70] sm:$0xff]  ;;  %v7090_v62 = vcombine.low %v534_v50, %v542_v51  ;;  %v7098_v63 = vcombine.low %v538_v52, %v546_v53 }
 0x2de   : > { %v7115_v2 = vcombine.high %v554_v60, %v562_v61  ;;  %v662_v50 = vld [vmem:[%s8638_s27 + $0xe90] sm:$0xff] }
 0x2df   : > { %v670_v51 = vld [vmem:[%s8638_s27 + $0xed0] sm:$0xff] }
 0x2e0   : > { %v666_v52 = vld [vmem:[%s8638_s27 + $0xeb0] sm:$0xff] }
 0x2e1   : > { %v674_v53 = vld [vmem:[%s8638_s27 + $0xef0] sm:$0xff] }
 0x2e4   : > { %5017 = vmatmul.mubr.bf16.gmra.mrb[56].mxu1 %v6978_v5  ;;  %6173 = vmatmul.mubr.bf16.gmra.mrb[56].mxu0 %v6986_v6  ;;  %v570_v5 = vld [vmem:[%s8638_s27 + $0xbb0] sm:$0xff] }
 0x2e5   : > { %5024 = vmatprep.mubr.bf16.mxu1 %v6995_v7  ;;  %6180 = vmatprep.mubr.bf16.mxu0 %v7003_v8  ;;  %v578_v6 = vld [vmem:[%s8638_s27 + $0xbf0] sm:$0xff]  ;;  %v7106_v7 = vcombine.low %v550_v58, %v558_v59  ;;  %v7114_v8 = vcombine.low %v554_v60, %v562_v61 }
 0x2e6   : > { %v7131_v9 = vcombine.high %v570_v5, %v578_v6  ;;  %v678_v58 = vld [vmem:[%s8638_s27 + $0xf10] sm:$0xff] }
 0x2e7   : > { %v686_v59 = vld [vmem:[%s8638_s27 + $0xf50] sm:$0xff] }
 0x2e8   : > { %v682_v60 = vld [vmem:[%s8638_s27 + $0xf30] sm:$0xff] }
 0x2e9   : > { %v690_v61 = vld [vmem:[%s8638_s27 + $0xf70] sm:$0xff] }
 0x2ec   : > { %5025 = vmatmul.mubr.bf16.gmra.mrb[60].mxu1 %v6994_v14  ;;  %6181 = vmatmul.mubr.bf16.gmra.mrb[60].mxu0 %v7002_v15  ;;  %v7122_v14 = vcombine.low %v566_v3, %v574_v4  ;;  %v7130_v15 = vcombine.low %v570_v5, %v578_v6  ;;  %v694_v3 = vld [vmem:[%s8638_s27 + $0xf90] sm:$0xff] }
 0x2ed   : > { %5032 = vmatprep.mubr.bf16.mxu1 %v7011_v16  ;;  %6188 = vmatprep.mubr.bf16.mxu0 %v7019_v17  ;;  %v7139_v16 = vcombine.high %v582_v10, %v590_v11  ;;  %v7147_v17 = vcombine.high %v586_v12, %v594_v13  ;;  %v702_v4 = vld [vmem:[%s8638_s27 + $0xfd0] sm:$0xff] }
 0x2ee   : > { %v698_v5 = vld [vmem:[%s8638_s27 + $0xfb0] sm:$0xff] }
 0x2ef   : > { %v706_v6 = vld [vmem:[%s8638_s27 + $0xff0] sm:$0xff] }
 0x2f4   : > { %5033 = vmatmul.mubr.bf16.gmra.mrb[64].mxu1 %v7010_v22  ;;  %6189 = vmatmul.mubr.bf16.gmra.mrb[64].mxu0 %v7018_v23  ;;  %v7138_v22 = vcombine.low %v582_v10, %v590_v11  ;;  %v7146_v23 = vcombine.low %v586_v12, %v594_v13  ;;  %v199_v10 = vld [vmem:[%s8638_s27 + $0x18] sm:$0xff] }
 0x2f5   : > { %5040 = vmatprep.mubr.bf16.mxu1 %v7027_v24  ;;  %6196 = vmatprep.mubr.bf16.mxu0 %v7035_v25  ;;  %v7155_v24 = vcombine.high %v598_v18, %v606_v19  ;;  %v7163_v25 = vcombine.high %v602_v20, %v610_v21  ;;  %v207_v11 = vld [vmem:[%s8638_s27 + $0x58] sm:$0xff] }
 0x2f6   : > { %v203_v12 = vld [vmem:[%s8638_s27 + $0x38] sm:$0xff] }
 0x2f7   : > { %v211_v13 = vld [vmem:[%s8638_s27 + $0x78] sm:$0xff] }
 0x2fc   : > { %5041 = vmatmul.mubr.bf16.gmra.mrb[68].mxu1 %v7026_v30  ;;  %6197 = vmatmul.mubr.bf16.gmra.mrb[68].mxu0 %v7034_v31  ;;  %v7154_v30 = vcombine.low %v598_v18, %v606_v19  ;;  %v7162_v31 = vcombine.low %v602_v20, %v610_v21  ;;  %v215_v18 = vld [vmem:[%s8638_s27 + $0x98] sm:$0xff] }
 0x2fd   : > { %5048 = vmatprep.mubr.bf16.mxu1 %v7043_v32  ;;  %6204 = vmatprep.mubr.bf16.mxu0 %v7051_v33  ;;  %v7171_v32 = vcombine.high %v614_v26, %v622_v27  ;;  %v7179_v33 = vcombine.high %v618_v28, %v626_v29  ;;  %v223_v19 = vld [vmem:[%s8638_s27 + $0xd8] sm:$0xff] }
 0x2fe   : > { %v219_v20 = vld [vmem:[%s8638_s27 + $0xb8] sm:$0xff] }
 0x2ff   : > { %v227_v21 = vld [vmem:[%s8638_s27 + $0xf8] sm:$0xff] }
 0x304   : > { %5049 = vmatmul.mubr.bf16.gmra.mrb[72].mxu1 %v7042_v38  ;;  %6205 = vmatmul.mubr.bf16.gmra.mrb[72].mxu0 %v7050_v39  ;;  %v7170_v38 = vcombine.low %v614_v26, %v622_v27  ;;  %v7178_v39 = vcombine.low %v618_v28, %v626_v29  ;;  %v231_v26 = vld [vmem:[%s8638_s27 + $0x118] sm:$0xff] }
 0x305   : > { %5056 = vmatprep.mubr.bf16.mxu1 %v7059_v40  ;;  %6212 = vmatprep.mubr.bf16.mxu0 %v7067_v41  ;;  %v7187_v40 = vcombine.high %v630_v34, %v638_v35  ;;  %v7195_v41 = vcombine.high %v634_v36, %v642_v37  ;;  %v239_v27 = vld [vmem:[%s8638_s27 + $0x158] sm:$0xff] }
 0x306   : > { %v235_v28 = vld [vmem:[%s8638_s27 + $0x138] sm:$0xff] }
 0x307   : > { %v243_v29 = vld [vmem:[%s8638_s27 + $0x178] sm:$0xff] }
 0x30c   : > { %5057 = vmatmul.mubr.bf16.gmra.mrb[76].mxu1 %v7058_v46  ;;  %6213 = vmatmul.mubr.bf16.gmra.mrb[76].mxu0 %v7066_v47  ;;  %v7186_v46 = vcombine.low %v630_v34, %v638_v35  ;;  %v7194_v47 = vcombine.low %v634_v36, %v642_v37  ;;  %v247_v34 = vld [vmem:[%s8638_s27 + $0x198] sm:$0xff] }
 0x30d   : > { %5064 = vmatprep.mubr.bf16.mxu1 %v7075_v48  ;;  %6220 = vmatprep.mubr.bf16.mxu0 %v7083_v49  ;;  %v7203_v48 = vcombine.high %v646_v42, %v654_v43  ;;  %v7211_v49 = vcombine.high %v650_v44, %v658_v45  ;;  %v255_v35 = vld [vmem:[%s8638_s27 + $0x1d8] sm:$0xff] }
 0x30e   : > { %v251_v36 = vld [vmem:[%s8638_s27 + $0x1b8] sm:$0xff] }
 0x30f   : > { %v259_v37 = vld [vmem:[%s8638_s27 + $0x1f8] sm:$0xff] }
 0x314   : > { %5065 = vmatmul.mubr.bf16.gmra.mrb[80].mxu1 %v7074_v54  ;;  %6221 = vmatmul.mubr.bf16.gmra.mrb[80].mxu0 %v7082_v55  ;;  %v7202_v54 = vcombine.low %v646_v42, %v654_v43  ;;  %v7210_v55 = vcombine.low %v650_v44, %v658_v45  ;;  %v263_v42 = vld [vmem:[%s8638_s27 + $0x218] sm:$0xff] }
 0x315   : > { %5072 = vmatprep.mubr.bf16.mxu1 %v7091_v56  ;;  %6228 = vmatprep.mubr.bf16.mxu0 %v7099_v57  ;;  %v7219_v56 = vcombine.high %v662_v50, %v670_v51  ;;  %v7227_v57 = vcombine.high %v666_v52, %v674_v53  ;;  %v271_v43 = vld [vmem:[%s8638_s27 + $0x258] sm:$0xff] }
 0x316   : > { %v267_v44 = vld [vmem:[%s8638_s27 + $0x238] sm:$0xff] }
 0x317   : > { %v275_v45 = vld [vmem:[%s8638_s27 + $0x278] sm:$0xff] }
 0x31c   : > { %5073 = vmatmul.mubr.bf16.gmra.mrb[84].mxu1 %v7090_v62  ;;  %6229 = vmatmul.mubr.bf16.gmra.mrb[84].mxu0 %v7098_v63  ;;  %v7218_v62 = vcombine.low %v662_v50, %v670_v51  ;;  %v7226_v63 = vcombine.low %v666_v52, %v674_v53  ;;  %v279_v50 = vld [vmem:[%s8638_s27 + $0x298] sm:$0xff] }
 0x31d   : > { %5080 = vmatprep.mubr.bf16.mxu1 %v7107_v1  ;;  %6236 = vmatprep.mubr.bf16.mxu0 %v7115_v2  ;;  %v7235_v1 = vcombine.high %v678_v58, %v686_v59  ;;  %v7243_v2 = vcombine.high %v682_v60, %v690_v61  ;;  %v287_v51 = vld [vmem:[%s8638_s27 + $0x2d8] sm:$0xff] }
 0x31e   : > { %v283_v52 = vld [vmem:[%s8638_s27 + $0x2b8] sm:$0xff] }
 0x31f   : > { %v291_v53 = vld [vmem:[%s8638_s27 + $0x2f8] sm:$0xff] }
 0x324   : > { %5081 = vmatmul.mubr.bf16.gmra.mrb[88].mxu1 %v7106_v7  ;;  %6237 = vmatmul.mubr.bf16.gmra.mrb[88].mxu0 %v7114_v8  ;;  %v7234_v7 = vcombine.low %v678_v58, %v686_v59  ;;  %v7242_v8 = vcombine.low %v682_v60, %v690_v61  ;;  %v295_v58 = vld [vmem:[%s8638_s27 + $0x318] sm:$0xff] }
 0x325   : > { %5088 = vmatprep.mubr.bf16.mxu1 %v7123_v0  ;;  %6244 = vmatprep.mubr.bf16.mxu0 %v7131_v9  ;;  %v7251_v0 = vcombine.high %v694_v3, %v702_v4  ;;  %v7259_v9 = vcombine.high %v698_v5, %v706_v6  ;;  %v303_v59 = vld [vmem:[%s8638_s27 + $0x358] sm:$0xff] }
 0x326   : > { %v299_v60 = vld [vmem:[%s8638_s27 + $0x338] sm:$0xff] }
 0x327   : > { %v307_v61 = vld [vmem:[%s8638_s27 + $0x378] sm:$0xff] }
 0x32c   : > { %5089 = vmatmul.mubr.bf16.gmra.mrb[92].mxu1 %v7122_v14  ;;  %6245 = vmatmul.mubr.bf16.gmra.mrb[92].mxu0 %v7130_v15  ;;  %v7250_v14 = vcombine.low %v694_v3, %v702_v4  ;;  %v7258_v15 = vcombine.low %v698_v5, %v706_v6  ;;  %v311_v3 = vld [vmem:[%s8638_s27 + $0x398] sm:$0xff] }
 0x32d   : > { %5096 = vmatprep.mubr.bf16.mxu1 %v7139_v16  ;;  %6252 = vmatprep.mubr.bf16.mxu0 %v7147_v17  ;;  %v6757_v16 = vcombine.high %v199_v10, %v207_v11  ;;  %v6765_v17 = vcombine.high %v203_v12, %v211_v13  ;;  %v319_v4 = vld [vmem:[%s8638_s27 + $0x3d8] sm:$0xff] }
 0x32e   : > { %v315_v5 = vld [vmem:[%s8638_s27 + $0x3b8] sm:$0xff] }
 0x32f   : > { %v323_v6 = vld [vmem:[%s8638_s27 + $0x3f8] sm:$0xff] }
 0x334   : > { %5097 = vmatmul.mubr.bf16.gmra.mrb[96].mxu1 %v7138_v22  ;;  %6253 = vmatmul.mubr.bf16.gmra.mrb[96].mxu0 %v7146_v23  ;;  %v6756_v22 = vcombine.low %v199_v10, %v207_v11  ;;  %v6764_v23 = vcombine.low %v203_v12, %v211_v13  ;;  %v327_v10 = vld [vmem:[%s8638_s27 + $0x418] sm:$0xff] }
 0x335   : > { %5104 = vmatprep.mubr.bf16.mxu1 %v7155_v24  ;;  %6260 = vmatprep.mubr.bf16.mxu0 %v7163_v25  ;;  %v6773_v24 = vcombine.high %v215_v18, %v223_v19  ;;  %v6781_v25 = vcombine.high %v219_v20, %v227_v21  ;;  %v335_v11 = vld [vmem:[%s8638_s27 + $0x458] sm:$0xff] }
 0x336   : > { %v331_v12 = vld [vmem:[%s8638_s27 + $0x438] sm:$0xff] }
 0x337   : > { %v339_v13 = vld [vmem:[%s8638_s27 + $0x478] sm:$0xff] }
 0x33c   : > { %5105 = vmatmul.mubr.bf16.gmra.mrb[100].mxu1 %v7154_v30  ;;  %6261 = vmatmul.mubr.bf16.gmra.mrb[100].mxu0 %v7162_v31  ;;  %v6772_v30 = vcombine.low %v215_v18, %v223_v19  ;;  %v6780_v31 = vcombine.low %v219_v20, %v227_v21  ;;  %v343_v18 = vld [vmem:[%s8638_s27 + $0x498] sm:$0xff] }
 0x33d   : > { %5112 = vmatprep.mubr.bf16.mxu1 %v7171_v32  ;;  %6268 = vmatprep.mubr.bf16.mxu0 %v7179_v33  ;;  %v6789_v32 = vcombine.high %v231_v26, %v239_v27  ;;  %v6797_v33 = vcombine.high %v235_v28, %v243_v29  ;;  %v351_v19 = vld [vmem:[%s8638_s27 + $0x4d8] sm:$0xff] }
 0x33e   : > { %v347_v20 = vld [vmem:[%s8638_s27 + $0x4b8] sm:$0xff] }
 0x33f   : > { %v355_v21 = vld [vmem:[%s8638_s27 + $0x4f8] sm:$0xff] }
 0x344   : > { %5113 = vmatmul.mubr.bf16.gmra.mrb[104].mxu1 %v7170_v38  ;;  %6269 = vmatmul.mubr.bf16.gmra.mrb[104].mxu0 %v7178_v39  ;;  %v6788_v38 = vcombine.low %v231_v26, %v239_v27  ;;  %v6796_v39 = vcombine.low %v235_v28, %v243_v29  ;;  %v359_v26 = vld [vmem:[%s8638_s27 + $0x518] sm:$0xff] }
 0x345   : > { %5120 = vmatprep.mubr.bf16.mxu1 %v7187_v40  ;;  %6276 = vmatprep.mubr.bf16.mxu0 %v7195_v41  ;;  %v6805_v40 = vcombine.high %v247_v34, %v255_v35  ;;  %v6813_v41 = vcombine.high %v251_v36, %v259_v37  ;;  %v367_v27 = vld [vmem:[%s8638_s27 + $0x558] sm:$0xff] }
 0x346   : > { %v363_v28 = vld [vmem:[%s8638_s27 + $0x538] sm:$0xff] }
 0x347   : > { %v371_v29 = vld [vmem:[%s8638_s27 + $0x578] sm:$0xff] }
 0x34c   : > { %5121 = vmatmul.mubr.bf16.gmra.mrb[108].mxu1 %v7186_v46  ;;  %6277 = vmatmul.mubr.bf16.gmra.mrb[108].mxu0 %v7194_v47  ;;  %v6804_v46 = vcombine.low %v247_v34, %v255_v35  ;;  %v6812_v47 = vcombine.low %v251_v36, %v259_v37  ;;  %v375_v34 = vld [vmem:[%s8638_s27 + $0x598] sm:$0xff] }
 0x34d   : > { %5128 = vmatprep.mubr.bf16.mxu1 %v7203_v48  ;;  %6284 = vmatprep.mubr.bf16.mxu0 %v7211_v49  ;;  %v6821_v48 = vcombine.high %v263_v42, %v271_v43  ;;  %v6829_v49 = vcombine.high %v267_v44, %v275_v45  ;;  %v383_v35 = vld [vmem:[%s8638_s27 + $0x5d8] sm:$0xff] }
 0x34e   : > { %v379_v36 = vld [vmem:[%s8638_s27 + $0x5b8] sm:$0xff] }
 0x34f   : > { %v387_v37 = vld [vmem:[%s8638_s27 + $0x5f8] sm:$0xff] }
 0x354   : > { %5129 = vmatmul.mubr.bf16.gmra.mrb[112].mxu1 %v7202_v54  ;;  %6285 = vmatmul.mubr.bf16.gmra.mrb[112].mxu0 %v7210_v55  ;;  %v6820_v54 = vcombine.low %v263_v42, %v271_v43  ;;  %v6828_v55 = vcombine.low %v267_v44, %v275_v45  ;;  %v391_v42 = vld [vmem:[%s8638_s27 + $0x618] sm:$0xff] }
 0x355   : > { %5136 = vmatprep.mubr.bf16.mxu1 %v7219_v56  ;;  %6292 = vmatprep.mubr.bf16.mxu0 %v7227_v57  ;;  %v6837_v56 = vcombine.high %v279_v50, %v287_v51  ;;  %v6845_v57 = vcombine.high %v283_v52, %v291_v53  ;;  %v399_v43 = vld [vmem:[%s8638_s27 + $0x658] sm:$0xff] }
 0x356   : > { %v395_v44 = vld [vmem:[%s8638_s27 + $0x638] sm:$0xff] }
 0x357   : > { %v403_v45 = vld [vmem:[%s8638_s27 + $0x678] sm:$0xff] }
 0x35c   : > { %5137 = vmatmul.mubr.bf16.gmra.mrb[116].mxu1 %v7218_v62  ;;  %6293 = vmatmul.mubr.bf16.gmra.mrb[116].mxu0 %v7226_v63  ;;  %v6836_v62 = vcombine.low %v279_v50, %v287_v51  ;;  %v6844_v63 = vcombine.low %v283_v52, %v291_v53  ;;  %v407_v50 = vld [vmem:[%s8638_s27 + $0x698] sm:$0xff] }
 0x35d   : > { %5144 = vmatprep.mubr.bf16.mxu1 %v7235_v1  ;;  %6300 = vmatprep.mubr.bf16.mxu0 %v7243_v2  ;;  %v6853_v1 = vcombine.high %v295_v58, %v303_v59  ;;  %v6861_v2 = vcombine.high %v299_v60, %v307_v61  ;;  %v415_v51 = vld [vmem:[%s8638_s27 + $0x6d8] sm:$0xff] }
 0x35e   : > { %v411_v52 = vld [vmem:[%s8638_s27 + $0x6b8] sm:$0xff] }
 0x35f   : > { %v419_v53 = vld [vmem:[%s8638_s27 + $0x6f8] sm:$0xff] }
 0x364   : > { %5145 = vmatmul.mubr.bf16.gmra.mrb[120].mxu1 %v7234_v7  ;;  %6301 = vmatmul.mubr.bf16.gmra.mrb[120].mxu0 %v7242_v8  ;;  %v6852_v7 = vcombine.low %v295_v58, %v303_v59  ;;  %v6860_v8 = vcombine.low %v299_v60, %v307_v61  ;;  %v423_v58 = vld [vmem:[%s8638_s27 + $0x718] sm:$0xff] }
 0x365   : > { %5152 = vmatprep.mubr.bf16.mxu1 %v7251_v0  ;;  %6308 = vmatprep.mubr.bf16.mxu0 %v7259_v9  ;;  %v6869_v0 = vcombine.high %v311_v3, %v319_v4  ;;  %v6877_v9 = vcombine.high %v315_v5, %v323_v6  ;;  %v431_v59 = vld [vmem:[%s8638_s27 + $0x758] sm:$0xff] }
 0x366   : > { %v427_v60 = vld [vmem:[%s8638_s27 + $0x738] sm:$0xff] }
 0x367   : > { %v435_v61 = vld [vmem:[%s8638_s27 + $0x778] sm:$0xff] }
 0x36c   : > { %5153 = vmatmul.mubr.bf16.gmra.mrb[124].mxu1 %v7250_v14  ;;  %6309 = vmatmul.mubr.bf16.gmra.mrb[124].mxu0 %v7258_v15  ;;  %v6868_v14 = vcombine.low %v311_v3, %v319_v4  ;;  %v6876_v15 = vcombine.low %v315_v5, %v323_v6  ;;  %v439_v3 = vld [vmem:[%s8638_s27 + $0x798] sm:$0xff] }
 0x36d   : > { %5193 = vmatprep.mubr.bf16.mxu1 %v6757_v16  ;;  %6349 = vmatprep.mubr.bf16.mxu0 %v6765_v17  ;;  %v6885_v16 = vcombine.high %v327_v10, %v335_v11  ;;  %v6893_v17 = vcombine.high %v331_v12, %v339_v13  ;;  %v447_v4 = vld [vmem:[%s8638_s27 + $0x7d8] sm:$0xff] }
 0x36e   : > { %v443_v5 = vld [vmem:[%s8638_s27 + $0x7b8] sm:$0xff] }
 0x36f   : > { %v451_v6 = vld [vmem:[%s8638_s27 + $0x7f8] sm:$0xff] }
 0x374   : > { %5194 = vmatmul.mubr.bf16.vlgmr.msra.gmra.mrb[0].mxu1 %v6756_v22  ;;  %6350 = vmatmul.mubr.bf16.vlgmr.msra.gmra.mrb[0].mxu0 %v6764_v23  ;;  %v6884_v22 = vcombine.low %v327_v10, %v335_v11  ;;  %v6892_v23 = vcombine.low %v331_v12, %v339_v13  ;;  %v455_v10 = vld [vmem:[%s8638_s27 + $0x818] sm:$0xff] }
 0x375   : > { %5201 = vmatprep.mubr.bf16.mxu1 %v6773_v24  ;;  %6357 = vmatprep.mubr.bf16.mxu0 %v6781_v25  ;;  %v6901_v24 = vcombine.high %v343_v18, %v351_v19  ;;  %v6909_v25 = vcombine.high %v347_v20, %v355_v21  ;;  %v463_v11 = vld [vmem:[%s8638_s27 + $0x858] sm:$0xff] }
 0x376   : > { %v459_v12 = vld [vmem:[%s8638_s27 + $0x838] sm:$0xff] }
 0x377   : > { %v467_v13 = vld [vmem:[%s8638_s27 + $0x878] sm:$0xff] }
 0x37c   : > { %5202 = vmatmul.mubr.bf16.gmra.mrb[4].mxu1 %v6772_v30  ;;  %6358 = vmatmul.mubr.bf16.gmra.mrb[4].mxu0 %v6780_v31  ;;  %v6900_v30 = vcombine.low %v343_v18, %v351_v19  ;;  %v6908_v31 = vcombine.low %v347_v20, %v355_v21  ;;  %v471_v18 = vld [vmem:[%s8638_s27 + $0x898] sm:$0xff] }
 0x37d   : > { %5209 = vmatprep.mubr.bf16.mxu1 %v6789_v32  ;;  %6365 = vmatprep.mubr.bf16.mxu0 %v6797_v33  ;;  %v6917_v32 = vcombine.high %v359_v26, %v367_v27  ;;  %v6925_v33 = vcombine.high %v363_v28, %v371_v29  ;;  %v479_v19 = vld [vmem:[%s8638_s27 + $0x8d8] sm:$0xff] }
 0x37e   : > { %v475_v20 = vld [vmem:[%s8638_s27 + $0x8b8] sm:$0xff] }
 0x37f   : > { %v483_v21 = vld [vmem:[%s8638_s27 + $0x8f8] sm:$0xff] }
 0x384   : > { %5210 = vmatmul.mubr.bf16.gmra.mrb[8].mxu1 %v6788_v38  ;;  %6366 = vmatmul.mubr.bf16.gmra.mrb[8].mxu0 %v6796_v39  ;;  %v6916_v38 = vcombine.low %v359_v26, %v367_v27  ;;  %v6924_v39 = vcombine.low %v363_v28, %v371_v29  ;;  %v487_v26 = vld [vmem:[%s8638_s27 + $0x918] sm:$0xff] }
 0x385   : > { %5217 = vmatprep.mubr.bf16.mxu1 %v6805_v40  ;;  %6373 = vmatprep.mubr.bf16.mxu0 %v6813_v41  ;;  %v6933_v40 = vcombine.high %v375_v34, %v383_v35  ;;  %v6941_v41 = vcombine.high %v379_v36, %v387_v37  ;;  %v495_v27 = vld [vmem:[%s8638_s27 + $0x958] sm:$0xff] }
 0x386   : > { %v491_v28 = vld [vmem:[%s8638_s27 + $0x938] sm:$0xff] }
 0x387   : > { %v499_v29 = vld [vmem:[%s8638_s27 + $0x978] sm:$0xff] }
 0x38c   : > { %5218 = vmatmul.mubr.bf16.gmra.mrb[12].mxu1 %v6804_v46  ;;  %6374 = vmatmul.mubr.bf16.gmra.mrb[12].mxu0 %v6812_v47  ;;  %v6932_v46 = vcombine.low %v375_v34, %v383_v35  ;;  %v6940_v47 = vcombine.low %v379_v36, %v387_v37  ;;  %v503_v34 = vld [vmem:[%s8638_s27 + $0x998] sm:$0xff] }
 0x38d   : > { %5225 = vmatprep.mubr.bf16.mxu1 %v6821_v48  ;;  %6381 = vmatprep.mubr.bf16.mxu0 %v6829_v49  ;;  %v6949_v48 = vcombine.high %v391_v42, %v399_v43  ;;  %v6957_v49 = vcombine.high %v395_v44, %v403_v45  ;;  %v511_v35 = vld [vmem:[%s8638_s27 + $0x9d8] sm:$0xff] }
 0x38e   : > { %v507_v36 = vld [vmem:[%s8638_s27 + $0x9b8] sm:$0xff] }
 0x38f   : > { %v515_v37 = vld [vmem:[%s8638_s27 + $0x9f8] sm:$0xff] }
 0x394   : > { %5226 = vmatmul.mubr.bf16.gmra.mrb[16].mxu1 %v6820_v54  ;;  %6382 = vmatmul.mubr.bf16.gmra.mrb[16].mxu0 %v6828_v55  ;;  %v6948_v54 = vcombine.low %v391_v42, %v399_v43  ;;  %v6956_v55 = vcombine.low %v395_v44, %v403_v45  ;;  %v519_v42 = vld [vmem:[%s8638_s27 + $0xa18] sm:$0xff] }
 0x395   : > { %5233 = vmatprep.mubr.bf16.mxu1 %v6837_v56  ;;  %6389 = vmatprep.mubr.bf16.mxu0 %v6845_v57  ;;  %v6965_v56 = vcombine.high %v407_v50, %v415_v51  ;;  %v6973_v57 = vcombine.high %v411_v52, %v419_v53  ;;  %v527_v43 = vld [vmem:[%s8638_s27 + $0xa58] sm:$0xff] }
 0x396   : > { %v523_v44 = vld [vmem:[%s8638_s27 + $0xa38] sm:$0xff] }
 0x397   : > { %v531_v45 = vld [vmem:[%s8638_s27 + $0xa78] sm:$0xff] }
 0x39c   : > { %5234 = vmatmul.mubr.bf16.gmra.mrb[20].mxu1 %v6836_v62  ;;  %6390 = vmatmul.mubr.bf16.gmra.mrb[20].mxu0 %v6844_v63  ;;  %v6964_v62 = vcombine.low %v407_v50, %v415_v51  ;;  %v6972_v63 = vcombine.low %v411_v52, %v419_v53  ;;  %v535_v50 = vld [vmem:[%s8638_s27 + $0xa98] sm:$0xff] }
 0x39d   : > { %5241 = vmatprep.mubr.bf16.mxu1 %v6853_v1  ;;  %6397 = vmatprep.mubr.bf16.mxu0 %v6861_v2  ;;  %v6981_v1 = vcombine.high %v423_v58, %v431_v59  ;;  %v6989_v2 = vcombine.high %v427_v60, %v435_v61  ;;  %v543_v51 = vld [vmem:[%s8638_s27 + $0xad8] sm:$0xff] }
 0x39e   : > { %v539_v52 = vld [vmem:[%s8638_s27 + $0xab8] sm:$0xff] }
 0x39f   : > { %v547_v53 = vld [vmem:[%s8638_s27 + $0xaf8] sm:$0xff] }
 0x3a4   : > { %5242 = vmatmul.mubr.bf16.gmra.mrb[24].mxu1 %v6852_v7  ;;  %6398 = vmatmul.mubr.bf16.gmra.mrb[24].mxu0 %v6860_v8  ;;  %v6980_v7 = vcombine.low %v423_v58, %v431_v59  ;;  %v6988_v8 = vcombine.low %v427_v60, %v435_v61  ;;  %v551_v58 = vld [vmem:[%s8638_s27 + $0xb18] sm:$0xff] }
 0x3a5   : > { %5249 = vmatprep.mubr.bf16.mxu1 %v6869_v0  ;;  %6405 = vmatprep.mubr.bf16.mxu0 %v6877_v9  ;;  %v6997_v0 = vcombine.high %v439_v3, %v447_v4  ;;  %v7005_v9 = vcombine.high %v443_v5, %v451_v6  ;;  %v559_v59 = vld [vmem:[%s8638_s27 + $0xb58] sm:$0xff] }
 0x3a6   : > { %v555_v60 = vld [vmem:[%s8638_s27 + $0xb38] sm:$0xff] }
 0x3a7   : > { %v563_v61 = vld [vmem:[%s8638_s27 + $0xb78] sm:$0xff] }
 0x3ac   : > { %5250 = vmatmul.mubr.bf16.gmra.mrb[28].mxu1 %v6868_v14  ;;  %6406 = vmatmul.mubr.bf16.gmra.mrb[28].mxu0 %v6876_v15  ;;  %v6996_v14 = vcombine.low %v439_v3, %v447_v4  ;;  %v7004_v15 = vcombine.low %v443_v5, %v451_v6  ;;  %v567_v3 = vld [vmem:[%s8638_s27 + $0xb98] sm:$0xff] }
 0x3ad   : > { %5257 = vmatprep.mubr.bf16.mxu1 %v6885_v16  ;;  %6413 = vmatprep.mubr.bf16.mxu0 %v6893_v17  ;;  %v7013_v16 = vcombine.high %v455_v10, %v463_v11  ;;  %v7021_v17 = vcombine.high %v459_v12, %v467_v13  ;;  %v575_v4 = vld [vmem:[%s8638_s27 + $0xbd8] sm:$0xff] }
 0x3ae   : > { %v571_v5 = vld [vmem:[%s8638_s27 + $0xbb8] sm:$0xff] }
 0x3af   : > { %v579_v6 = vld [vmem:[%s8638_s27 + $0xbf8] sm:$0xff] }
 0x3b4   : > { %5258 = vmatmul.mubr.bf16.gmra.mrb[32].mxu1 %v6884_v22  ;;  %6414 = vmatmul.mubr.bf16.gmra.mrb[32].mxu0 %v6892_v23  ;;  %v7012_v22 = vcombine.low %v455_v10, %v463_v11  ;;  %v7020_v23 = vcombine.low %v459_v12, %v467_v13  ;;  %v583_v10 = vld [vmem:[%s8638_s27 + $0xc18] sm:$0xff] }
 0x3b5   : > { %5265 = vmatprep.mubr.bf16.mxu1 %v6901_v24  ;;  %6421 = vmatprep.mubr.bf16.mxu0 %v6909_v25  ;;  %v7029_v24 = vcombine.high %v471_v18, %v479_v19  ;;  %v7037_v25 = vcombine.high %v475_v20, %v483_v21  ;;  %v591_v11 = vld [vmem:[%s8638_s27 + $0xc58] sm:$0xff] }
 0x3b6   : > { %v587_v12 = vld [vmem:[%s8638_s27 + $0xc38] sm:$0xff] }
 0x3b7   : > { %v595_v13 = vld [vmem:[%s8638_s27 + $0xc78] sm:$0xff] }
 0x3bc   : > { %5266 = vmatmul.mubr.bf16.gmra.mrb[36].mxu1 %v6900_v30  ;;  %6422 = vmatmul.mubr.bf16.gmra.mrb[36].mxu0 %v6908_v31  ;;  %v7028_v30 = vcombine.low %v471_v18, %v479_v19  ;;  %v7036_v31 = vcombine.low %v475_v20, %v483_v21  ;;  %v599_v18 = vld [vmem:[%s8638_s27 + $0xc98] sm:$0xff] }
 0x3bd   : > { %5273 = vmatprep.mubr.bf16.mxu1 %v6917_v32  ;;  %6429 = vmatprep.mubr.bf16.mxu0 %v6925_v33  ;;  %v7045_v32 = vcombine.high %v487_v26, %v495_v27  ;;  %v7053_v33 = vcombine.high %v491_v28, %v499_v29  ;;  %v607_v19 = vld [vmem:[%s8638_s27 + $0xcd8] sm:$0xff] }
 0x3be   : > { %v603_v20 = vld [vmem:[%s8638_s27 + $0xcb8] sm:$0xff] }
 0x3bf   : > { %v611_v21 = vld [vmem:[%s8638_s27 + $0xcf8] sm:$0xff] }
 0x3c4   : > { %5274 = vmatmul.mubr.bf16.gmra.mrb[40].mxu1 %v6916_v38  ;;  %6430 = vmatmul.mubr.bf16.gmra.mrb[40].mxu0 %v6924_v39  ;;  %v7044_v38 = vcombine.low %v487_v26, %v495_v27  ;;  %v7052_v39 = vcombine.low %v491_v28, %v499_v29  ;;  %v615_v26 = vld [vmem:[%s8638_s27 + $0xd18] sm:$0xff] }
 0x3c5   : > { %5281 = vmatprep.mubr.bf16.mxu1 %v6933_v40  ;;  %6437 = vmatprep.mubr.bf16.mxu0 %v6941_v41  ;;  %v7061_v40 = vcombine.high %v503_v34, %v511_v35  ;;  %v7069_v41 = vcombine.high %v507_v36, %v515_v37  ;;  %v623_v27 = vld [vmem:[%s8638_s27 + $0xd58] sm:$0xff] }
 0x3c6   : > { %v619_v28 = vld [vmem:[%s8638_s27 + $0xd38] sm:$0xff] }
 0x3c7   : > { %v627_v29 = vld [vmem:[%s8638_s27 + $0xd78] sm:$0xff] }
 0x3cc   : > { %5282 = vmatmul.mubr.bf16.gmra.mrb[44].mxu1 %v6932_v46  ;;  %6438 = vmatmul.mubr.bf16.gmra.mrb[44].mxu0 %v6940_v47  ;;  %v7060_v46 = vcombine.low %v503_v34, %v511_v35  ;;  %v7068_v47 = vcombine.low %v507_v36, %v515_v37  ;;  %v631_v34 = vld [vmem:[%s8638_s27 + $0xd98] sm:$0xff] }
 0x3cd   : > { %5289 = vmatprep.mubr.bf16.mxu1 %v6949_v48  ;;  %6445 = vmatprep.mubr.bf16.mxu0 %v6957_v49  ;;  %v7077_v48 = vcombine.high %v519_v42, %v527_v43  ;;  %v7085_v49 = vcombine.high %v523_v44, %v531_v45  ;;  %v639_v35 = vld [vmem:[%s8638_s27 + $0xdd8] sm:$0xff] }
 0x3ce   : > { %v635_v36 = vld [vmem:[%s8638_s27 + $0xdb8] sm:$0xff] }
 0x3cf   : > { %v643_v37 = vld [vmem:[%s8638_s27 + $0xdf8] sm:$0xff] }
 0x3d4   : > { %5290 = vmatmul.mubr.bf16.gmra.mrb[48].mxu1 %v6948_v54  ;;  %6446 = vmatmul.mubr.bf16.gmra.mrb[48].mxu0 %v6956_v55  ;;  %v7076_v54 = vcombine.low %v519_v42, %v527_v43  ;;  %v7084_v55 = vcombine.low %v523_v44, %v531_v45  ;;  %v9670_v42 = vstv %s964_s6  ;;  %v647_v43 = vld [vmem:[%s8638_s27 + $0xe18] sm:$0xff] }
 0x3d5   : > { %5297 = vmatprep.mubr.bf16.mxu1 %v6965_v56  ;;  %6453 = vmatprep.mubr.bf16.mxu0 %v6973_v57  ;;  %v7093_v56 = vcombine.high %v535_v50, %v543_v51  ;;  %v7101_v57 = vcombine.high %v539_v52, %v547_v53  ;;  %v655_v44 = vld [vmem:[%s8638_s27 + $0xe58] sm:$0xff] }
 0x3dc   : > { %5298 = vmatmul.mubr.bf16.gmra.mrb[52].mxu1 %v6964_v62  ;;  %6454 = vmatmul.mubr.bf16.gmra.mrb[52].mxu0 %v6972_v63  ;;  %v7092_v62 = vcombine.low %v535_v50, %v543_v51  ;;  %v7100_v63 = vcombine.low %v539_v52, %v547_v53  ;;  %v7188_v51 = vcombine.low %v631_v34, %v639_v35 }
 0x3dd   : > { %5305 = vmatprep.mubr.bf16.mxu1 %v6981_v1  ;;  %6461 = vmatprep.mubr.bf16.mxu0 %v6989_v2  ;;  %v7109_v1 = vcombine.high %v551_v58, %v559_v59  ;;  %v7117_v2 = vcombine.high %v555_v60, %v563_v61 }
 0x3e4   : > { %5306 = vmatmul.mubr.bf16.gmra.mrb[56].mxu1 %v6980_v7  ;;  %6462 = vmatmul.mubr.bf16.gmra.mrb[56].mxu0 %v6988_v8  ;;  %v7108_v7 = vcombine.low %v551_v58, %v559_v59  ;;  %v7116_v8 = vcombine.low %v555_v60, %v563_v61 }
 0x3e5   : > { %5313 = vmatprep.mubr.bf16.mxu1 %v6997_v0  ;;  %6469 = vmatprep.mubr.bf16.mxu0 %v7005_v9  ;;  %v7125_v0 = vcombine.high %v567_v3, %v575_v4  ;;  %v7133_v9 = vcombine.high %v571_v5, %v579_v6 }
 0x3ec   : > { %5314 = vmatmul.mubr.bf16.gmra.mrb[60].mxu1 %v6996_v14  ;;  %6470 = vmatmul.mubr.bf16.gmra.mrb[60].mxu0 %v7004_v15  ;;  %v7124_v14 = vcombine.low %v567_v3, %v575_v4  ;;  %v7132_v15 = vcombine.low %v571_v5, %v579_v6  ;;  %v667_v3 = vld [vmem:[%s8638_s27 + $0xeb8] sm:$0xff] }
 0x3ed   : > { %5321 = vmatprep.mubr.bf16.mxu1 %v7013_v16  ;;  %6477 = vmatprep.mubr.bf16.mxu0 %v7021_v17  ;;  %v7141_v16 = vcombine.high %v583_v10, %v591_v11  ;;  %v7149_v17 = vcombine.high %v587_v12, %v595_v13  ;;  %v675_v4 = vld [vmem:[%s8638_s27 + $0xef8] sm:$0xff] }
 0x3f4   : > { %5322 = vmatmul.mubr.bf16.gmra.mrb[64].mxu1 %v7012_v22  ;;  %6478 = vmatmul.mubr.bf16.gmra.mrb[64].mxu0 %v7020_v23  ;;  %v7140_v22 = vcombine.low %v583_v10, %v591_v11  ;;  %v7148_v23 = vcombine.low %v587_v12, %v595_v13 }
 0x3f5   : > { %5329 = vmatprep.mubr.bf16.mxu1 %v7029_v24  ;;  %6485 = vmatprep.mubr.bf16.mxu0 %v7037_v25  ;;  %v7157_v24 = vcombine.high %v599_v18, %v607_v19  ;;  %v7165_v25 = vcombine.high %v603_v20, %v611_v21 }
 0x3fc   : > { %5330 = vmatmul.mubr.bf16.gmra.mrb[68].mxu1 %v7028_v30  ;;  %6486 = vmatmul.mubr.bf16.gmra.mrb[68].mxu0 %v7036_v31  ;;  %v7156_v30 = vcombine.low %v599_v18, %v607_v19  ;;  %v7164_v31 = vcombine.low %v603_v20, %v611_v21  ;;  %v679_v19 = vld [vmem:[%s8638_s27 + $0xf18] sm:$0xff] }
 0x3fd   : > { %5337 = vmatprep.mubr.bf16.mxu1 %v7045_v32  ;;  %6493 = vmatprep.mubr.bf16.mxu0 %v7053_v33  ;;  %v7173_v32 = vcombine.high %v615_v26, %v623_v27  ;;  %v7181_v33 = vcombine.high %v619_v28, %v627_v29  ;;  %v687_v20 = vld [vmem:[%s8638_s27 + $0xf58] sm:$0xff] }
 0x404   : > { %5338 = vmatmul.mubr.bf16.gmra.mrb[72].mxu1 %v7044_v38  ;;  %6494 = vmatmul.mubr.bf16.gmra.mrb[72].mxu0 %v7052_v39  ;;  %v7172_v38 = vcombine.low %v615_v26, %v623_v27  ;;  %v7180_v39 = vcombine.low %v619_v28, %v627_v29 }
 0x405   : > { %5345 = vmatprep.mubr.bf16.mxu1 %v7061_v40  ;;  %6501 = vmatprep.mubr.bf16.mxu0 %v7069_v41  ;;  %v7189_v40 = vcombine.high %v631_v34, %v639_v35  ;;  %v7197_v41 = vcombine.high %v635_v36, %v643_v37 }
 0x40c   : > { %5346 = vmatmul.mubr.bf16.gmra.mrb[76].mxu1 %v7060_v46  ;;  %6502 = vmatmul.mubr.bf16.gmra.mrb[76].mxu0 %v7068_v47  ;;  %v651_v46 = vld [vmem:[%s8638_s27 + $0xe38] sm:$0xff] }
 0x40d   : > { %5353 = vmatprep.mubr.bf16.mxu1 %v7077_v48  ;;  %6509 = vmatprep.mubr.bf16.mxu0 %v7085_v49  ;;  %v659_v47 = vld [vmem:[%s8638_s27 + $0xe78] sm:$0xff] }
 0x40e   : > { %v7213_v60 = vcombine.high %v651_v46, %v659_v47  ;;  %v7212_v10 = vcombine.low %v651_v46, %v659_v47 }
 0x414   : > { %5354 = vmatmul.mubr.bf16.gmra.mrb[80].mxu1 %v7076_v54  ;;  %6510 = vmatmul.mubr.bf16.gmra.mrb[80].mxu0 %v7084_v55  ;;  %v7196_v54 = vcombine.low %v635_v36, %v643_v37  ;;  %v7205_v55 = vcombine.high %v647_v43, %v655_v44 }
 0x415   : > { %5361 = vmatprep.mubr.bf16.mxu1 %v7093_v56  ;;  %6517 = vmatprep.mubr.bf16.mxu0 %v7101_v57 }
 0x41c   : > { %5362 = vmatmul.mubr.bf16.gmra.mrb[84].mxu1 %v7092_v62  ;;  %6518 = vmatmul.mubr.bf16.gmra.mrb[84].mxu0 %v7100_v63  ;;  %v663_v63 = vld [vmem:[%s8638_s27 + $0xe98] sm:$0xff] }
 0x41d   : > { %5369 = vmatprep.mubr.bf16.mxu1 %v7109_v1  ;;  %6525 = vmatprep.mubr.bf16.mxu0 %v7117_v2  ;;  %v671_v1 = vld [vmem:[%s8638_s27 + $0xed8] sm:$0xff] }
 0x41e   : > { %v7221_v11 = vcombine.high %v663_v63, %v671_v1  ;;  %v7220_v27 = vcombine.low %v663_v63, %v671_v1 }
 0x424   : > { %5370 = vmatmul.mubr.bf16.gmra.mrb[88].mxu1 %v7108_v7  ;;  %6526 = vmatmul.mubr.bf16.gmra.mrb[88].mxu0 %v7116_v8  ;;  %v7204_v8 = vcombine.low %v647_v43, %v655_v44  ;;  %v699_v43 = vld [vmem:[%s8638_s27 + $0xfb8] sm:$0xff] }
 0x425   : > { %5377 = vmatprep.mubr.bf16.mxu1 %v7125_v0  ;;  %6533 = vmatprep.mubr.bf16.mxu0 %v7133_v9  ;;  %v707_v44 = vld [vmem:[%s8638_s27 + $0xff8] sm:$0xff] }
 0x42c   : > { %5378 = vmatmul.mubr.bf16.gmra.mrb[92].mxu1 %v7124_v14  ;;  %6534 = vmatmul.mubr.bf16.gmra.mrb[92].mxu0 %v7132_v15 }
 0x42d   : > { %5385 = vmatprep.mubr.bf16.mxu1 %v7141_v16  ;;  %6541 = vmatprep.mubr.bf16.mxu0 %v7149_v17  ;;  %v7229_v16 = vcombine.high %v667_v3, %v675_v4 }
 0x434   : > { %5386 = vmatmul.mubr.bf16.gmra.mrb[96].mxu1 %v7140_v22  ;;  %6542 = vmatmul.mubr.bf16.gmra.mrb[96].mxu0 %v7148_v23  ;;  %v683_v22 = vld [vmem:[%s8638_s27 + $0xf38] sm:$0xff] }
 0x435   : > { %5393 = vmatprep.mubr.bf16.mxu1 %v7157_v24  ;;  %6549 = vmatprep.mubr.bf16.mxu0 %v7165_v25  ;;  %v691_v23 = vld [vmem:[%s8638_s27 + $0xf78] sm:$0xff] }
 0x436   : > { %v7245_v36 = vcombine.high %v683_v22, %v691_v23 }
 0x43c   : > { %5394 = vmatmul.mubr.bf16.gmra.mrb[100].mxu1 %v7156_v30  ;;  %6550 = vmatmul.mubr.bf16.gmra.mrb[100].mxu0 %v7164_v31  ;;  %v7228_v30 = vcombine.low %v667_v3, %v675_v4  ;;  %v7237_v31 = vcombine.high %v679_v19, %v687_v20  ;;  %v7260_v4 = vcombine.low %v699_v43, %v707_v44 }
 0x43d   : > { %5401 = vmatprep.mubr.bf16.mxu1 %v7173_v32  ;;  %6557 = vmatprep.mubr.bf16.mxu0 %v7181_v33 }
 0x444   : > { %5402 = vmatmul.mubr.bf16.gmra.mrb[104].mxu1 %v7172_v38  ;;  %6558 = vmatmul.mubr.bf16.gmra.mrb[104].mxu0 %v7180_v39  ;;  %v695_v39 = vld [vmem:[%s8638_s27 + $0xf98] sm:$0xff] }
 0x445   : > { %5409 = vmatprep.mubr.bf16.mxu1 %v7189_v40  ;;  %6565 = vmatprep.mubr.bf16.mxu0 %v7197_v41  ;;  %v703_v40 = vld [vmem:[%s8638_s27 + $0xfd8] sm:$0xff] }
 0x446   : > { %v7252_v1 = vcombine.low %v695_v39, %v703_v40 }
 0x447   : > { %v5195_v45 = vpop.f32.mrb[0].mxu1  ;;  %v6351_v49 = vpop.f32.mrb[0].mxu0 }
 0x448   : > { %v7394_v48 = vadd.f32 %v5195_v45, %v9670_v42  ;;  %v5197_v50 = vpop.f32.mrb[1].mxu1  ;;  %v6353_v52 = vpop.f32.mrb[1].mxu0 }
 0x449   : > { %v5198_v53 = vpop.f32.mrb[2].mxu1  ;;  %v6354_v58 = vpop.f32.mrb[2].mxu0  ;;  %v7253_v52 = vcombine.high %v695_v39, %v703_v40 }
 0x44a   : > { %v7395_v56 = vadd.f32 %v7394_v48, %v6351_v49  ;;  %v7396_v57 = vadd.f32 %v5198_v53, %v9670_v42  ;;  %v5200_v59 = vpop.f32.mrb[3].mxu1  ;;  %v6356_v61 = vpop.f32.mrb[3].mxu0  ;;  %v7236_v48 = vcombine.low %v679_v19, %v687_v20 }
 0x44c   : > { %6607 = vst.msk [vmem:[%s9680_s7] sm:$0xff] %vm6606_vm0, %v7395_v56  ;;  %v7397_v62 = vadd.f32 %v7396_v57, %v6354_v58  ;;  %5410 = vmatmul.mubr.bf16.gmra.mrb[108].mxu1 %v7188_v51  ;;  %6566 = vmatmul.mubr.bf16.gmra.mrb[108].mxu0 %v7196_v54  ;;  %v7244_v51 = vcombine.low %v683_v22, %v691_v23 }
 0x44d   : > { %5417 = vmatprep.mubr.bf16.mxu1 %v7205_v55  ;;  %6573 = vmatprep.mubr.bf16.mxu0 %v7213_v60  ;;  %v7261_v57 = vcombine.high %v699_v43, %v707_v44 }
 0x44e   : > { %6608 = vst.msk [vmem:[%s9680_s7 + $0x8] sm:$0xff] %vm6606_vm0, %v7397_v62 }
 0x44f   : > { %v5203_v2 = vpop.f32.mrb[4].mxu1  ;;  %v6359_v6 = vpop.f32.mrb[4].mxu0 }
 0x450   : > { %v7398_v5 = vadd.f32 %v5203_v2, %v9670_v42  ;;  %v5205_v7 = vpop.f32.mrb[5].mxu1  ;;  %v6361_v0 = vpop.f32.mrb[5].mxu0 }
 0x451   : > { %v5206_v9 = vpop.f32.mrb[6].mxu1  ;;  %v6362_v14 = vpop.f32.mrb[6].mxu0 }
 0x452   : > { %v7399_v12 = vadd.f32 %v7398_v5, %v6359_v6  ;;  %v7400_v13 = vadd.f32 %v5206_v9, %v9670_v42  ;;  %v5208_v15 = vpop.f32.mrb[7].mxu1  ;;  %v6364_v17 = vpop.f32.mrb[7].mxu0 }
 0x454   : > { %6609 = vst.msk [vmem:[%s9680_s7 + $0x10] sm:$0xff] %vm6606_vm0, %v7399_v12  ;;  %v7401_v18 = vadd.f32 %v7400_v13, %v6362_v14  ;;  %5418 = vmatmul.mubr.bf16.gmra.mrb[112].mxu1 %v7204_v8  ;;  %6574 = vmatmul.mubr.bf16.gmra.mrb[112].mxu0 %v7212_v10 }
 0x455   : > { %5425 = vmatprep.mubr.bf16.mxu1 %v7221_v11  ;;  %6581 = vmatprep.mubr.bf16.mxu0 %v7229_v16 }
 0x456   : > { %6610 = vst.msk [vmem:[%s9680_s7 + $0x18] sm:$0xff] %vm6606_vm0, %v7401_v18 }
 0x457   : > { %v5211_v21 = vpop.f32.mrb[8].mxu1  ;;  %v6367_v25 = vpop.f32.mrb[8].mxu0 }
 0x458   : > { %v7402_v24 = vadd.f32 %v5211_v21, %v9670_v42  ;;  %v5213_v26 = vpop.f32.mrb[9].mxu1  ;;  %v6369_v28 = vpop.f32.mrb[9].mxu0 }
 0x459   : > { %v5214_v29 = vpop.f32.mrb[10].mxu1  ;;  %v6370_v34 = vpop.f32.mrb[10].mxu0 }
 0x45a   : > { %v7403_v32 = vadd.f32 %v7402_v24, %v6367_v25  ;;  %v7404_v33 = vadd.f32 %v5214_v29, %v9670_v42  ;;  %v5216_v35 = vpop.f32.mrb[11].mxu1  ;;  %v6372_v37 = vpop.f32.mrb[11].mxu0 }
 0x45c   : > { %6611 = vst.msk [vmem:[%s9680_s7 + $0x20] sm:$0xff] %vm6606_vm0, %v7403_v32  ;;  %v7405_v38 = vadd.f32 %v7404_v33, %v6370_v34  ;;  %5426 = vmatmul.mubr.bf16.gmra.mrb[116].mxu1 %v7220_v27  ;;  %6582 = vmatmul.mubr.bf16.gmra.mrb[116].mxu0 %v7228_v30 }
 0x45d   : > { %5433 = vmatprep.mubr.bf16.mxu1 %v7237_v31  ;;  %6589 = vmatprep.mubr.bf16.mxu0 %v7245_v36 }
 0x45e   : > { %6612 = vst.msk [vmem:[%s9680_s7 + $0x28] sm:$0xff] %vm6606_vm0, %v7405_v38 }
 0x45f   : > { %v5219_v41 = vpop.f32.mrb[12].mxu1  ;;  %v6375_v46 = vpop.f32.mrb[12].mxu0 }
 0x460   : > { %v7406_v45 = vadd.f32 %v5219_v41, %v9670_v42  ;;  %v5221_v47 = vpop.f32.mrb[13].mxu1  ;;  %v6377_v49 = vpop.f32.mrb[13].mxu0 }
 0x461   : > { %v5222_v50 = vpop.f32.mrb[14].mxu1  ;;  %v6378_v55 = vpop.f32.mrb[14].mxu0 }
 0x462   : > { %v7407_v53 = vadd.f32 %v7406_v45, %v6375_v46  ;;  %v7408_v54 = vadd.f32 %v5222_v50, %v9670_v42  ;;  %v5224_v56 = vpop.f32.mrb[15].mxu1  ;;  %v6380_v58 = vpop.f32.mrb[15].mxu0 }
 0x464   : > { %6613 = vst.msk [vmem:[%s9680_s7 + $0x30] sm:$0xff] %vm6606_vm0, %v7407_v53  ;;  %v7409_v59 = vadd.f32 %v7408_v54, %v6378_v55  ;;  %5434 = vmatmul.mubr.bf16.gmra.mrb[120].mxu1 %v7236_v48  ;;  %6590 = vmatmul.mubr.bf16.gmra.mrb[120].mxu0 %v7244_v51 }
 0x465   : > { %5441 = vmatprep.mubr.bf16.mxu1 %v7253_v52  ;;  %6597 = vmatprep.mubr.bf16.mxu0 %v7261_v57 }
 0x466   : > { %6614 = vst.msk [vmem:[%s9680_s7 + $0x38] sm:$0xff] %vm6606_vm0, %v7409_v59 }
 0x467   : > { %v5227_v60 = vpop.f32.mrb[16].mxu1  ;;  %v6383_v62 = vpop.f32.mrb[16].mxu0 }
 0x468   : > { %v7410_v61 = vadd.f32 %v5227_v60, %v9670_v42  ;;  %v5229_v63 = vpop.f32.mrb[17].mxu1  ;;  %v6385_v2 = vpop.f32.mrb[17].mxu0 }
 0x469   : > { %v5230_v3 = vpop.f32.mrb[18].mxu1  ;;  %v6386_v7 = vpop.f32.mrb[18].mxu0 }
 0x46a   : > { %v7411_v5 = vadd.f32 %v7410_v61, %v6383_v62  ;;  %v7412_v6 = vadd.f32 %v5230_v3, %v9670_v42  ;;  %v5232_v8 = vpop.f32.mrb[19].mxu1  ;;  %v6388_v0 = vpop.f32.mrb[19].mxu0 }
 0x46c   : > { %6615 = vst.msk [vmem:[%s9680_s7 + $0x40] sm:$0xff] %vm6606_vm0, %v7411_v5  ;;  %v7413_v9 = vadd.f32 %v7412_v6, %v6386_v7  ;;  %5442 = vmatmul.mubr.bf16.gmra.mrb[124].mxu1 %v7252_v1  ;;  %6598 = vmatmul.mubr.bf16.gmra.mrb[124].mxu0 %v7260_v4 }
 0x46e   : > { %6616 = vst.msk [vmem:[%s9680_s7 + $0x48] sm:$0xff] %vm6606_vm0, %v7413_v9 }
 0x46f   : > { %v5235_v10 = vpop.f32.mrb[20].mxu1  ;;  %v6391_v12 = vpop.f32.mrb[20].mxu0 }
 0x470   : > { %v7414_v11 = vadd.f32 %v5235_v10, %v9670_v42  ;;  %v5237_v13 = vpop.f32.mrb[21].mxu1  ;;  %v6393_v14 = vpop.f32.mrb[21].mxu0 }
 0x471   : > { %v5238_v15 = vpop.f32.mrb[22].mxu1  ;;  %v6394_v18 = vpop.f32.mrb[22].mxu0 }
 0x472   : > { %v7415_v16 = vadd.f32 %v7414_v11, %v6391_v12  ;;  %v7416_v17 = vadd.f32 %v5238_v15, %v9670_v42  ;;  %v5240_v19 = vpop.f32.mrb[23].mxu1  ;;  %v6396_v20 = vpop.f32.mrb[23].mxu0 }
 0x474   : > { %6617 = vst.msk [vmem:[%s9680_s7 + $0x50] sm:$0xff] %vm6606_vm0, %v7415_v16  ;;  %v7417_v21 = vadd.f32 %v7416_v17, %v6394_v18 }
 0x476   : > { %6618 = vst.msk [vmem:[%s9680_s7 + $0x58] sm:$0xff] %vm6606_vm0, %v7417_v21 }
 0x477   : > { %v5243_v22 = vpop.f32.mrb[24].mxu1  ;;  %v6399_v24 = vpop.f32.mrb[24].mxu0 }
 0x478   : > { %v7418_v23 = vadd.f32 %v5243_v22, %v9670_v42  ;;  %v5245_v25 = vpop.f32.mrb[25].mxu1  ;;  %v6401_v26 = vpop.f32.mrb[25].mxu0 }
 0x479   : > { %v5246_v27 = vpop.f32.mrb[26].mxu1  ;;  %v6402_v30 = vpop.f32.mrb[26].mxu0 }
 0x47a   : > { %v7419_v28 = vadd.f32 %v7418_v23, %v6399_v24  ;;  %v7420_v29 = vadd.f32 %v5246_v27, %v9670_v42  ;;  %v5248_v31 = vpop.f32.mrb[27].mxu1  ;;  %v6404_v32 = vpop.f32.mrb[27].mxu0 }
 0x47c   : > { %6619 = vst.msk [vmem:[%s9680_s7 + $0x60] sm:$0xff] %vm6606_vm0, %v7419_v28  ;;  %v7421_v33 = vadd.f32 %v7420_v29, %v6402_v30 }
 0x47e   : > { %6620 = vst.msk [vmem:[%s9680_s7 + $0x68] sm:$0xff] %vm6606_vm0, %v7421_v33 }
 0x47f   : > { %v5251_v34 = vpop.f32.mrb[28].mxu1  ;;  %v6407_v36 = vpop.f32.mrb[28].mxu0 }
 0x480   : > { %v7422_v35 = vadd.f32 %v5251_v34, %v9670_v42  ;;  %v5253_v37 = vpop.f32.mrb[29].mxu1  ;;  %v6409_v38 = vpop.f32.mrb[29].mxu0 }
 0x481   : > { %v5254_v39 = vpop.f32.mrb[30].mxu1  ;;  %v6410_v43 = vpop.f32.mrb[30].mxu0 }
 0x482   : > { %v7423_v40 = vadd.f32 %v7422_v35, %v6407_v36  ;;  %v7424_v41 = vadd.f32 %v5254_v39, %v9670_v42  ;;  %v5256_v44 = vpop.f32.mrb[31].mxu1  ;;  %v6412_v45 = vpop.f32.mrb[31].mxu0 }
 0x484   : > { %6621 = vst.msk [vmem:[%s9680_s7 + $0x70] sm:$0xff] %vm6606_vm0, %v7423_v40  ;;  %v7425_v46 = vadd.f32 %v7424_v41, %v6410_v43 }
 0x486   : > { %6622 = vst.msk [vmem:[%s9680_s7 + $0x78] sm:$0xff] %vm6606_vm0, %v7425_v46 }
 0x487   : > { %v5259_v47 = vpop.f32.mrb[32].mxu1  ;;  %v6415_v49 = vpop.f32.mrb[32].mxu0 }
 0x488   : > { %v7426_v48 = vadd.f32 %v5259_v47, %v9670_v42  ;;  %v5261_v50 = vpop.f32.mrb[33].mxu1  ;;  %v6417_v51 = vpop.f32.mrb[33].mxu0 }
 0x489   : > { %v5262_v52 = vpop.f32.mrb[34].mxu1  ;;  %v6418_v55 = vpop.f32.mrb[34].mxu0 }
 0x48a   : > { %v7427_v53 = vadd.f32 %v7426_v48, %v6415_v49  ;;  %v7428_v54 = vadd.f32 %v5262_v52, %v9670_v42  ;;  %v5264_v56 = vpop.f32.mrb[35].mxu1  ;;  %v6420_v57 = vpop.f32.mrb[35].mxu0 }
 0x48c   : > { %6623 = vst.msk [vmem:[%s9680_s7 + $0x80] sm:$0xff] %vm6606_vm0, %v7427_v53  ;;  %v7429_v58 = vadd.f32 %v7428_v54, %v6418_v55 }
 0x48e   : > { %6624 = vst.msk [vmem:[%s9680_s7 + $0x88] sm:$0xff] %vm6606_vm0, %v7429_v58 }
 0x48f   : > { %v5267_v59 = vpop.f32.mrb[36].mxu1  ;;  %v6423_v61 = vpop.f32.mrb[36].mxu0 }
 0x490   : > { %v7430_v60 = vadd.f32 %v5267_v59, %v9670_v42  ;;  %v5269_v62 = vpop.f32.mrb[37].mxu1  ;;  %v6425_v63 = vpop.f32.mrb[37].mxu0 }
 0x491   : > { %v5270_v1 = vpop.f32.mrb[38].mxu1  ;;  %v6426_v4 = vpop.f32.mrb[38].mxu0 }
 0x492   : > { %v7431_v2 = vadd.f32 %v7430_v60, %v6423_v61  ;;  %v7432_v3 = vadd.f32 %v5270_v1, %v9670_v42  ;;  %v5272_v5 = vpop.f32.mrb[39].mxu1  ;;  %v6428_v6 = vpop.f32.mrb[39].mxu0 }
 0x494   : > { %6625 = vst.msk [vmem:[%s9680_s7 + $0x90] sm:$0xff] %vm6606_vm0, %v7431_v2  ;;  %v7433_v7 = vadd.f32 %v7432_v3, %v6426_v4 }
 0x496   : > { %6626 = vst.msk [vmem:[%s9680_s7 + $0x98] sm:$0xff] %vm6606_vm0, %v7433_v7 }
 0x497   : > { %v5275_v8 = vpop.f32.mrb[40].mxu1  ;;  %v6431_v9 = vpop.f32.mrb[40].mxu0 }
 0x498   : > { %v7434_v0 = vadd.f32 %v5275_v8, %v9670_v42  ;;  %v5277_v10 = vpop.f32.mrb[41].mxu1  ;;  %v6433_v11 = vpop.f32.mrb[41].mxu0 }
 0x499   : > { %v5278_v12 = vpop.f32.mrb[42].mxu1  ;;  %v6434_v15 = vpop.f32.mrb[42].mxu0 }
 0x49a   : > { %v7435_v13 = vadd.f32 %v7434_v0, %v6431_v9  ;;  %v7436_v14 = vadd.f32 %v5278_v12, %v9670_v42  ;;  %v5280_v16 = vpop.f32.mrb[43].mxu1  ;;  %v6436_v17 = vpop.f32.mrb[43].mxu0 }
 0x49c   : > { %6627 = vst.msk [vmem:[%s9680_s7 + $0xa0] sm:$0xff] %vm6606_vm0, %v7435_v13  ;;  %v7437_v18 = vadd.f32 %v7436_v14, %v6434_v15 }
 0x49e   : > { %6628 = vst.msk [vmem:[%s9680_s7 + $0xa8] sm:$0xff] %vm6606_vm0, %v7437_v18 }
 0x49f   : > { %v5283_v19 = vpop.f32.mrb[44].mxu1  ;;  %v6439_v21 = vpop.f32.mrb[44].mxu0 }
 0x4a0   : > { %v7438_v20 = vadd.f32 %v5283_v19, %v9670_v42  ;;  %v5285_v22 = vpop.f32.mrb[45].mxu1  ;;  %v6441_v23 = vpop.f32.mrb[45].mxu0 }
 0x4a1   : > { %v5286_v24 = vpop.f32.mrb[46].mxu1  ;;  %v6442_v27 = vpop.f32.mrb[46].mxu0 }
 0x4a2   : > { %v7439_v25 = vadd.f32 %v7438_v20, %v6439_v21  ;;  %v7440_v26 = vadd.f32 %v5286_v24, %v9670_v42  ;;  %v5288_v28 = vpop.f32.mrb[47].mxu1  ;;  %v6444_v29 = vpop.f32.mrb[47].mxu0 }
 0x4a4   : > { %6629 = vst.msk [vmem:[%s9680_s7 + $0xb0] sm:$0xff] %vm6606_vm0, %v7439_v25  ;;  %v7441_v30 = vadd.f32 %v7440_v26, %v6442_v27 }
 0x4a6   : > { %6630 = vst.msk [vmem:[%s9680_s7 + $0xb8] sm:$0xff] %vm6606_vm0, %v7441_v30 }
 0x4a7   : > { %v5291_v31 = vpop.f32.mrb[48].mxu1  ;;  %v6447_v33 = vpop.f32.mrb[48].mxu0 }
 0x4a8   : > { %v7442_v32 = vadd.f32 %v5291_v31, %v9670_v42  ;;  %v5293_v34 = vpop.f32.mrb[49].mxu1  ;;  %v6449_v35 = vpop.f32.mrb[49].mxu0 }
 0x4a9   : > { %v5294_v36 = vpop.f32.mrb[50].mxu1  ;;  %v6450_v39 = vpop.f32.mrb[50].mxu0 }
 0x4aa   : > { %v7443_v37 = vadd.f32 %v7442_v32, %v6447_v33  ;;  %v7444_v38 = vadd.f32 %v5294_v36, %v9670_v42  ;;  %v5296_v40 = vpop.f32.mrb[51].mxu1  ;;  %v6452_v41 = vpop.f32.mrb[51].mxu0 }
 0x4ac   : > { %6631 = vst.msk [vmem:[%s9680_s7 + $0xc0] sm:$0xff] %vm6606_vm0, %v7443_v37  ;;  %v7445_v43 = vadd.f32 %v7444_v38, %v6450_v39 }
 0x4ae   : > { %6632 = vst.msk [vmem:[%s9680_s7 + $0xc8] sm:$0xff] %vm6606_vm0, %v7445_v43 }
 0x4af   : > { %v5299_v44 = vpop.f32.mrb[52].mxu1  ;;  %v6455_v46 = vpop.f32.mrb[52].mxu0 }
 0x4b0   : > { %v7446_v45 = vadd.f32 %v5299_v44, %v9670_v42  ;;  %v5301_v47 = vpop.f32.mrb[53].mxu1  ;;  %v6457_v48 = vpop.f32.mrb[53].mxu0 }
 0x4b1   : > { %v5302_v49 = vpop.f32.mrb[54].mxu1  ;;  %v6458_v52 = vpop.f32.mrb[54].mxu0 }
 0x4b2   : > { %v7447_v50 = vadd.f32 %v7446_v45, %v6455_v46  ;;  %v7448_v51 = vadd.f32 %v5302_v49, %v9670_v42  ;;  %v5304_v53 = vpop.f32.mrb[55].mxu1  ;;  %v6460_v54 = vpop.f32.mrb[55].mxu0 }
 0x4b4   : > { %6633 = vst.msk [vmem:[%s9680_s7 + $0xd0] sm:$0xff] %vm6606_vm0, %v7447_v50  ;;  %v7449_v55 = vadd.f32 %v7448_v51, %v6458_v52 }
 0x4b6   : > { %6634 = vst.msk [vmem:[%s9680_s7 + $0xd8] sm:$0xff] %vm6606_vm0, %v7449_v55 }
 0x4b7   : > { %v5307_v56 = vpop.f32.mrb[56].mxu1  ;;  %v6463_v58 = vpop.f32.mrb[56].mxu0 }
 0x4b8   : > { %v7450_v57 = vadd.f32 %v5307_v56, %v9670_v42  ;;  %v5309_v59 = vpop.f32.mrb[57].mxu1  ;;  %v6465_v60 = vpop.f32.mrb[57].mxu0 }
 0x4b9   : > { %v5310_v61 = vpop.f32.mrb[58].mxu1  ;;  %v6466_v1 = vpop.f32.mrb[58].mxu0 }
 0x4ba   : > { %v7451_v62 = vadd.f32 %v7450_v57, %v6463_v58  ;;  %v7452_v63 = vadd.f32 %v5310_v61, %v9670_v42  ;;  %v5312_v2 = vpop.f32.mrb[59].mxu1  ;;  %v6468_v3 = vpop.f32.mrb[59].mxu0 }
 0x4bc   : > { %6635 = vst.msk [vmem:[%s9680_s7 + $0xe0] sm:$0xff] %vm6606_vm0, %v7451_v62  ;;  %v7453_v4 = vadd.f32 %v7452_v63, %v6466_v1 }
 0x4be   : > { %6636 = vst.msk [vmem:[%s9680_s7 + $0xe8] sm:$0xff] %vm6606_vm0, %v7453_v4 }
 0x4bf   : > { %v5315_v5 = vpop.f32.mrb[60].mxu1  ;;  %v6471_v7 = vpop.f32.mrb[60].mxu0 }
 0x4c0   : > { %v7454_v6 = vadd.f32 %v5315_v5, %v9670_v42  ;;  %v5317_v8 = vpop.f32.mrb[61].mxu1  ;;  %v6473_v0 = vpop.f32.mrb[61].mxu0 }
 0x4c1   : > { %v5318_v9 = vpop.f32.mrb[62].mxu1  ;;  %v6474_v12 = vpop.f32.mrb[62].mxu0 }
 0x4c2   : > { %v7455_v10 = vadd.f32 %v7454_v6, %v6471_v7  ;;  %v7456_v11 = vadd.f32 %v5318_v9, %v9670_v42  ;;  %v5320_v13 = vpop.f32.mrb[63].mxu1  ;;  %v6476_v14 = vpop.f32.mrb[63].mxu0 }
 0x4c4   : > { %6637 = vst.msk [vmem:[%s9680_s7 + $0xf0] sm:$0xff] %vm6606_vm0, %v7455_v10  ;;  %v7457_v15 = vadd.f32 %v7456_v11, %v6474_v12 }
 0x4c6   : > { %6638 = vst.msk [vmem:[%s9680_s7 + $0xf8] sm:$0xff] %vm6606_vm0, %v7457_v15 }
 0x4c7   : > { %v5323_v16 = vpop.f32.mrb[64].mxu1  ;;  %v6479_v18 = vpop.f32.mrb[64].mxu0 }
 0x4c8   : > { %v7458_v17 = vadd.f32 %v5323_v16, %v9670_v42  ;;  %v5325_v19 = vpop.f32.mrb[65].mxu1  ;;  %v6481_v20 = vpop.f32.mrb[65].mxu0 }
 0x4c9   : > { %v5326_v21 = vpop.f32.mrb[66].mxu1  ;;  %v6482_v24 = vpop.f32.mrb[66].mxu0 }
 0x4ca   : > { %v7459_v22 = vadd.f32 %v7458_v17, %v6479_v18  ;;  %v7460_v23 = vadd.f32 %v5326_v21, %v9670_v42  ;;  %v5328_v25 = vpop.f32.mrb[67].mxu1  ;;  %v6484_v26 = vpop.f32.mrb[67].mxu0 }
 0x4cc   : > { %6639 = vst.msk [vmem:[%s9680_s7 + $0x100] sm:$0xff] %vm6606_vm0, %v7459_v22  ;;  %v7461_v27 = vadd.f32 %v7460_v23, %v6482_v24 }
 0x4ce   : > { %6640 = vst.msk [vmem:[%s9680_s7 + $0x108] sm:$0xff] %vm6606_vm0, %v7461_v27 }
 0x4cf   : > { %v5331_v28 = vpop.f32.mrb[68].mxu1  ;;  %v6487_v30 = vpop.f32.mrb[68].mxu0 }
 0x4d0   : > { %v7462_v29 = vadd.f32 %v5331_v28, %v9670_v42  ;;  %v5333_v31 = vpop.f32.mrb[69].mxu1  ;;  %v6489_v32 = vpop.f32.mrb[69].mxu0 }
 0x4d1   : > { %v5334_v33 = vpop.f32.mrb[70].mxu1  ;;  %v6490_v36 = vpop.f32.mrb[70].mxu0 }
 0x4d2   : > { %v7463_v34 = vadd.f32 %v7462_v29, %v6487_v30  ;;  %v7464_v35 = vadd.f32 %v5334_v33, %v9670_v42  ;;  %v5336_v37 = vpop.f32.mrb[71].mxu1  ;;  %v6492_v38 = vpop.f32.mrb[71].mxu0 }
 0x4d4   : > { %6641 = vst.msk [vmem:[%s9680_s7 + $0x110] sm:$0xff] %vm6606_vm0, %v7463_v34  ;;  %v7465_v39 = vadd.f32 %v7464_v35, %v6490_v36 }
 0x4d6   : > { %6642 = vst.msk [vmem:[%s9680_s7 + $0x118] sm:$0xff] %vm6606_vm0, %v7465_v39 }
 0x4d7   : > { %v5339_v40 = vpop.f32.mrb[72].mxu1  ;;  %v6495_v43 = vpop.f32.mrb[72].mxu0 }
 0x4d8   : > { %v7466_v41 = vadd.f32 %v5339_v40, %v9670_v42  ;;  %v5341_v44 = vpop.f32.mrb[73].mxu1  ;;  %v6497_v45 = vpop.f32.mrb[73].mxu0 }
 0x4d9   : > { %v5342_v46 = vpop.f32.mrb[74].mxu1  ;;  %v6498_v49 = vpop.f32.mrb[74].mxu0 }
 0x4da   : > { %v7467_v47 = vadd.f32 %v7466_v41, %v6495_v43  ;;  %v7468_v48 = vadd.f32 %v5342_v46, %v9670_v42  ;;  %v5344_v50 = vpop.f32.mrb[75].mxu1  ;;  %v6500_v51 = vpop.f32.mrb[75].mxu0 }
 0x4dc   : > { %6643 = vst.msk [vmem:[%s9680_s7 + $0x120] sm:$0xff] %vm6606_vm0, %v7467_v47  ;;  %v7469_v52 = vadd.f32 %v7468_v48, %v6498_v49 }
 0x4de   : > { %6644 = vst.msk [vmem:[%s9680_s7 + $0x128] sm:$0xff] %vm6606_vm0, %v7469_v52 }
 0x4df   : > { %v5347_v53 = vpop.f32.mrb[76].mxu1  ;;  %v6503_v55 = vpop.f32.mrb[76].mxu0 }
 0x4e0   : > { %v7470_v54 = vadd.f32 %v5347_v53, %v9670_v42  ;;  %v5349_v56 = vpop.f32.mrb[77].mxu1  ;;  %v6505_v57 = vpop.f32.mrb[77].mxu0 }
 0x4e1   : > { %v5350_v58 = vpop.f32.mrb[78].mxu1  ;;  %v6506_v61 = vpop.f32.mrb[78].mxu0 }
 0x4e2   : > { %v7471_v59 = vadd.f32 %v7470_v54, %v6503_v55  ;;  %v7472_v60 = vadd.f32 %v5350_v58, %v9670_v42  ;;  %v5352_v62 = vpop.f32.mrb[79].mxu1  ;;  %v6508_v63 = vpop.f32.mrb[79].mxu0 }
 0x4e4   : > { %6645 = vst.msk [vmem:[%s9680_s7 + $0x130] sm:$0xff] %vm6606_vm0, %v7471_v59  ;;  %v7473_v1 = vadd.f32 %v7472_v60, %v6506_v61 }
 0x4e6   : > { %6646 = vst.msk [vmem:[%s9680_s7 + $0x138] sm:$0xff] %vm6606_vm0, %v7473_v1 }
 0x4e7   : > { %v5355_v2 = vpop.f32.mrb[80].mxu1  ;;  %v6511_v4 = vpop.f32.mrb[80].mxu0 }
 0x4e8   : > { %v7474_v3 = vadd.f32 %v5355_v2, %v9670_v42  ;;  %v5357_v5 = vpop.f32.mrb[81].mxu1  ;;  %v6513_v6 = vpop.f32.mrb[81].mxu0 }
 0x4e9   : > { %v5358_v7 = vpop.f32.mrb[82].mxu1  ;;  %v6514_v9 = vpop.f32.mrb[82].mxu0 }
 0x4ea   : > { %v7475_v8 = vadd.f32 %v7474_v3, %v6511_v4  ;;  %v7476_v0 = vadd.f32 %v5358_v7, %v9670_v42  ;;  %v5360_v10 = vpop.f32.mrb[83].mxu1  ;;  %v6516_v11 = vpop.f32.mrb[83].mxu0 }
 0x4ec   : > { %6647 = vst.msk [vmem:[%s9680_s7 + $0x140] sm:$0xff] %vm6606_vm0, %v7475_v8  ;;  %v7477_v12 = vadd.f32 %v7476_v0, %v6514_v9 }
 0x4ee   : > { %6648 = vst.msk [vmem:[%s9680_s7 + $0x148] sm:$0xff] %vm6606_vm0, %v7477_v12 }
 0x4ef   : > { %v5363_v13 = vpop.f32.mrb[84].mxu1  ;;  %v6519_v15 = vpop.f32.mrb[84].mxu0 }
 0x4f0   : > { %v7478_v14 = vadd.f32 %v5363_v13, %v9670_v42  ;;  %v5365_v16 = vpop.f32.mrb[85].mxu1  ;;  %v6521_v17 = vpop.f32.mrb[85].mxu0 }
 0x4f1   : > { %v5366_v18 = vpop.f32.mrb[86].mxu1  ;;  %v6522_v21 = vpop.f32.mrb[86].mxu0 }
 0x4f2   : > { %v7479_v19 = vadd.f32 %v7478_v14, %v6519_v15  ;;  %v7480_v20 = vadd.f32 %v5366_v18, %v9670_v42  ;;  %v5368_v22 = vpop.f32.mrb[87].mxu1  ;;  %v6524_v23 = vpop.f32.mrb[87].mxu0 }
 0x4f4   : > { %6649 = vst.msk [vmem:[%s9680_s7 + $0x150] sm:$0xff] %vm6606_vm0, %v7479_v19  ;;  %v7481_v24 = vadd.f32 %v7480_v20, %v6522_v21 }
 0x4f6   : > { %6650 = vst.msk [vmem:[%s9680_s7 + $0x158] sm:$0xff] %vm6606_vm0, %v7481_v24 }
 0x4f7   : > { %v5371_v25 = vpop.f32.mrb[88].mxu1  ;;  %v6527_v27 = vpop.f32.mrb[88].mxu0 }
 0x4f8   : > { %v7482_v26 = vadd.f32 %v5371_v25, %v9670_v42  ;;  %v5373_v28 = vpop.f32.mrb[89].mxu1  ;;  %v6529_v29 = vpop.f32.mrb[89].mxu0 }
 0x4f9   : > { %v5374_v30 = vpop.f32.mrb[90].mxu1  ;;  %v6530_v33 = vpop.f32.mrb[90].mxu0 }
 0x4fa   : > { %v7483_v31 = vadd.f32 %v7482_v26, %v6527_v27  ;;  %v7484_v32 = vadd.f32 %v5374_v30, %v9670_v42  ;;  %v5376_v34 = vpop.f32.mrb[91].mxu1  ;;  %v6532_v35 = vpop.f32.mrb[91].mxu0 }
 0x4fc   : > { %6651 = vst.msk [vmem:[%s9680_s7 + $0x160] sm:$0xff] %vm6606_vm0, %v7483_v31  ;;  %v7485_v36 = vadd.f32 %v7484_v32, %v6530_v33 }
 0x4fe   : > { %6652 = vst.msk [vmem:[%s9680_s7 + $0x168] sm:$0xff] %vm6606_vm0, %v7485_v36 }
 0x4ff   : > { %v5379_v37 = vpop.f32.mrb[92].mxu1  ;;  %v6535_v39 = vpop.f32.mrb[92].mxu0 }
 0x500   : > { %v7486_v38 = vadd.f32 %v5379_v37, %v9670_v42  ;;  %v5381_v40 = vpop.f32.mrb[93].mxu1  ;;  %v6537_v41 = vpop.f32.mrb[93].mxu0 }
 0x501   : > { %v5382_v43 = vpop.f32.mrb[94].mxu1  ;;  %v6538_v46 = vpop.f32.mrb[94].mxu0 }
 0x502   : > { %v7487_v44 = vadd.f32 %v7486_v38, %v6535_v39  ;;  %v7488_v45 = vadd.f32 %v5382_v43, %v9670_v42  ;;  %v5384_v47 = vpop.f32.mrb[95].mxu1  ;;  %v6540_v48 = vpop.f32.mrb[95].mxu0 }
 0x504   : > { %6653 = vst.msk [vmem:[%s9680_s7 + $0x170] sm:$0xff] %vm6606_vm0, %v7487_v44  ;;  %v7489_v49 = vadd.f32 %v7488_v45, %v6538_v46 }
 0x506   : > { %6654 = vst.msk [vmem:[%s9680_s7 + $0x178] sm:$0xff] %vm6606_vm0, %v7489_v49 }
 0x507   : > { %v5387_v50 = vpop.f32.mrb[96].mxu1  ;;  %v6543_v52 = vpop.f32.mrb[96].mxu0 }
 0x508   : > { %v7490_v51 = vadd.f32 %v5387_v50, %v9670_v42  ;;  %v5389_v53 = vpop.f32.mrb[97].mxu1  ;;  %v6545_v54 = vpop.f32.mrb[97].mxu0 }
 0x509   : > { %v5390_v55 = vpop.f32.mrb[98].mxu1  ;;  %v6546_v58 = vpop.f32.mrb[98].mxu0 }
 0x50a   : > { %v7491_v56 = vadd.f32 %v7490_v51, %v6543_v52  ;;  %v7492_v57 = vadd.f32 %v5390_v55, %v9670_v42  ;;  %v5392_v59 = vpop.f32.mrb[99].mxu1  ;;  %v6548_v60 = vpop.f32.mrb[99].mxu0 }
 0x50c   : > { %6655 = vst.msk [vmem:[%s9680_s7 + $0x180] sm:$0xff] %vm6606_vm0, %v7491_v56  ;;  %v7493_v61 = vadd.f32 %v7492_v57, %v6546_v58 }
 0x50e   : > { %6656 = vst.msk [vmem:[%s9680_s7 + $0x188] sm:$0xff] %vm6606_vm0, %v7493_v61 }
 0x50f   : > { %v5395_v62 = vpop.f32.mrb[100].mxu1  ;;  %v6551_v1 = vpop.f32.mrb[100].mxu0 }
 0x510   : > { %v7494_v63 = vadd.f32 %v5395_v62, %v9670_v42  ;;  %v5397_v2 = vpop.f32.mrb[101].mxu1  ;;  %v6553_v3 = vpop.f32.mrb[101].mxu0 }
 0x511   : > { %v5398_v4 = vpop.f32.mrb[102].mxu1  ;;  %v6554_v7 = vpop.f32.mrb[102].mxu0 }
 0x512   : > { %v7495_v5 = vadd.f32 %v7494_v63, %v6551_v1  ;;  %v7496_v6 = vadd.f32 %v5398_v4, %v9670_v42  ;;  %v5400_v8 = vpop.f32.mrb[103].mxu1  ;;  %v6556_v0 = vpop.f32.mrb[103].mxu0 }
 0x514   : > { %6657 = vst.msk [vmem:[%s9680_s7 + $0x190] sm:$0xff] %vm6606_vm0, %v7495_v5  ;;  %v7497_v9 = vadd.f32 %v7496_v6, %v6554_v7 }
 0x516   : > { %6658 = vst.msk [vmem:[%s9680_s7 + $0x198] sm:$0xff] %vm6606_vm0, %v7497_v9 }
 0x517   : > { %v5403_v10 = vpop.f32.mrb[104].mxu1  ;;  %v6559_v12 = vpop.f32.mrb[104].mxu0 }
 0x518   : > { %v7498_v11 = vadd.f32 %v5403_v10, %v9670_v42  ;;  %v5405_v13 = vpop.f32.mrb[105].mxu1  ;;  %v6561_v14 = vpop.f32.mrb[105].mxu0 }
 0x519   : > { %v5406_v15 = vpop.f32.mrb[106].mxu1  ;;  %v6562_v18 = vpop.f32.mrb[106].mxu0 }
 0x51a   : > { %v7499_v16 = vadd.f32 %v7498_v11, %v6559_v12  ;;  %v7500_v17 = vadd.f32 %v5406_v15, %v9670_v42  ;;  %v5408_v19 = vpop.f32.mrb[107].mxu1  ;;  %v6564_v20 = vpop.f32.mrb[107].mxu0 }
 0x51c   : > { %6659 = vst.msk [vmem:[%s9680_s7 + $0x1a0] sm:$0xff] %vm6606_vm0, %v7499_v16  ;;  %v7501_v21 = vadd.f32 %v7500_v17, %v6562_v18 }
 0x51e   : > { %6660 = vst.msk [vmem:[%s9680_s7 + $0x1a8] sm:$0xff] %vm6606_vm0, %v7501_v21 }
 0x51f   : > { %v5411_v22 = vpop.f32.mrb[108].mxu1  ;;  %v6567_v24 = vpop.f32.mrb[108].mxu0 }
 0x520   : > { %v7502_v23 = vadd.f32 %v5411_v22, %v9670_v42  ;;  %v5413_v25 = vpop.f32.mrb[109].mxu1  ;;  %v6569_v26 = vpop.f32.mrb[109].mxu0 }
 0x521   : > { %v5414_v27 = vpop.f32.mrb[110].mxu1  ;;  %v6570_v30 = vpop.f32.mrb[110].mxu0 }
 0x522   : > { %v7503_v28 = vadd.f32 %v7502_v23, %v6567_v24  ;;  %v7504_v29 = vadd.f32 %v5414_v27, %v9670_v42  ;;  %v5416_v31 = vpop.f32.mrb[111].mxu1  ;;  %v6572_v32 = vpop.f32.mrb[111].mxu0 }
 0x524   : > { %6661 = vst.msk [vmem:[%s9680_s7 + $0x1b0] sm:$0xff] %vm6606_vm0, %v7503_v28  ;;  %v7505_v33 = vadd.f32 %v7504_v29, %v6570_v30 }
 0x526   : > { %6662 = vst.msk [vmem:[%s9680_s7 + $0x1b8] sm:$0xff] %vm6606_vm0, %v7505_v33 }
 0x527   : > { %v5419_v34 = vpop.f32.mrb[112].mxu1  ;;  %v6575_v36 = vpop.f32.mrb[112].mxu0 }
 0x528   : > { %v7506_v35 = vadd.f32 %v5419_v34, %v9670_v42  ;;  %v5421_v37 = vpop.f32.mrb[113].mxu1  ;;  %v6577_v38 = vpop.f32.mrb[113].mxu0 }
 0x529   : > { %v5422_v39 = vpop.f32.mrb[114].mxu1  ;;  %v6578_v43 = vpop.f32.mrb[114].mxu0 }
 0x52a   : > { %v7507_v40 = vadd.f32 %v7506_v35, %v6575_v36  ;;  %v7508_v41 = vadd.f32 %v5422_v39, %v9670_v42  ;;  %v5424_v44 = vpop.f32.mrb[115].mxu1  ;;  %v6580_v45 = vpop.f32.mrb[115].mxu0 }
 0x52c   : > { %6663 = vst.msk [vmem:[%s9680_s7 + $0x1c0] sm:$0xff] %vm6606_vm0, %v7507_v40  ;;  %v7509_v46 = vadd.f32 %v7508_v41, %v6578_v43 }
 0x52e   : > { %6664 = vst.msk [vmem:[%s9680_s7 + $0x1c8] sm:$0xff] %vm6606_vm0, %v7509_v46 }
 0x52f   : > { %v5427_v47 = vpop.f32.mrb[116].mxu1  ;;  %v6583_v49 = vpop.f32.mrb[116].mxu0 }
 0x530   : > { %v7510_v48 = vadd.f32 %v5427_v47, %v9670_v42  ;;  %v5429_v50 = vpop.f32.mrb[117].mxu1  ;;  %v6585_v51 = vpop.f32.mrb[117].mxu0 }
 0x531   : > { %v5430_v52 = vpop.f32.mrb[118].mxu1  ;;  %v6586_v55 = vpop.f32.mrb[118].mxu0 }
 0x532   : > { %v7511_v53 = vadd.f32 %v7510_v48, %v6583_v49  ;;  %v7512_v54 = vadd.f32 %v5430_v52, %v9670_v42  ;;  %v5432_v56 = vpop.f32.mrb[119].mxu1  ;;  %v6588_v57 = vpop.f32.mrb[119].mxu0 }
 0x534   : > { %6665 = vst.msk [vmem:[%s9680_s7 + $0x1d0] sm:$0xff] %vm6606_vm0, %v7511_v53  ;;  %v7513_v58 = vadd.f32 %v7512_v54, %v6586_v55 }
 0x536   : > { %6666 = vst.msk [vmem:[%s9680_s7 + $0x1d8] sm:$0xff] %vm6606_vm0, %v7513_v58 }
 0x537   : > { %v5435_v59 = vpop.f32.mrb[120].mxu1  ;;  %v6591_v61 = vpop.f32.mrb[120].mxu0 }
 0x538   : > { %v7514_v60 = vadd.f32 %v5435_v59, %v9670_v42  ;;  %v5437_v62 = vpop.f32.mrb[121].mxu1  ;;  %v6593_v63 = vpop.f32.mrb[121].mxu0 }
 0x539   : > { %v5438_v1 = vpop.f32.mrb[122].mxu1  ;;  %v6594_v4 = vpop.f32.mrb[122].mxu0 }
 0x53a   : > { %v7515_v2 = vadd.f32 %v7514_v60, %v6591_v61  ;;  %v7516_v3 = vadd.f32 %v5438_v1, %v9670_v42  ;;  %v5440_v5 = vpop.f32.mrb[123].mxu1  ;;  %v6596_v6 = vpop.f32.mrb[123].mxu0 }
 0x53c   : > { %6667 = vst.msk [vmem:[%s9680_s7 + $0x1e0] sm:$0xff] %vm6606_vm0, %v7515_v2  ;;  %v7517_v7 = vadd.f32 %v7516_v3, %v6594_v4 }
 0x53e   : > { %6668 = vst.msk [vmem:[%s9680_s7 + $0x1e8] sm:$0xff] %vm6606_vm0, %v7517_v7 }
 0x53f   : > { %v5443_v8 = vpop.f32.mrb[124].mxu1  ;;  %v6599_v9 = vpop.f32.mrb[124].mxu0 }
 0x540   : > { %v7518_v0 = vadd.f32 %v5443_v8, %v9670_v42  ;;  %v5445_v10 = vpop.f32.mrb[125].mxu1  ;;  %v6601_v11 = vpop.f32.mrb[125].mxu0 }
 0x541   : > { %v5446_v12 = vpop.f32.mrb[126].mxu1  ;;  %v6602_v15 = vpop.f32.mrb[126].mxu0 }
 0x542   : > { %v7519_v13 = vadd.f32 %v7518_v0, %v6599_v9  ;;  %v7520_v14 = vadd.f32 %v5446_v12, %v9670_v42  ;;  %v5448_v16 = vpop.f32.mrb[127].mxu1  ;;  %v6604_v17 = vpop.f32.mrb[127].mxu0 }
 0x544   : > { %6669 = vst.msk [vmem:[%s9680_s7 + $0x1f0] sm:$0xff] %vm6606_vm0, %v7519_v13  ;;  %v7521_v18 = vadd.f32 %v7520_v14, %v6602_v15 }
 0x546   : > { %6670 = vst.msk [vmem:[%s9680_s7 + $0x1f8] sm:$0xff] %vm6606_vm0, %v7521_v18 }
 0x547 PF: > { %p14_p8 = scmp.ge.s32.totalorder %s8573_s18, 4   ;;  %s9905_s14 = smov %s8516_s15 }
 0x548   : > { %s9906_s15 = smov %s8520_s16  ;;  %s9907_s16 = smov %s8583_s21 }
 0x549   : > { %s9908_s17 = smov %s8573_s18  ;;  %16 = sbr.rel (!%p14_p8) target bundleno = 5 (0x5), region = 72 }
 0x550   :  { %6693 = vsyncpa [#allocation4], 1 }
 0x551   :  { %6695 = vsyncpa [#allocation4 + $0x1], 1 }

</bundles_post_ra>
